<compile_context>
chip_gen: v6e
topology: v6e:2x2x1
jax: 0.10.0
libtpu: 0.0.40
codegen_flags: <defaults>
</compile_context>

<pallas_src>
import functools
import math

import jax
import jax.numpy as jnp
from jax.experimental import pallas as pl
from jax.experimental.pallas import tpu as pltpu


# ------------------------------- kernel math --------------------------------

def _layernorm(h, gamma, beta, eps=1e-5):
    """Two-pass (mean-centred) LayerNorm; gamma*rsqrt folded into a single scale."""
    mean = jnp.mean(h, axis=-1, keepdims=True)
    c = h - mean
    var = jnp.mean(c * c, axis=-1, keepdims=True)
    scale = gamma * jax.lax.rsqrt(var + eps)
    return c * scale + beta


def _gelu(x, approx):
    if approx:
        # tanh approximation: transcendental runs on the EUP slot instead of a long VALU
        # erf polynomial (use when numerics allow; differs slightly from torch GELU default).
        return jax.nn.gelu(x, approximate=True)
    # exact (erf) GELU, matching torch.nn.GELU(approximate='none')
    return 0.5 * x * (1.0 + jax.lax.erf(x * (1.0 / math.sqrt(2.0))))


def projection_head_kernel(
    x_ref,        # (block_b, D_in)  f32, pipelined over the batch
    wcat_ref,     # (D_in, D_out+H)  compute dtype, whole-array VMEM   [w_skip | w1]
    bcat_ref,     # (1, D_out+H)     f32                               [b_skip | b1]
    w2_ref,       # (H, H)           compute dtype
    w3_ref,       # (H, D_out)       compute dtype
    hp_ref,       # (5, H)           f32: rows = [g1, be1, b2, g2, be2]
    op_ref,       # (3, D_out)       f32: rows = [b3, ls*g3, ls*be3]
    o_ref,        # (block_b, D_out)
    *, d_out, approx_gelu,
):
    cdt = wcat_ref.dtype                  # matmul compute dtype (f32 or bf16)
    x = x_ref[...].astype(cdt)            # cast in-kernel (no wrapper HBM round trip)

    # fused skip + linear1: a single lane-dense MXU pass, f32 accumulation
    hcat = jnp.dot(x, wcat_ref[...], preferred_element_type=jnp.float32) + bcat_ref[...]
    skip = hcat[:, :d_out]
    h = hcat[:, d_out:]

    hp = hp_ref[...]
    op = op_ref[...]

    h = _gelu(_layernorm(h, hp[0:1, :], hp[1:2, :]), approx_gelu)
    # Dropout -> identity (eval)
    h = jnp.dot(h.astype(cdt), w2_ref[...], preferred_element_type=jnp.float32) + hp[2:3, :]
    h = _gelu(_layernorm(h, hp[3:4, :], hp[4:5, :]), approx_gelu)
    # Dropout -> identity (eval)
    h = jnp.dot(h.astype(cdt), w3_ref[...], preferred_element_type=jnp.float32) + op[0:1, :]
    h = _layernorm(h, op[1:2, :], op[2:3, :])   # layer_scale folded into gamma/beta

    o_ref[...] = (skip + h).astype(o_ref.dtype)


# ------------------------------- wrapper -------------------------------------

def _tpu_topology():
    """(vmem_bytes_per_core, tensorcores_per_chip) with conservative fallbacks."""
    vmem_cap = 64 << 20                     # conservative default = v7x per-TC VMEM
    try:
        vmem_cap = int(pltpu.get_tpu_info().vmem_capacity_bytes)
    except Exception:
        pass
    cores = 1                               # v5e / v6e: one TensorCore per chip
    try:
        kind = jax.devices()[0].device_kind.lower()
        if "v7" in kind or "tpu7" in kind:
            cores = 2                       # v7x: two TensorCores per chip
    except Exception:
        pass
    return vmem_cap, cores


def _vmem_budget_bytes(vmem_cap):
    # leave ~8 MiB headroom for compiler internal scratch / semaphores;
    # cap at 100 MiB on 128 MiB parts (v5e/v6e), floor for sanity.
    return int(max(min(vmem_cap - (8 << 20), 100 << 20), 24 << 20))


def _residency_bytes(bb, d_in, h, d_out, w_bytes):
    f32 = 4
    weights = (d_in * (d_out + h) + h * h + h * d_out) * w_bytes      # single-buffered
    small = ((d_out + h) + 5 * h + 3 * d_out + 8 * 128) * f32         # packed biases/LN params
    act_tiles = 2 * bb * (d_in + d_out) * f32                         # double-buffered x / out
    live = 4 * bb * max(h + d_out, 2 * h) * f32                       # live f32 intermediates
    return weights + small + act_tiles + live + (2 << 20)


def _pick_block_b(B, d_in, h, d_out, w_bytes, budget, cores):
    candidates = (512, 256, 128, 64, 32, 16, 8)
    fitting = [bb for bb in candidates
               if _residency_bytes(bb, d_in, h, d_out, w_bytes) <= budget]
    bb = fitting[0] if fitting else 8
    # Only shrink for pipelining on multi-TensorCore parts (>=2 steps per core).
    # On single-core v5e/v6e shrinking only adds ~0.35us per grid step.
    min_steps = 2 * cores if cores > 1 else 1
    while bb > 8 and pl.cdiv(B, bb) < min_steps:
        bb //= 2
    if bb >= B:
        bb = B                              # one full-extent block: no padded sublanes
    return bb


def projection_head_forward(x, params, *, block_b=None, compute_dtype=jnp.bfloat16,
                            out_dtype=None, gelu_approximate=False):
    """x: (B, D_in) f32. params: dict of weights (see init_params).

    compute_dtype: dtype of the matmul inputs (bf16 recommended on v5e/v6e/v7x);
    accumulation, LayerNorm and GELU always run in f32.
    """
    B, D_in = x.shape
    H = params["w1"].shape[1]
    D_out = params["w_skip"].shape[1]
    out_dtype = x.dtype if out_dtype is None else out_dtype
    w_bytes = jnp.dtype(compute_dtype).itemsize

    vmem_cap, cores = _tpu_topology()
    budget = _vmem_budget_bytes(vmem_cap)
    if block_b is None:
        block_b = _pick_block_b(B, D_in, H, D_out, w_bytes, budget, cores)
    nb = pl.cdiv(B, block_b)                 # batch tail handled by masked partial last block

    # ---- operand packing (all grid-invariant, fetched once into VMEM) -------------------
    w_cat = jnp.concatenate([params["w_skip"], params["w1"]], axis=1).astype(compute_dtype)
    b_cat = jnp.concatenate([params["b_skip"], params["b1"]], axis=1).astype(jnp.float32)
    w2 = params["w2"].astype(compute_dtype)
    w3 = params["w3"].astype(compute_dtype)
    hid_params = jnp.concatenate(
        [params["g1"], params["be1"], params["b2"], params["g2"], params["be2"]],
        axis=0).astype(jnp.float32)
    # fold layer_scale into LN3's affine params: ls*(xhat*g3 + be3) == xhat*(ls*g3) + (ls*be3)
    ls = params["layer_scale"][0, 0]
    out_params = jnp.concatenate(
        [params["b3"], params["g3"] * ls, params["be3"] * ls], axis=0).astype(jnp.float32)

    def vmem_full():
        # whole array resident in VMEM for the entire launch (single copy, no re-DMA)
        return pl.BlockSpec(memory_space=pltpu.MemorySpace.VMEM)

    kernel = functools.partial(projection_head_kernel,
                               d_out=D_out, approx_gelu=gelu_approximate)

    return pl.pallas_call(
        kernel,
        out_shape=jax.ShapeDtypeStruct((B, D_out), out_dtype),
        grid_spec=pltpu.PrefetchScalarGridSpec(
            num_scalar_prefetch=0,
            grid=(nb,),
            in_specs=[
                pl.BlockSpec((block_b, D_in), lambda i: (i, 0)),   # x: pipelined over batch
                vmem_full(),   # w_cat
                vmem_full(),   # b_cat
                vmem_full(),   # w2
                vmem_full(),   # w3
                vmem_full(),   # hid_params
                vmem_full(),   # out_params
            ],
            out_specs=pl.BlockSpec((block_b, D_out), lambda i: (i, 0)),
        ),
        compiler_params=pltpu.CompilerParams(
            dimension_semantics=("parallel",),
            vmem_limit_bytes=budget,
        ),
    )(x, w_cat, b_cat, w2, w3, hid_params, out_params)


# ------------------------------- params / reference --------------------------

def init_params(key, input_dim, output_dim, hidden_dim=None):
    if hidden_dim is None:
        hidden_dim = input_dim * 2
    ks = jax.random.split(key, 4)

    def lin(k, fan_in, fan_out):
        kw, kb = jax.random.split(k)
        bound = 1.0 / math.sqrt(fan_in)
        w = jax.random.uniform(kw, (fan_in, fan_out), jnp.float32, -bound, bound)
        b = jax.random.uniform(kb, (1, fan_out), jnp.float32, -bound, bound)
        return w, b

    w_skip, b_skip = lin(ks[0], input_dim, output_dim)
    w1, b1 = lin(ks[1], input_dim, hidden_dim)
    w2, b2 = lin(ks[2], hidden_dim, hidden_dim)
    w3, b3 = lin(ks[3], hidden_dim, output_dim)

    return {
        "w_skip": w_skip, "b_skip": b_skip,
        "layer_scale": jnp.full((1, 1), 1e-4, jnp.float32),
        "w1": w1, "b1": b1,
        "g1": jnp.ones((1, hidden_dim), jnp.float32), "be1": jnp.zeros((1, hidden_dim), jnp.float32),
        "w2": w2, "b2": b2,
        "g2": jnp.ones((1, hidden_dim), jnp.float32), "be2": jnp.zeros((1, hidden_dim), jnp.float32),
        "w3": w3, "b3": b3,
        "g3": jnp.ones((1, output_dim), jnp.float32), "be3": jnp.zeros((1, output_dim), jnp.float32),
    }


def reference_forward(x, p):
    hi = jax.lax.Precision.HIGHEST

    def ln(h, g, b, eps=1e-5):
        m = jnp.mean(h, -1, keepdims=True)
        v = jnp.mean((h - m) ** 2, -1, keepdims=True)
        return (h - m) / jnp.sqrt(v + eps) * g + b

    gelu = lambda z: 0.5 * z * (1.0 + jax.lax.erf(z / math.sqrt(2.0)))
    dot = lambda a, w: jnp.dot(a, w, precision=hi)

    skip = dot(x, p["w_skip"]) + p["b_skip"]
    h = gelu(ln(dot(x, p["w1"]) + p["b1"], p["g1"], p["be1"]))
    h = gelu(ln(dot(h, p["w2"]) + p["b2"], p["g2"], p["be2"]))
    h = ln(dot(h, p["w3"]) + p["b3"], p["g3"], p["be3"])
    return skip + p["layer_scale"][0, 0] * h


# ------------------------------- demo / check --------------------------------

if __name__ == "__main__":
    key = jax.random.PRNGKey(0)
    k_x, k_p = jax.random.split(key)

    # lane-dense feature dims (multiples of 128); small batch per the spec
    B, D_in, D_out = 200, 128, 128
    H = 2 * D_in
    x = jax.random.normal(k_x, (B, D_in), jnp.float32)
    params = init_params(k_p, D_in, D_out, hidden_dim=H)

    ref = reference_forward(x, params)

    # f32 matmul path, auto-picked block — tight numerical check against the reference
    out_f32 = jax.block_until_ready(
        projection_head_forward(x, params, compute_dtype=jnp.float32))
    assert out_f32.shape == (B, D_out)
    assert jnp.allclose(out_f32, ref, atol=2e-3, rtol=2e-3), "f32 mismatch vs reference"

    # explicit block_b=128 exercises the masked partial tail block (200 = 128 + 72 rows)
    out_tail = jax.block_until_ready(
        projection_head_forward(x, params, compute_dtype=jnp.float32, block_b=128))
    assert out_tail.shape == (B, D_out)
    assert jnp.allclose(out_tail, ref, atol=2e-3, rtol=2e-3), "partial-tail mismatch vs reference"

    # bf16 matmul-input path (MXU-peak config for v5e/v6e/v7x) — looser tolerance
    out_bf16 = jax.block_until_ready(
        projection_head_forward(x, params, compute_dtype=jnp.bfloat16))
    assert out_bf16.shape == (B, D_out)
    assert jnp.allclose(out_bf16, ref, atol=3e-2, rtol=3e-2), "bf16 mismatch vs reference"

    print("KERNEL_OK")
</pallas_src>

<mosaic_0001>
module attributes {stable_mosaic.version = 11 : i64} {
  func.func @projection_head_kernel(%arg0: i32, %arg1: memref<200x128xf32, #tpu.memory_space<vmem>>, %arg2: memref<128x384xf32, #tpu.memory_space<vmem>>, %arg3: memref<1x384xf32, #tpu.memory_space<vmem>>, %arg4: memref<256x256xf32, #tpu.memory_space<vmem>>, %arg5: memref<256x128xf32, #tpu.memory_space<vmem>>, %arg6: memref<5x256xf32, #tpu.memory_space<vmem>>, %arg7: memref<3x128xf32, #tpu.memory_space<vmem>>, %arg8: memref<200x128xf32, #tpu.memory_space<vmem>>) attributes {dimension_semantics = [#tpu.dimension_semantics<parallel>], iteration_bounds = array<i64: 1>, scalar_prefetch = 0 : i64, scratch_operands = 0 : i64, tpu.core_type = #tpu.core_type<tc>, window_params = [{transform_indices = @transform_0, window_bounds = array<i64: 200, 128>}, {pipeline_mode = #tpu.pipeline_mode<synchronous>, transform_indices = @transform_1, window_bounds = array<i64: 128, 384>}, {pipeline_mode = #tpu.pipeline_mode<synchronous>, transform_indices = @transform_2, window_bounds = array<i64: 1, 384>}, {pipeline_mode = #tpu.pipeline_mode<synchronous>, transform_indices = @transform_3, window_bounds = array<i64: 256, 256>}, {pipeline_mode = #tpu.pipeline_mode<synchronous>, transform_indices = @transform_4, window_bounds = array<i64: 256, 128>}, {pipeline_mode = #tpu.pipeline_mode<synchronous>, transform_indices = @transform_5, window_bounds = array<i64: 5, 256>}, {pipeline_mode = #tpu.pipeline_mode<synchronous>, transform_indices = @transform_6, window_bounds = array<i64: 3, 128>}, {transform_indices = @transform_7, window_bounds = array<i64: 200, 128>}]} {
    %c0 = arith.constant 0 : index
    %c0_0 = arith.constant 0 : index
    %0 = vector.load %arg1[%c0, %c0_0] : memref<200x128xf32, #tpu.memory_space<vmem>>, vector<200x128xf32>
    %c0_1 = arith.constant 0 : index
    %c0_2 = arith.constant 0 : index
    %1 = vector.load %arg2[%c0_1, %c0_2] : memref<128x384xf32, #tpu.memory_space<vmem>>, vector<128x384xf32>
    %cst = arith.constant dense<0.000000e+00> : vector<200x384xf32>
    %2 = tpu.matmul %0, %1, %cst {dimension_numbers = #tpu.dot_dimension_numbers<[1], [0], [0], [1], [0, 0, 1, 1], [], []>} : vector<200x128xf32>, vector<128x384xf32>, vector<200x384xf32> -> vector<200x384xf32>
    %c0_3 = arith.constant 0 : index
    %c0_4 = arith.constant 0 : index
    %3 = vector.load %arg3[%c0_3, %c0_4] : memref<1x384xf32, #tpu.memory_space<vmem>>, vector<1x384xf32>
    %4 = vector.broadcast %3 : vector<1x384xf32> to vector<200x384xf32>
    %5 = arith.addf %2, %4 : vector<200x384xf32>
    %6 = vector.extract_strided_slice %5 {offsets = [0, 0], sizes = [200, 128], strides = [1, 1]} : vector<200x384xf32> to vector<200x128xf32>
    %7 = vector.extract_strided_slice %5 {offsets = [0, 128], sizes = [200, 256], strides = [1, 1]} : vector<200x384xf32> to vector<200x256xf32>
    %c0_5 = arith.constant 0 : index
    %c0_6 = arith.constant 0 : index
    %8 = vector.load %arg6[%c0_5, %c0_6] : memref<5x256xf32, #tpu.memory_space<vmem>>, vector<5x256xf32>
    %c0_7 = arith.constant 0 : index
    %c0_8 = arith.constant 0 : index
    %9 = vector.load %arg7[%c0_7, %c0_8] : memref<3x128xf32, #tpu.memory_space<vmem>>, vector<3x128xf32>
    %10 = vector.extract_strided_slice %8 {offsets = [0, 0], sizes = [1, 256], strides = [1, 1]} : vector<5x256xf32> to vector<1x256xf32>
    %11 = vector.extract_strided_slice %8 {offsets = [1, 0], sizes = [1, 256], strides = [1, 1]} : vector<5x256xf32> to vector<1x256xf32>
    %cst_9 = arith.constant dense<0.000000e+00> : vector<200xf32>
    %12 = vector.multi_reduction <add>, %7, %cst_9 [1] : vector<200x256xf32> to vector<200xf32>
    %13 = vector.shape_cast %12 : vector<200xf32> to vector<200x1xf32>
    %cst_10 = arith.constant 2.560000e+02 : f32
    %14 = vector.broadcast %cst_10 : f32 to vector<200x1xf32>
    %15 = arith.divf %13, %14 : vector<200x1xf32>
    %16 = vector.broadcast %15 : vector<200x1xf32> to vector<200x256xf32>
    %17 = arith.subf %7, %16 : vector<200x256xf32>
    %18 = arith.mulf %17, %17 : vector<200x256xf32>
    %cst_11 = arith.constant dense<0.000000e+00> : vector<200xf32>
    %19 = vector.multi_reduction <add>, %18, %cst_11 [1] : vector<200x256xf32> to vector<200xf32>
    %20 = vector.shape_cast %19 : vector<200xf32> to vector<200x1xf32>
    %cst_12 = arith.constant 2.560000e+02 : f32
    %21 = vector.broadcast %cst_12 : f32 to vector<200x1xf32>
    %22 = arith.divf %20, %21 : vector<200x1xf32>
    %cst_13 = arith.constant 9.99999974E-6 : f32
    %23 = vector.broadcast %cst_13 : f32 to vector<200x1xf32>
    %24 = arith.addf %22, %23 : vector<200x1xf32>
    %25 = math.rsqrt %24 : vector<200x1xf32>
    %26 = vector.broadcast %10 : vector<1x256xf32> to vector<200x256xf32>
    %27 = vector.broadcast %25 : vector<200x1xf32> to vector<200x256xf32>
    %28 = arith.mulf %26, %27 : vector<200x256xf32>
    %29 = arith.mulf %17, %28 : vector<200x256xf32>
    %30 = vector.broadcast %11 : vector<1x256xf32> to vector<200x256xf32>
    %31 = arith.addf %29, %30 : vector<200x256xf32>
    %cst_14 = arith.constant 5.000000e-01 : f32
    %32 = vector.broadcast %cst_14 : f32 to vector<200x256xf32>
    %33 = arith.mulf %32, %31 : vector<200x256xf32>
    %cst_15 = arith.constant 0.707106769 : f32
    %34 = vector.broadcast %cst_15 : f32 to vector<200x256xf32>
    %35 = arith.mulf %31, %34 : vector<200x256xf32>
    %36 = math.erf %35 : vector<200x256xf32>
    %cst_16 = arith.constant 1.000000e+00 : f32
    %37 = vector.broadcast %cst_16 : f32 to vector<200x256xf32>
    %38 = arith.addf %37, %36 : vector<200x256xf32>
    %39 = arith.mulf %33, %38 : vector<200x256xf32>
    %c0_17 = arith.constant 0 : index
    %c0_18 = arith.constant 0 : index
    %40 = vector.load %arg4[%c0_17, %c0_18] : memref<256x256xf32, #tpu.memory_space<vmem>>, vector<256x256xf32>
    %cst_19 = arith.constant dense<0.000000e+00> : vector<200x256xf32>
    %41 = tpu.matmul %39, %40, %cst_19 {dimension_numbers = #tpu.dot_dimension_numbers<[1], [0], [0], [1], [0, 0, 1, 1], [], []>} : vector<200x256xf32>, vector<256x256xf32>, vector<200x256xf32> -> vector<200x256xf32>
    %42 = vector.extract_strided_slice %8 {offsets = [2, 0], sizes = [1, 256], strides = [1, 1]} : vector<5x256xf32> to vector<1x256xf32>
    %43 = vector.broadcast %42 : vector<1x256xf32> to vector<200x256xf32>
    %44 = arith.addf %41, %43 : vector<200x256xf32>
    %45 = vector.extract_strided_slice %8 {offsets = [3, 0], sizes = [1, 256], strides = [1, 1]} : vector<5x256xf32> to vector<1x256xf32>
    %46 = vector.extract_strided_slice %8 {offsets = [4, 0], sizes = [1, 256], strides = [1, 1]} : vector<5x256xf32> to vector<1x256xf32>
    %cst_20 = arith.constant dense<0.000000e+00> : vector<200xf32>
    %47 = vector.multi_reduction <add>, %44, %cst_20 [1] : vector<200x256xf32> to vector<200xf32>
    %48 = vector.shape_cast %47 : vector<200xf32> to vector<200x1xf32>
    %cst_21 = arith.constant 2.560000e+02 : f32
    %49 = vector.broadcast %cst_21 : f32 to vector<200x1xf32>
    %50 = arith.divf %48, %49 : vector<200x1xf32>
    %51 = vector.broadcast %50 : vector<200x1xf32> to vector<200x256xf32>
    %52 = arith.subf %44, %51 : vector<200x256xf32>
    %53 = arith.mulf %52, %52 : vector<200x256xf32>
    %cst_22 = arith.constant dense<0.000000e+00> : vector<200xf32>
    %54 = vector.multi_reduction <add>, %53, %cst_22 [1] : vector<200x256xf32> to vector<200xf32>
    %55 = vector.shape_cast %54 : vector<200xf32> to vector<200x1xf32>
    %cst_23 = arith.constant 2.560000e+02 : f32
    %56 = vector.broadcast %cst_23 : f32 to vector<200x1xf32>
    %57 = arith.divf %55, %56 : vector<200x1xf32>
    %cst_24 = arith.constant 9.99999974E-6 : f32
    %58 = vector.broadcast %cst_24 : f32 to vector<200x1xf32>
    %59 = arith.addf %57, %58 : vector<200x1xf32>
    %60 = math.rsqrt %59 : vector<200x1xf32>
    %61 = vector.broadcast %45 : vector<1x256xf32> to vector<200x256xf32>
    %62 = vector.broadcast %60 : vector<200x1xf32> to vector<200x256xf32>
    %63 = arith.mulf %61, %62 : vector<200x256xf32>
    %64 = arith.mulf %52, %63 : vector<200x256xf32>
    %65 = vector.broadcast %46 : vector<1x256xf32> to vector<200x256xf32>
    %66 = arith.addf %64, %65 : vector<200x256xf32>
    %cst_25 = arith.constant 5.000000e-01 : f32
    %67 = vector.broadcast %cst_25 : f32 to vector<200x256xf32>
    %68 = arith.mulf %67, %66 : vector<200x256xf32>
    %cst_26 = arith.constant 0.707106769 : f32
    %69 = vector.broadcast %cst_26 : f32 to vector<200x256xf32>
    %70 = arith.mulf %66, %69 : vector<200x256xf32>
    %71 = math.erf %70 : vector<200x256xf32>
    %cst_27 = arith.constant 1.000000e+00 : f32
    %72 = vector.broadcast %cst_27 : f32 to vector<200x256xf32>
    %73 = arith.addf %72, %71 : vector<200x256xf32>
    %74 = arith.mulf %68, %73 : vector<200x256xf32>
    %c0_28 = arith.constant 0 : index
    %c0_29 = arith.constant 0 : index
    %75 = vector.load %arg5[%c0_28, %c0_29] : memref<256x128xf32, #tpu.memory_space<vmem>>, vector<256x128xf32>
    %cst_30 = arith.constant dense<0.000000e+00> : vector<200x128xf32>
    %76 = tpu.matmul %74, %75, %cst_30 {dimension_numbers = #tpu.dot_dimension_numbers<[1], [0], [0], [1], [0, 0, 1, 1], [], []>} : vector<200x256xf32>, vector<256x128xf32>, vector<200x128xf32> -> vector<200x128xf32>
    %77 = vector.extract_strided_slice %9 {offsets = [0, 0], sizes = [1, 128], strides = [1, 1]} : vector<3x128xf32> to vector<1x128xf32>
    %78 = vector.broadcast %77 : vector<1x128xf32> to vector<200x128xf32>
    %79 = arith.addf %76, %78 : vector<200x128xf32>
    %80 = vector.extract_strided_slice %9 {offsets = [1, 0], sizes = [1, 128], strides = [1, 1]} : vector<3x128xf32> to vector<1x128xf32>
    %81 = vector.extract_strided_slice %9 {offsets = [2, 0], sizes = [1, 128], strides = [1, 1]} : vector<3x128xf32> to vector<1x128xf32>
    %cst_31 = arith.constant dense<0.000000e+00> : vector<200xf32>
    %82 = vector.multi_reduction <add>, %79, %cst_31 [1] : vector<200x128xf32> to vector<200xf32>
    %83 = vector.shape_cast %82 : vector<200xf32> to vector<200x1xf32>
    %cst_32 = arith.constant 1.280000e+02 : f32
    %84 = vector.broadcast %cst_32 : f32 to vector<200x1xf32>
    %85 = arith.divf %83, %84 : vector<200x1xf32>
    %86 = vector.broadcast %85 : vector<200x1xf32> to vector<200x128xf32>
    %87 = arith.subf %79, %86 : vector<200x128xf32>
    %88 = arith.mulf %87, %87 : vector<200x128xf32>
    %cst_33 = arith.constant dense<0.000000e+00> : vector<200xf32>
    %89 = vector.multi_reduction <add>, %88, %cst_33 [1] : vector<200x128xf32> to vector<200xf32>
    %90 = vector.shape_cast %89 : vector<200xf32> to vector<200x1xf32>
    %cst_34 = arith.constant 1.280000e+02 : f32
    %91 = vector.broadcast %cst_34 : f32 to vector<200x1xf32>
    %92 = arith.divf %90, %91 : vector<200x1xf32>
    %cst_35 = arith.constant 9.99999974E-6 : f32
    %93 = vector.broadcast %cst_35 : f32 to vector<200x1xf32>
    %94 = arith.addf %92, %93 : vector<200x1xf32>
    %95 = math.rsqrt %94 : vector<200x1xf32>
    %96 = vector.broadcast %80 : vector<1x128xf32> to vector<200x128xf32>
    %97 = vector.broadcast %95 : vector<200x1xf32> to vector<200x128xf32>
    %98 = arith.mulf %96, %97 : vector<200x128xf32>
    %99 = arith.mulf %87, %98 : vector<200x128xf32>
    %100 = vector.broadcast %81 : vector<1x128xf32> to vector<200x128xf32>
    %101 = arith.addf %99, %100 : vector<200x128xf32>
    %102 = arith.addf %6, %101 : vector<200x128xf32>
    %c0_36 = arith.constant 0 : index
    %c0_37 = arith.constant 0 : index
    %103 = vector.load %arg8[%c0_36, %c0_37] : memref<200x128xf32, #tpu.memory_space<vmem>>, vector<200x128xf32>
    tpu.vector_store %arg8[%c0_36, %c0_37], %102 {strides = array<i32>} : memref<200x128xf32, #tpu.memory_space<vmem>>, vector<200x128xf32>,
    return
  }
  func.func @transform_0(%arg0: i32) -> (i32, i32) {
    %c0_i32 = arith.constant 0 : i32
    %c0_i32_0 = arith.constant 0 : i32
    return %arg0, %c0_i32 : i32, i32
  }
  func.func @transform_1(%arg0: i32) -> (i32, i32) {
    %c0_i32 = arith.constant 0 : i32
    %c0_i32_0 = arith.constant 0 : i32
    %c0_i32_1 = arith.constant 0 : i32
    return %c0_i32, %c0_i32_0 : i32, i32
  }
  func.func @transform_2(%arg0: i32) -> (i32, i32) {
    %c0_i32 = arith.constant 0 : i32
    %c0_i32_0 = arith.constant 0 : i32
    %c0_i32_1 = arith.constant 0 : i32
    return %c0_i32, %c0_i32_0 : i32, i32
  }
  func.func @transform_3(%arg0: i32) -> (i32, i32) {
    %c0_i32 = arith.constant 0 : i32
    %c0_i32_0 = arith.constant 0 : i32
    %c0_i32_1 = arith.constant 0 : i32
    return %c0_i32, %c0_i32_0 : i32, i32
  }
  func.func @transform_4(%arg0: i32) -> (i32, i32) {
    %c0_i32 = arith.constant 0 : i32
    %c0_i32_0 = arith.constant 0 : i32
    %c0_i32_1 = arith.constant 0 : i32
    return %c0_i32, %c0_i32_0 : i32, i32
  }
  func.func @transform_5(%arg0: i32) -> (i32, i32) {
    %c0_i32 = arith.constant 0 : i32
    %c0_i32_0 = arith.constant 0 : i32
    %c0_i32_1 = arith.constant 0 : i32
    return %c0_i32, %c0_i32_0 : i32, i32
  }
  func.func @transform_6(%arg0: i32) -> (i32, i32) {
    %c0_i32 = arith.constant 0 : i32
    %c0_i32_0 = arith.constant 0 : i32
    %c0_i32_1 = arith.constant 0 : i32
    return %c0_i32, %c0_i32_0 : i32, i32
  }
  func.func @transform_7(%arg0: i32) -> (i32, i32) {
    %c0_i32 = arith.constant 0 : i32
    %c0_i32_0 = arith.constant 0 : i32
    return %arg0, %c0_i32 : i32, i32
  }
}

</mosaic_0001>

<bundles_post_ra>
// kernel: tpu_custom_call.1
= control target key start
LH: loop header
LB: loop body
LE: loop exit
PB: predicated region body
PF: predicated region fallthrough
CT: control target
= control target key end

     0   :  { %12 = vsyncpa [#allocation3], 0  ;;  %s5892_s0 = inlined_call_operand.hbm [shape: f32[200,128], index: 0, kind: input, shape index: {}]   ;;  %s5893_s1 = inlined_call_operand.hbm [shape: f32[128,384], index: 1, kind: input, shape index: {}]   ;;  %s5894_s2 = inlined_call_operand.vmem [shape: f32[1,384], index: 2, kind: input, shape index: {}]   ;;  %s5895_s3 = inlined_call_operand.hbm [shape: f32[256,256], index: 3, kind: input, shape index: {}]   ;;  %s5896_s4 = inlined_call_operand.hbm [shape: f32[256,128], index: 4, kind: input, shape index: {}]   ;;  %s5897_s5 = inlined_call_operand.hbm [shape: f32[5,256], index: 5, kind: input, shape index: {}]   ;;  %s5898_s6 = inlined_call_operand.vmem [shape: f32[3,128], index: 6, kind: input, shape index: {}]   ;;  %s5899_s7 = inlined_call_operand.hbm [shape: f32[200,128], index: 7, kind: output, shape index: {}]  }
   0x1   :  { %13 = vsyncpa [#allocation6], 0 }
   0x2   :  { %14 = vsyncpa [#allocation9], 0 }
   0x3   :  { %15 = vsyncpa [#allocation4], 0  ;;  %s3683_s24 = smov [#allocation5]  }
   0x4   :  { %s33_s25 = sshll.u32 %s3683_s24, 4  ;;  %s34_s25 = int_to_ptr.vmem [resolvable:$true] %s33_s25 }
   0x5   :  { %s3563_s26 = scalar_lea.vmem %s34_s25, 6144  ;;  %p3568_p1 = scmp.lt.s32.totalorder %s34_s25, %s34_s25 }
   0x6   :  { %p3564_p0 = scmp.ne.s32.totalorder %s34_s25, %s3563_s26  ;;  %p3569_p2 = scmp.lt.s32.totalorder %s3563_s26, %s3563_s26 }
   0x8   :  { %p3570_p3 = por %p3569_p2, %p3568_p1 }
   0xa   :  { %p3571_p4 = pnand %p3570_p3, %p3564_p0 }
   0xc   :  { %3574 = shalt.err (!%p3571_p4)
}
   0xd   :  { %s3684_s27 = smov 384   ;;  %s3685_s28 = smov 24  }
   0xe   :  { %39 = dma.hbm_to_vmem [thread:$0]  %s5893_s1, 6144, %s34_s25, [#allocation6], %s3684_s27, %s3684_s27, %s3685_s28  }
   0xf   :  { %s3686_s8 = smov [#allocation8]   ;;  %s3687_s10 = smov [#allocation2]  }
  0x10   :  { %s59_s9 = sshll.u32 %s3686_s8, 4  ;;  %s21_s11 = sshll.u32 %s3687_s10, 4  ;;  %s60_s9 = int_to_ptr.vmem [resolvable:$true] %s59_s9  ;;  %s22_s11 = int_to_ptr.vmem [resolvable:$true] %s21_s11 }
  0x11   :  { %s3583_s12 = scalar_lea.vmem %s60_s9, 4096  ;;  %p3588_p6 = scmp.lt.s32.totalorder %s60_s9, %s60_s9 }
  0x12   :  { %p3584_p5 = scmp.ne.s32.totalorder %s60_s9, %s3583_s12  ;;  %p3589_p7 = scmp.lt.s32.totalorder %s3583_s12, %s3583_s12 }
  0x14   :  { %p3590_p8 = por %p3589_p7, %p3588_p6 }
  0x16   :  { %p3591_p9 = pnand %p3590_p8, %p3584_p5 }
  0x18   :  { %3594 = shalt.err (!%p3591_p9)
}
  0x19   :  { %s3688_s13 = smov 128   ;;  %s3689_s14 = smov 8  }
  0x1a   :  { %65 = dma.hbm_to_vmem [thread:$0]  %s5896_s4, 4096, %s60_s9, [#allocation9], %s3688_s13, %s3688_s13, %s3689_s14  }
  0x1b   :  { %s3603_s1 = scalar_lea.vmem %s22_s11, 3200  ;;  %p3608_p11 = scmp.lt.s32.totalorder %s22_s11, %s22_s11 }
  0x1c   :  { %p3604_p10 = scmp.ne.s32.totalorder %s22_s11, %s3603_s1  ;;  %p3609_p12 = scmp.lt.s32.totalorder %s3603_s1, %s3603_s1 }
  0x1e   :  { %p3610_p13 = por %p3609_p12, %p3608_p11 }
  0x20   :  { %p3611_p0 = pnand %p3610_p13, %p3604_p10 }
  0x22   :  { %3614 = shalt.err (!%p3611_p0)
}
  0x23   :  { %27 = dma.hbm_to_vmem [thread:$0]  %s5892_s0, 3200, %s22_s11, [#allocation3], %s3688_s13, %s3688_s13, %s3689_s14  }
  0x24   :  { %s3690_s19 = smov [#allocation7]  }
  0x25   :  { %s47_s20 = sshll.u32 %s3690_s19, 4  ;;  %s48_s20 = int_to_ptr.vmem [resolvable:$true] %s47_s20 }
  0x26   :  { %s3623_s21 = scalar_lea.vmem %s48_s20, 8192  ;;  %p3628_p2 = scmp.lt.s32.totalorder %s48_s20, %s48_s20 }
  0x27   :  { %p3624_p1 = scmp.ne.s32.totalorder %s48_s20, %s3623_s21  ;;  %p3629_p3 = scmp.lt.s32.totalorder %s3623_s21, %s3623_s21 }
  0x29   :  { %p3630_p4 = por %p3629_p3, %p3628_p2 }
  0x2b   :  { %p3631_p5 = pnand %p3630_p4, %p3624_p1 }
  0x2d   :  { %3634 = shalt.err (!%p3631_p5)
}
  0x2e   :  { %s3691_s4 = smov 256   ;;  %s3692_s22 = smov 16  }
  0x2f   :  { %53 = dma.hbm_to_vmem [thread:$0]  %s5895_s3, 8192, %s48_s20, [#allocation6], %s3691_s4, %s3691_s4, %s3692_s22  }
  0x30   :  { %s3693_s25 = smov [#allocation10]  }
  0x31   :  { %s72_s26 = sshll.u32 %s3693_s25, 4  ;;  %s73_s26 = int_to_ptr.vmem [resolvable:$true] %s72_s26 }
  0x32   :  { %s3643_s0 = scalar_lea.vmem %s73_s26, 256  ;;  %p3648_p7 = scmp.lt.s32.totalorder %s73_s26, %s73_s26 }
  0x33   :  { %p3644_p6 = scmp.ne.s32.totalorder %s73_s26, %s3643_s0  ;;  %p3649_p8 = scmp.lt.s32.totalorder %s3643_s0, %s3643_s0 }
  0x35   :  { %p3650_p9 = por %p3649_p8, %p3648_p7 }
  0x37   :  { %p3651_p10 = pnand %p3650_p9, %p3644_p6 }
  0x39   :  { %3654 = shalt.err (!%p3651_p10)
}
  0x3a   :  { %75 = dma.hbm_to_vmem [thread:$0]  %s5897_s5, 256, %s73_s26, [#allocation9]  }
  0x3b   :  { %3675 = dma.done.wait [#allocation3], 3200  }
  0x3c   :  { %3676 = vsyncadd [#allocation3], 4294964096 }
  0x3d   :  { %3677 = dma.done.wait [#allocation6], 14336  }
  0x3e   :  { %3678 = vsyncadd [#allocation6], 4294952960 }
  0x3f   :  { %3679 = dma.done.wait [#allocation9], 4352  }
  0x40   :  { %3680 = vsyncadd [#allocation9], 4294962944  ;;  %v5900_v0 = vmov 0.0   ;;  %vm3695_vm0 = vmmov 0   ;;  %v164_v1 = vld [vmem:[#allocation5 + $0x170] sm:$0xff]  ;;  %v163_v2 = vld [vmem:[#allocation5 + $0x168] sm:$0xff] }
  0x41   :  { %3081 = vmatprep.subr.mxu1 %v5900_v0  ;;  %247 = vmatprep.mubr.f32.mxu0 %v5900_v0  ;;  %v165_v3 = vld [vmem:[#allocation5 + $0x178] sm:$0xff]  ;;  %v160_v5 = vld [vmem:[#allocation5 + $0x150] sm:$0xff]  ;;  %v162_v6 = vld [vmem:[#allocation5 + $0x160] sm:$0xff] }
  0x42   :  { %3113 = vmatprep.mubr.msk.f32.mxu1 %vm3695_vm0, %v5900_v0  ;;  %183 = vmatprep.subr.mxu0 %v164_v1  ;;  %v161_v4 = vld [vmem:[#allocation5 + $0x158] sm:$0xff]  ;;  %v158_v7 = vld [vmem:[#allocation5 + $0x140] sm:$0xff]  ;;  %v159_v8 = vld [vmem:[#allocation5 + $0x148] sm:$0xff] }
  0x43   :  { %3082 = vmatpush3.msra.mxu1 %v165_v3  ;;  %184 = vmatpush1.msra.mxu0 %v163_v2  ;;  %v157_v9 = vld [vmem:[#allocation5 + $0x138] sm:$0xff]  ;;  %v155_v10 = vld [vmem:[#allocation5 + $0x128] sm:$0xff]  ;;  %v156_v11 = vld [vmem:[#allocation5 + $0x130] sm:$0xff] }
  0x44   :  { %3083 = vmatprep.subr.mxu1 %v5900_v0  ;;  %185 = vmatprep.subr.mxu0 %v161_v4  ;;  %v154_v12 = vld [vmem:[#allocation5 + $0x120] sm:$0xff]  ;;  %v152_v13 = vld [vmem:[#allocation5 + $0x110] sm:$0xff]  ;;  %v153_v14 = vld [vmem:[#allocation5 + $0x118] sm:$0xff] }
  0x45   :  { %3084 = vmatpush3.msra.mxu1 %v162_v6  ;;  %186 = vmatpush1.msra.mxu0 %v160_v5  ;;  %v151_v15 = vld [vmem:[#allocation5 + $0x108] sm:$0xff]  ;;  %v149_v16 = vld [vmem:[#allocation5 + $0xf8] sm:$0xff]  ;;  %v150_v17 = vld [vmem:[#allocation5 + $0x100] sm:$0xff] }
  0x46   :  { %3085 = vmatprep.subr.mxu1 %v5900_v0  ;;  %187 = vmatprep.subr.mxu0 %v158_v7  ;;  %v148_v18 = vld [vmem:[#allocation5 + $0xf0] sm:$0xff]  ;;  %v146_v19 = vld [vmem:[#allocation5 + $0xe0] sm:$0xff]  ;;  %v147_v20 = vld [vmem:[#allocation5 + $0xe8] sm:$0xff] }
  0x47   :  { %3086 = vmatpush3.msra.mxu1 %v159_v8  ;;  %188 = vmatpush1.msra.mxu0 %v157_v9  ;;  %v145_v21 = vld [vmem:[#allocation5 + $0xd8] sm:$0xff]  ;;  %v143_v22 = vld [vmem:[#allocation5 + $0xc8] sm:$0xff]  ;;  %v144_v23 = vld [vmem:[#allocation5 + $0xd0] sm:$0xff] }
  0x48   :  { %3087 = vmatprep.subr.mxu1 %v5900_v0  ;;  %189 = vmatprep.subr.mxu0 %v155_v10  ;;  %v142_v24 = vld [vmem:[#allocation5 + $0xc0] sm:$0xff]  ;;  %v140_v25 = vld [vmem:[#allocation5 + $0xb0] sm:$0xff]  ;;  %v141_v26 = vld [vmem:[#allocation5 + $0xb8] sm:$0xff] }
  0x49   :  { %3088 = vmatpush3.msra.mxu1 %v156_v11  ;;  %190 = vmatpush1.msra.mxu0 %v154_v12  ;;  %v139_v27 = vld [vmem:[#allocation5 + $0xa8] sm:$0xff]  ;;  %v137_v28 = vld [vmem:[#allocation5 + $0x98] sm:$0xff]  ;;  %v138_v29 = vld [vmem:[#allocation5 + $0xa0] sm:$0xff]  ;;  %v168_v11 = vlaneseq }
  0x4a   :  { %3089 = vmatprep.subr.mxu1 %v5900_v0  ;;  %191 = vmatprep.subr.mxu0 %v152_v13  ;;  %v136_v30 = vld [vmem:[#allocation5 + $0x90] sm:$0xff]  ;;  %v134_v31 = vld [vmem:[#allocation5 + $0x80] sm:$0xff]  ;;  %v135_v32 = vld [vmem:[#allocation5 + $0x88] sm:$0xff] }
  0x4b   :  { %3090 = vmatpush3.msra.mxu1 %v153_v14  ;;  %192 = vmatpush1.msra.mxu0 %v151_v15  ;;  %v133_v33 = vld [vmem:[#allocation5 + $0x78] sm:$0xff]  ;;  %v131_v34 = vld [vmem:[#allocation5 + $0x68] sm:$0xff]  ;;  %v132_v35 = vld [vmem:[#allocation5 + $0x70] sm:$0xff]  ;;  %v3850_v12 = vshrl.u32 %v168_v11, 7 }
  0x4c   :  { %3091 = vmatprep.subr.mxu1 %v5900_v0  ;;  %193 = vmatprep.subr.mxu0 %v149_v16  ;;  %v130_v36 = vld [vmem:[#allocation5 + $0x60] sm:$0xff]  ;;  %v128_v37 = vld [vmem:[#allocation5 + $0x50] sm:$0xff]  ;;  %v129_v38 = vld [vmem:[#allocation5 + $0x58] sm:$0xff] }
  0x4d   :  { %3092 = vmatpush3.msra.mxu1 %v150_v17  ;;  %194 = vmatpush1.msra.mxu0 %v148_v18  ;;  %v127_v39 = vld [vmem:[#allocation5 + $0x48] sm:$0xff]  ;;  %v125_v40 = vld [vmem:[#allocation5 + $0x38] sm:$0xff]  ;;  %v126_v41 = vld [vmem:[#allocation5 + $0x40] sm:$0xff]  ;;  %5934 = vst [vmem:[#allocation16_spill] sm:$0xff] %v3850_v12  ;;  %v3853_v13 = vsub.s32 2, %v3850_v12  ;;  %v3856_v14 = vsub.s32 1, %v3850_v12 }
  0x4e   :  { %3093 = vmatprep.subr.mxu1 %v5900_v0  ;;  %195 = vmatprep.subr.mxu0 %v146_v19  ;;  %v124_v42 = vld [vmem:[#allocation5 + $0x30] sm:$0xff]  ;;  %v122_v43 = vld [vmem:[#allocation5 + $0x20] sm:$0xff]  ;;  %v123_v44 = vld [vmem:[#allocation5 + $0x28] sm:$0xff] }
  0x4f   :  { %3094 = vmatpush3.msra.mxu1 %v147_v20  ;;  %196 = vmatpush1.msra.mxu0 %v145_v21  ;;  %v121_v45 = vld [vmem:[#allocation5 + $0x18] sm:$0xff]  ;;  %v119_v46 = vld [vmem:[#allocation5 + $0x8] sm:$0xff]  ;;  %v120_v47 = vld [vmem:[#allocation5 + $0x10] sm:$0xff]  ;;  %5935 = vst [vmem:[#allocation17_spill] sm:$0xff] %v3853_v13 }
  0x50   :  { %3095 = vmatprep.subr.mxu1 %v5900_v0  ;;  %197 = vmatprep.subr.mxu0 %v143_v22  ;;  %v118_v48 = vld [vmem:[#allocation5] sm:$0xff]  ;;  %v93_v49 = vld [vmem:[#allocation2] sm:$0xff]  ;;  %v95_v51 = vld [vmem:[#allocation2 + $0x10] sm:$0xff]  ;;  %5936 = vst [vmem:[#allocation18_spill] sm:$0xff] %v3856_v14 }
  0x51   :  { %3096 = vmatpush3.msra.mxu1 %v144_v23  ;;  %198 = vmatpush1.msra.mxu0 %v142_v24  ;;  %v94_v50 = vld [vmem:[#allocation2 + $0x8] sm:$0xff]  ;;  %v96_v52 = vld [vmem:[#allocation2 + $0x18] sm:$0xff]  ;;  %v97_v53 = vld [vmem:[#allocation2 + $0x20] sm:$0xff] }
  0x52   :  { %3097 = vmatprep.subr.mxu1 %v5900_v0  ;;  %199 = vmatprep.subr.mxu0 %v140_v25  ;;  %v98_v54 = vld [vmem:[#allocation2 + $0x28] sm:$0xff]  ;;  %v99_v55 = vld [vmem:[#allocation2 + $0x30] sm:$0xff]  ;;  %v100_v56 = vld [vmem:[#allocation2 + $0x38] sm:$0xff] }
  0x53   :  { %3098 = vmatpush3.msra.mxu1 %v141_v26  ;;  %200 = vmatpush1.msra.mxu0 %v139_v27  ;;  %v101_v57 = vld [vmem:[#allocation2 + $0x40] sm:$0xff]  ;;  %v102_v58 = vld [vmem:[#allocation2 + $0x48] sm:$0xff]  ;;  %v103_v59 = vld [vmem:[#allocation2 + $0x50] sm:$0xff] }
  0x54   :  { %3099 = vmatprep.subr.mxu1 %v5900_v0  ;;  %201 = vmatprep.subr.mxu0 %v137_v28  ;;  %v104_v60 = vld [vmem:[#allocation2 + $0x58] sm:$0xff]  ;;  %v105_v61 = vld [vmem:[#allocation2 + $0x60] sm:$0xff]  ;;  %v106_v62 = vld [vmem:[#allocation2 + $0x68] sm:$0xff] }
  0x55   :  { %3100 = vmatpush3.msra.mxu1 %v138_v29  ;;  %202 = vmatpush1.msra.mxu0 %v136_v30  ;;  %v107_v63 = vld [vmem:[#allocation2 + $0x70] sm:$0xff]  ;;  %v108_v1 = vld [vmem:[#allocation2 + $0x78] sm:$0xff]  ;;  %v109_v2 = vld [vmem:[#allocation2 + $0x80] sm:$0xff] }
  0x56   :  { %3101 = vmatprep.subr.mxu1 %v5900_v0  ;;  %203 = vmatprep.subr.mxu0 %v134_v31  ;;  %v110_v3 = vld [vmem:[#allocation2 + $0x88] sm:$0xff]  ;;  %v111_v4 = vld [vmem:[#allocation2 + $0x90] sm:$0xff]  ;;  %v112_v5 = vld [vmem:[#allocation2 + $0x98] sm:$0xff] }
  0x57   :  { %3102 = vmatpush3.msra.mxu1 %v135_v32  ;;  %204 = vmatpush1.msra.mxu0 %v133_v33  ;;  %v113_v6 = vld [vmem:[#allocation2 + $0xa0] sm:$0xff]  ;;  %v114_v7 = vld [vmem:[#allocation2 + $0xa8] sm:$0xff]  ;;  %v115_v8 = vld [vmem:[#allocation2 + $0xb0] sm:$0xff] }
  0x58   :  { %3103 = vmatprep.subr.mxu1 %v5900_v0  ;;  %205 = vmatprep.subr.mxu0 %v131_v34  ;;  %v116_v9 = vld [vmem:[#allocation2 + $0xb8] sm:$0xff]  ;;  %v117_v10 = vld [vmem:[#allocation2 + $0xc0] sm:$0xff] }
  0x59   :  { %3104 = vmatpush3.msra.mxu1 %v132_v35  ;;  %206 = vmatpush1.msra.mxu0 %v130_v36  ;;  %v166_v15 = vld [vmem:[%s5894_s2] sm:$0x7] }
  0x5a   :  { %3105 = vmatprep.subr.mxu1 %v5900_v0  ;;  %207 = vmatprep.subr.mxu0 %v128_v37  ;;  %v3862_v16 = vrot.slane %v166_v15, %v3853_v13  ;;  %v3865_v18 = vrot.slane %v166_v15, %v3856_v14  ;;  %v1378_v13 = vld [vmem:[#allocation7 + $0xa0] sm:$0xff]  ;;  %v1373_v14 = vld [vmem:[#allocation7 + $0x78] sm:$0xff] }
  0x5b   :  { %3106 = vmatpush3.msra.mxu1 %v129_v38  ;;  %208 = vmatpush1.msra.mxu0 %v127_v39 }
  0x5c   :  { %3107 = vmatprep.subr.mxu1 %v5900_v0  ;;  %209 = vmatprep.subr.mxu0 %v125_v40 }
  0x5d   :  { %3108 = vmatpush3.msra.mxu1 %v126_v41  ;;  %210 = vmatpush1.msra.mxu0 %v124_v42 }
  0x5e   :  { %3109 = vmatprep.subr.mxu1 %v5900_v0  ;;  %211 = vmatprep.subr.mxu0 %v122_v43 }
  0x5f   :  { %3110 = vmatpush3.msra.mxu1 %v123_v44  ;;  %212 = vmatpush1.msra.mxu0 %v121_v45 }
  0x60   :  { %3111 = vmatprep.subr.mxu1 %v5900_v0  ;;  %213 = vmatprep.subr.mxu0 %v119_v46 }
  0x61   :  { %3112 = vmatpush3.msra.mxu1 %v120_v47  ;;  %214 = vmatpush1.msra.mxu0 %v118_v48 }
  0x62   :  { %3114 = vmatmul.mubr.f32.vlgmr.msra.gmra.mxu1 %v93_v49  ;;  %248 = vmatmul.mubr.f32.vlgmr.msra.gmra.mxu0 %v93_v49 }
  0x63   :  { %3116 = vmatprep.mubr.msk.f32.mxu1 %vm3695_vm0, %v5900_v0  ;;  %253 = vmatprep.mubr.f32.mxu0 %v5900_v0 }
  0x64   :  { %2447 = vmatprep.subr.mxu1 %v5900_v0 }
  0x66   :  { %3117 = vmatmul.mubr.f32.gmra.mxu1 %v94_v50  ;;  %254 = vmatmul.mubr.f32.gmra.mxu0 %v94_v50 }
  0x67   :  { %3119 = vmatprep.mubr.msk.f32.mxu1 %vm3695_vm0, %v5900_v0  ;;  %259 = vmatprep.mubr.f32.mxu0 %v5900_v0 }
  0x6a   :  { %3120 = vmatmul.mubr.f32.gmra.mxu1 %v95_v51  ;;  %260 = vmatmul.mubr.f32.gmra.mxu0 %v95_v51 }
  0x6b   :  { %3122 = vmatprep.mubr.msk.f32.mxu1 %vm3695_vm0, %v5900_v0  ;;  %265 = vmatprep.mubr.f32.mxu0 %v5900_v0 }
  0x6e   :  { %3123 = vmatmul.mubr.f32.gmra.mxu1 %v96_v52  ;;  %266 = vmatmul.mubr.f32.gmra.mxu0 %v96_v52 }
  0x6f   :  { %3125 = vmatprep.mubr.msk.f32.mxu1 %vm3695_vm0, %v5900_v0  ;;  %271 = vmatprep.mubr.f32.mxu0 %v5900_v0 }
  0x72   :  { %3126 = vmatmul.mubr.f32.gmra.mxu1 %v97_v53  ;;  %272 = vmatmul.mubr.f32.gmra.mxu0 %v97_v53 }
  0x73   :  { %3128 = vmatprep.mubr.msk.f32.mxu1 %vm3695_vm0, %v5900_v0  ;;  %277 = vmatprep.mubr.f32.mxu0 %v5900_v0 }
  0x76   :  { %3129 = vmatmul.mubr.f32.gmra.mxu1 %v98_v54  ;;  %278 = vmatmul.mubr.f32.gmra.mxu0 %v98_v54 }
  0x77   :  { %3131 = vmatprep.mubr.msk.f32.mxu1 %vm3695_vm0, %v5900_v0  ;;  %283 = vmatprep.mubr.f32.mxu0 %v5900_v0 }
  0x7a   :  { %3132 = vmatmul.mubr.f32.gmra.mxu1 %v99_v55  ;;  %284 = vmatmul.mubr.f32.gmra.mxu0 %v99_v55 }
  0x7b   :  { %3134 = vmatprep.mubr.msk.f32.mxu1 %vm3695_vm0, %v5900_v0  ;;  %289 = vmatprep.mubr.f32.mxu0 %v5900_v0 }
  0x7e   :  { %3135 = vmatmul.mubr.f32.gmra.mxu1 %v100_v56  ;;  %290 = vmatmul.mubr.f32.gmra.mxu0 %v100_v56 }
  0x7f   :  { %3137 = vmatprep.mubr.msk.f32.mxu1 %vm3695_vm0, %v5900_v0  ;;  %295 = vmatprep.mubr.f32.mxu0 %v5900_v0 }
  0x82   :  { %3138 = vmatmul.mubr.f32.gmra.mxu1 %v101_v57  ;;  %296 = vmatmul.mubr.f32.gmra.mxu0 %v101_v57 }
  0x83   :  { %3140 = vmatprep.mubr.msk.f32.mxu1 %vm3695_vm0, %v5900_v0  ;;  %301 = vmatprep.mubr.f32.mxu0 %v5900_v0 }
  0x86   :  { %3141 = vmatmul.mubr.f32.gmra.mxu1 %v102_v58  ;;  %302 = vmatmul.mubr.f32.gmra.mxu0 %v102_v58 }
  0x87   :  { %3143 = vmatprep.mubr.msk.f32.mxu1 %vm3695_vm0, %v5900_v0  ;;  %307 = vmatprep.mubr.f32.mxu0 %v5900_v0 }
  0x8a   :  { %3144 = vmatmul.mubr.f32.gmra.mxu1 %v103_v59  ;;  %308 = vmatmul.mubr.f32.gmra.mxu0 %v103_v59 }
  0x8b   :  { %3146 = vmatprep.mubr.msk.f32.mxu1 %vm3695_vm0, %v5900_v0  ;;  %313 = vmatprep.mubr.f32.mxu0 %v5900_v0 }
  0x8e   :  { %3147 = vmatmul.mubr.f32.gmra.mxu1 %v104_v60  ;;  %314 = vmatmul.mubr.f32.gmra.mxu0 %v104_v60 }
  0x8f   :  { %3149 = vmatprep.mubr.msk.f32.mxu1 %vm3695_vm0, %v5900_v0  ;;  %319 = vmatprep.mubr.f32.mxu0 %v5900_v0 }
  0x92   :  { %3150 = vmatmul.mubr.f32.gmra.mxu1 %v105_v61  ;;  %320 = vmatmul.mubr.f32.gmra.mxu0 %v105_v61 }
  0x93   :  { %3152 = vmatprep.mubr.msk.f32.mxu1 %vm3695_vm0, %v5900_v0  ;;  %325 = vmatprep.mubr.f32.mxu0 %v5900_v0 }
  0x96   :  { %3153 = vmatmul.mubr.f32.gmra.mxu1 %v106_v62  ;;  %326 = vmatmul.mubr.f32.gmra.mxu0 %v106_v62 }
  0x97   :  { %3155 = vmatprep.mubr.msk.f32.mxu1 %vm3695_vm0, %v5900_v0  ;;  %331 = vmatprep.mubr.f32.mxu0 %v5900_v0 }
  0x9a   :  { %3156 = vmatmul.mubr.f32.gmra.mxu1 %v107_v63  ;;  %332 = vmatmul.mubr.f32.gmra.mxu0 %v107_v63 }
  0x9b   :  { %3158 = vmatprep.mubr.msk.f32.mxu1 %vm3695_vm0, %v5900_v0  ;;  %337 = vmatprep.mubr.f32.mxu0 %v5900_v0 }
  0x9e   :  { %3159 = vmatmul.mubr.f32.gmra.mxu1 %v108_v1  ;;  %338 = vmatmul.mubr.f32.gmra.mxu0 %v108_v1 }
  0x9f   :  { %3161 = vmatprep.mubr.msk.f32.mxu1 %vm3695_vm0, %v5900_v0  ;;  %343 = vmatprep.mubr.f32.mxu0 %v5900_v0 }
  0xa2   :  { %3162 = vmatmul.mubr.f32.gmra.mxu1 %v109_v2  ;;  %344 = vmatmul.mubr.f32.gmra.mxu0 %v109_v2 }
  0xa3   :  { %3164 = vmatprep.mubr.msk.f32.mxu1 %vm3695_vm0, %v5900_v0  ;;  %349 = vmatprep.mubr.f32.mxu0 %v5900_v0 }
  0xa6   :  { %3165 = vmatmul.mubr.f32.gmra.mxu1 %v110_v3  ;;  %350 = vmatmul.mubr.f32.gmra.mxu0 %v110_v3 }
  0xa7   :  { %3167 = vmatprep.mubr.msk.f32.mxu1 %vm3695_vm0, %v5900_v0  ;;  %355 = vmatprep.mubr.f32.mxu0 %v5900_v0 }
  0xaa   :  { %3168 = vmatmul.mubr.f32.gmra.mxu1 %v111_v4  ;;  %356 = vmatmul.mubr.f32.gmra.mxu0 %v111_v4 }
  0xab   :  { %3170 = vmatprep.mubr.msk.f32.mxu1 %vm3695_vm0, %v5900_v0  ;;  %361 = vmatprep.mubr.f32.mxu0 %v5900_v0 }
  0xae   :  { %3171 = vmatmul.mubr.f32.gmra.mxu1 %v112_v5  ;;  %362 = vmatmul.mubr.f32.gmra.mxu0 %v112_v5 }
  0xaf   :  { %3173 = vmatprep.mubr.msk.f32.mxu1 %vm3695_vm0, %v5900_v0  ;;  %367 = vmatprep.mubr.f32.mxu0 %v5900_v0 }
  0xb2   :  { %3174 = vmatmul.mubr.f32.gmra.mxu1 %v113_v6  ;;  %368 = vmatmul.mubr.f32.gmra.mxu0 %v113_v6 }
  0xb3   :  { %3176 = vmatprep.mubr.msk.f32.mxu1 %vm3695_vm0, %v5900_v0  ;;  %373 = vmatprep.mubr.f32.mxu0 %v5900_v0 }
  0xb6   :  { %3177 = vmatmul.mubr.f32.gmra.mxu1 %v114_v7  ;;  %374 = vmatmul.mubr.f32.gmra.mxu0 %v114_v7 }
  0xb7   :  { %3179 = vmatprep.mubr.msk.f32.mxu1 %vm3695_vm0, %v5900_v0  ;;  %379 = vmatprep.mubr.f32.mxu0 %v5900_v0 }
  0xba   :  { %3180 = vmatmul.mubr.f32.gmra.mxu1 %v115_v8  ;;  %380 = vmatmul.mubr.f32.gmra.mxu0 %v115_v8 }
  0xbb   :  { %3182 = vmatprep.mubr.msk.f32.mxu1 %vm3695_vm0, %v5900_v0  ;;  %385 = vmatprep.mubr.f32.mxu0 %v5900_v0 }
  0xbe   :  { %3183 = vmatmul.mubr.f32.gmra.mxu1 %v116_v9  ;;  %386 = vmatmul.mubr.f32.gmra.mxu0 %v116_v9 }
  0xbf   :  { %3185 = vmatprep.mubr.msk.f32.mxu1 %vm3695_vm0, %v5900_v0  ;;  %391 = vmatprep.mubr.f32.mxu0 %v5900_v0 }
  0xc2   :  { %3186 = vmatmul.mubr.f32.gmra.mxu1 %v117_v10  ;;  %392 = vmatmul.mubr.f32.gmra.mxu0 %v117_v10 }
 0x122   :  { %v464_v17 = vpop.f32.mrf.mxu1  ;;  %v3867_v19 = vpop.f32.mrf.mxu0 }
 0x123   :  { %5937 = vst [vmem:[#allocation19_spill] sm:$0xff] %v3867_v19  ;;  %v3870_v20 = vadd.f32 %v464_v17, %v3862_v16  ;;  %v1383_v19 = vld [vmem:[#allocation7 + $0xc8] sm:$0xff] }
 0x124   :  { %v3115_v21 = vpop.f32.mrf.mxu1  ;;  %v251_v22 = vpop.f32.mrf.mxu0 }
 0x125   :  { %v3873_v23 = vadd.f32 %v251_v22, %v3865_v18 }
 0x126   :  { %v469_v24 = vpop.f32.mrf.mxu1  ;;  %v3875_v25 = vpop.f32.mrf.mxu0 }
 0x127   :  { %5938 = vst [vmem:[#allocation20_spill] sm:$0xff] %v3875_v25  ;;  %v3878_v26 = vadd.f32 %v469_v24, %v3862_v16  ;;  %v591_v28 = vadd.f32 %v3870_v20, %v3873_v23  ;;  %v1388_v25 = vld [vmem:[#allocation7 + $0xf0] sm:$0xff] }
 0x128   :  { %v3118_v27 = vpop.f32.mrf.mxu1  ;;  %v257_v29 = vpop.f32.mrf.mxu0 }
 0x129   :  { %v3883_v30 = vadd.f32 %v257_v29, %v3865_v18  ;;  %592 = vadd.xlane.f32.xlu0 %v591_v28 }
 0x12a   :  { %v474_v31 = vpop.f32.mrf.mxu1  ;;  %v3885_v32 = vpop.f32.mrf.mxu0 }
 0x12b   :  { %5939 = vst [vmem:[#allocation21_spill] sm:$0xff] %v3885_v32  ;;  %v3888_v33 = vadd.f32 %v474_v31, %v3862_v16  ;;  %v594_v35 = vadd.f32 %v3878_v26, %v3883_v30 }
 0x12c   :  { %v3121_v34 = vpop.f32.mrf.mxu1  ;;  %v263_v36 = vpop.f32.mrf.mxu0 }
 0x12d   :  { %v3893_v37 = vadd.f32 %v263_v36, %v3865_v18  ;;  %595 = vadd.xlane.f32.xlu0 %v594_v35 }
 0x12e   :  { %v479_v38 = vpop.f32.mrf.mxu1  ;;  %v3895_v39 = vpop.f32.mrf.mxu0 }
 0x12f   :  { %5940 = vst [vmem:[#allocation22_spill] sm:$0xff] %v3895_v39  ;;  %v3898_v40 = vadd.f32 %v479_v38, %v3862_v16  ;;  %v597_v42 = vadd.f32 %v3888_v33, %v3893_v37 }
 0x130   :  { %v3124_v41 = vpop.f32.mrf.mxu1  ;;  %v269_v43 = vpop.f32.mrf.mxu0 }
 0x131   :  { %v3903_v44 = vadd.f32 %v269_v43, %v3865_v18  ;;  %598 = vadd.xlane.f32.xlu1 %v597_v42 }
 0x132   :  { %v484_v45 = vpop.f32.mrf.mxu1  ;;  %v3905_v46 = vpop.f32.mrf.mxu0 }
 0x133   :  { %5941 = vst [vmem:[#allocation23_spill] sm:$0xff] %v3905_v46  ;;  %v3908_v47 = vadd.f32 %v484_v45, %v3862_v16  ;;  %v600_v49 = vadd.f32 %v3898_v40, %v3903_v44 }
 0x134   :  { %v3127_v48 = vpop.f32.mrf.mxu1  ;;  %v275_v50 = vpop.f32.mrf.mxu0 }
 0x135   :  { %v3913_v51 = vadd.f32 %v275_v50, %v3865_v18  ;;  %601 = vadd.xlane.f32.xlu1 %v600_v49 }
 0x136   :  { %v489_v52 = vpop.f32.mrf.mxu1  ;;  %v3915_v53 = vpop.f32.mrf.mxu0 }
 0x137   :  { %5942 = vst [vmem:[#allocation24_spill] sm:$0xff] %v3915_v53  ;;  %v3918_v54 = vadd.f32 %v489_v52, %v3862_v16  ;;  %v603_v56 = vadd.f32 %v3908_v47, %v3913_v51 }
 0x138   :  { %v3130_v55 = vpop.f32.mrf.mxu1  ;;  %v281_v57 = vpop.f32.mrf.mxu0 }
 0x139   :  { %v3923_v58 = vadd.f32 %v281_v57, %v3865_v18  ;;  %604 = vadd.xlane.f32.xlu0 %v603_v56 }
 0x13a   :  { %v494_v59 = vpop.f32.mrf.mxu1  ;;  %v3925_v60 = vpop.f32.mrf.mxu0 }
 0x13b   :  { %5943 = vst [vmem:[#allocation25_spill] sm:$0xff] %v3925_v60  ;;  %v3928_v61 = vadd.f32 %v494_v59, %v3862_v16  ;;  %v606_v63 = vadd.f32 %v3918_v54, %v3923_v58 }
 0x13c   :  { %v3133_v62 = vpop.f32.mrf.mxu1  ;;  %v287_v1 = vpop.f32.mrf.mxu0 }
 0x13d   :  { %v3933_v2 = vadd.f32 %v287_v1, %v3865_v18  ;;  %607 = vadd.xlane.f32.xlu1 %v606_v63 }
 0x13e   :  { %v499_v3 = vpop.f32.mrf.mxu1  ;;  %v3935_v4 = vpop.f32.mrf.mxu0 }
 0x13f   :  { %5944 = vst [vmem:[#allocation26_spill] sm:$0xff] %v3935_v4  ;;  %v3938_v5 = vadd.f32 %v499_v3, %v3862_v16  ;;  %v609_v7 = vadd.f32 %v3928_v61, %v3933_v2 }
 0x140   :  { %v3136_v6 = vpop.f32.mrf.mxu1  ;;  %v293_v8 = vpop.f32.mrf.mxu0 }
 0x141   :  { %v3943_v9 = vadd.f32 %v293_v8, %v3865_v18  ;;  %610 = vadd.xlane.f32.xlu0 %v609_v7 }
 0x142   :  { %v504_v10 = vpop.f32.mrf.mxu1  ;;  %v3945_v11 = vpop.f32.mrf.mxu0 }
 0x143   :  { %5945 = vst [vmem:[#allocation27_spill] sm:$0xff] %v3945_v11  ;;  %v3948_v15 = vadd.f32 %v504_v10, %v3862_v16  ;;  %v612_v21 = vadd.f32 %v3938_v5, %v3943_v9 }
 0x144   :  { %v3139_v17 = vpop.f32.mrf.mxu1  ;;  %v299_v22 = vpop.f32.mrf.mxu0 }
 0x145   :  { %v3953_v24 = vadd.f32 %v299_v22, %v3865_v18  ;;  %613 = vadd.xlane.f32.xlu1 %v612_v21 }
 0x146   :  { %v509_v27 = vpop.f32.mrf.mxu1  ;;  %v3955_v28 = vpop.f32.mrf.mxu0 }
 0x147   :  { %5946 = vst [vmem:[#allocation28_spill] sm:$0xff] %v3955_v28  ;;  %v3958_v29 = vadd.f32 %v509_v27, %v3862_v16  ;;  %v615_v34 = vadd.f32 %v3948_v15, %v3953_v24 }
 0x148   :  { %v3142_v31 = vpop.f32.mrf.mxu1  ;;  %v305_v35 = vpop.f32.mrf.mxu0 }
 0x149   :  { %v3963_v36 = vadd.f32 %v305_v35, %v3865_v18  ;;  %616 = vadd.xlane.f32.xlu0 %v615_v34 }
 0x14a   :  { %v514_v38 = vpop.f32.mrf.mxu1  ;;  %v3965_v41 = vpop.f32.mrf.mxu0 }
 0x14b   :  { %5947 = vst [vmem:[#allocation29_spill] sm:$0xff] %v3965_v41  ;;  %v3968_v42 = vadd.f32 %v514_v38, %v3862_v16  ;;  %v618_v45 = vadd.f32 %v3958_v29, %v3963_v36 }
 0x14c   :  { %v3145_v43 = vpop.f32.mrf.mxu1  ;;  %v311_v48 = vpop.f32.mrf.mxu0 }
 0x14d   :  { %v3973_v49 = vadd.f32 %v311_v48, %v3865_v18  ;;  %619 = vadd.xlane.f32.xlu1 %v618_v45 }
 0x14e   :  { %v519_v50 = vpop.f32.mrf.mxu1  ;;  %v3975_v52 = vpop.f32.mrf.mxu0 }
 0x14f   :  { %5948 = vst [vmem:[#allocation30_spill] sm:$0xff] %v3975_v52  ;;  %v3978_v55 = vadd.f32 %v519_v50, %v3862_v16  ;;  %v621_v57 = vadd.f32 %v3968_v42, %v3973_v49 }
 0x150   :  { %v3148_v56 = vpop.f32.mrf.mxu1  ;;  %v317_v59 = vpop.f32.mrf.mxu0 }
 0x151   :  { %v3983_v62 = vadd.f32 %v317_v59, %v3865_v18  ;;  %622 = vadd.xlane.f32.xlu0 %v621_v57 }
 0x152   :  { %v524_v63 = vpop.f32.mrf.mxu1  ;;  %v3985_v1 = vpop.f32.mrf.mxu0 }
 0x153   :  { %5949 = vst [vmem:[#allocation31_spill] sm:$0xff] %v3985_v1  ;;  %v3988_v3 = vadd.f32 %v524_v63, %v3862_v16  ;;  %v624_v7 = vadd.f32 %v3978_v55, %v3983_v62 }
 0x154   :  { %v3151_v6 = vpop.f32.mrf.mxu1  ;;  %v323_v8 = vpop.f32.mrf.mxu0 }
 0x155   :  { %v3993_v10 = vadd.f32 %v323_v8, %v3865_v18  ;;  %625 = vadd.xlane.f32.xlu1 %v624_v7 }
 0x156   :  { %v529_v17 = vpop.f32.mrf.mxu1  ;;  %v3995_v21 = vpop.f32.mrf.mxu0 }
 0x157   :  { %5950 = vst [vmem:[#allocation32_spill] sm:$0xff] %v3995_v21  ;;  %v3998_v22 = vadd.f32 %v529_v17, %v3862_v16  ;;  %v627_v31 = vadd.f32 %v3988_v3, %v3993_v10 }
 0x158   :  { %v3154_v27 = vpop.f32.mrf.mxu1  ;;  %v329_v34 = vpop.f32.mrf.mxu0 }
 0x159   :  { %v4003_v35 = vadd.f32 %v329_v34, %v3865_v18  ;;  %628 = vadd.xlane.f32.xlu0 %v627_v31 }
 0x15a   :  { %v534_v38 = vpop.f32.mrf.mxu1  ;;  %v4005_v43 = vpop.f32.mrf.mxu0 }
 0x15b   :  { %5951 = vst [vmem:[#allocation33_spill] sm:$0xff] %v4005_v43  ;;  %v4008_v45 = vadd.f32 %v534_v38, %v3862_v16  ;;  %v630_v50 = vadd.f32 %v3998_v22, %v4003_v35 }
 0x15c   :  { %v3157_v48 = vpop.f32.mrf.mxu1  ;;  %v335_v56 = vpop.f32.mrf.mxu0 }
 0x15d   :  { %v4013_v57 = vadd.f32 %v335_v56, %v3865_v18  ;;  %631 = vadd.xlane.f32.xlu1 %v630_v50 }
 0x15e   :  { %v539_v59 = vpop.f32.mrf.mxu1  ;;  %v4015_v63 = vpop.f32.mrf.mxu0 }
 0x15f   :  { %5952 = vst [vmem:[#allocation34_spill] sm:$0xff] %v4015_v63  ;;  %v4018_v6 = vadd.f32 %v539_v59, %v3862_v16  ;;  %v633_v8 = vadd.f32 %v4008_v45, %v4013_v57 }
 0x160   :  { %v3160_v7 = vpop.f32.mrf.mxu1  ;;  %v341_v17 = vpop.f32.mrf.mxu0 }
 0x161   :  { %v4023_v27 = vadd.f32 %v341_v17, %v3865_v18  ;;  %634 = vadd.xlane.f32.xlu0 %v633_v8 }
 0x162   :  { %v544_v31 = vpop.f32.mrf.mxu1  ;;  %v4025_v34 = vpop.f32.mrf.mxu0 }
 0x163   :  { %5953 = vst [vmem:[#allocation35_spill] sm:$0xff] %v4025_v34  ;;  %v4028_v38 = vadd.f32 %v544_v31, %v3862_v16  ;;  %v636_v50 = vadd.f32 %v4018_v6, %v4023_v27 }
 0x164   :  { %v3163_v48 = vpop.f32.mrf.mxu1  ;;  %v347_v56 = vpop.f32.mrf.mxu0 }
 0x165   :  { %v4033_v59 = vadd.f32 %v347_v56, %v3865_v18  ;;  %637 = vadd.xlane.f32.xlu1 %v636_v50 }
 0x166   :  { %v549_v7 = vpop.f32.mrf.mxu1  ;;  %v4035_v0 = vpop.f32.mrf.mxu0 }
 0x167   :  { %5954 = vst [vmem:[#allocation36_spill] sm:$0xff] %v4035_v0  ;;  %v4038_v8 = vadd.f32 %v549_v7, %v3862_v16  ;;  %v639_v31 = vadd.f32 %v4028_v38, %v4033_v59 }
 0x168   :  { %v3166_v17 = vpop.f32.mrf.mxu1  ;;  %v353_v34 = vpop.f32.mrf.mxu0 }
 0x169   :  { %v4043_v48 = vadd.f32 %v353_v34, %v3865_v18  ;;  %640 = vadd.xlane.f32.xlu0 %v639_v31 }
 0x16a   :  { %v554_v63 = vpop.f32.mrf.mxu1  ;;  %v4045_v43 = vpop.f32.mrf.mxu0 }
 0x16b   :  { %5955 = vst [vmem:[#allocation37_spill] sm:$0xff] %v4045_v43  ;;  %v4048_v50 = vadd.f32 %v554_v63, %v3862_v16  ;;  %v642_v7 = vadd.f32 %v4038_v8, %v4043_v48 }
 0x16c   :  { %v3169_v56 = vpop.f32.mrf.mxu1  ;;  %v359_v0 = vpop.f32.mrf.mxu0 }
 0x16d   :  { %v4053_v17 = vadd.f32 %v359_v0, %v3865_v18  ;;  %643 = vadd.xlane.f32.xlu1 %v642_v7 }
 0x16e   :  { %v559_v21 = vpop.f32.mrf.mxu1  ;;  %v4055_v1 = vpop.f32.mrf.mxu0 }
 0x16f   :  { %5956 = vst [vmem:[#allocation38_spill] sm:$0xff] %v4055_v1  ;;  %v4058_v34 = vadd.f32 %v559_v21, %v3862_v16  ;;  %v645_v63 = vadd.f32 %v4048_v50, %v4053_v17 }
 0x170   :  { %v3172_v31 = vpop.f32.mrf.mxu1  ;;  %v365_v43 = vpop.f32.mrf.mxu0 }
 0x171   :  { %v4063_v56 = vadd.f32 %v365_v43, %v3865_v18  ;;  %646 = vadd.xlane.f32.xlu0 %v645_v63 }
 0x172   :  { %v564_v52 = vpop.f32.mrf.mxu1  ;;  %v4065_v41 = vpop.f32.mrf.mxu0 }
 0x173   :  { %5957 = vst [vmem:[#allocation39_spill] sm:$0xff] %v4065_v41  ;;  %v4068_v0 = vadd.f32 %v564_v52, %v3862_v16  ;;  %v648_v21 = vadd.f32 %v4058_v34, %v4063_v56 }
 0x174   :  { %v3175_v7 = vpop.f32.mrf.mxu1  ;;  %v371_v1 = vpop.f32.mrf.mxu0 }
 0x175   :  { %v4073_v31 = vadd.f32 %v371_v1, %v3865_v18  ;;  %649 = vadd.xlane.f32.xlu1 %v648_v21 }
 0x176   :  { %v569_v28 = vpop.f32.mrf.mxu1  ;;  %v4075_v11 = vpop.f32.mrf.mxu0 }
 0x177   :  { %5958 = vst [vmem:[#allocation40_spill] sm:$0xff] %v4075_v11  ;;  %v4078_v43 = vadd.f32 %v569_v28, %v3862_v16  ;;  %v651_v52 = vadd.f32 %v4068_v0, %v4073_v31 }
 0x178   :  { %v3178_v63 = vpop.f32.mrf.mxu1  ;;  %v377_v41 = vpop.f32.mrf.mxu0 }
 0x179   :  { %v4083_v7 = vadd.f32 %v377_v41, %v3865_v18  ;;  %652 = vadd.xlane.f32.xlu1 %v651_v52 }
 0x17a   :  { %v574_v4 = vpop.f32.mrf.mxu1  ;;  %v4085_v60 = vpop.f32.mrf.mxu0 }
 0x17b   :  { %5959 = vst [vmem:[#allocation41_spill] sm:$0xff] %v4085_v60  ;;  %v4088_v1 = vadd.f32 %v574_v4, %v3862_v16  ;;  %v654_v28 = vadd.f32 %v4078_v43, %v4083_v7 }
 0x17c   :  { %v3181_v21 = vpop.f32.mrf.mxu1  ;;  %v383_v11 = vpop.f32.mrf.mxu0 }
 0x17d   :  { %v4093_v63 = vadd.f32 %v383_v11, %v3865_v18  ;;  %655 = vadd.xlane.f32.xlu1 %v654_v28 }
 0x17e   :  { %v579_v53 = vpop.f32.mrf.mxu1  ;;  %v4095_v46 = vpop.f32.mrf.mxu0 }
 0x17f   :  { %5960 = vst [vmem:[#allocation42_spill] sm:$0xff] %v4095_v46  ;;  %v4098_v41 = vadd.f32 %v579_v53, %v3862_v16  ;;  %v657_v4 = vadd.f32 %v4088_v1, %v4093_v63 }
 0x180   :  { %v3184_v52 = vpop.f32.mrf.mxu1  ;;  %v389_v60 = vpop.f32.mrf.mxu0 }
 0x181   :  { %v4103_v21 = vadd.f32 %v389_v60, %v3865_v18  ;;  %658 = vadd.xlane.f32.xlu1 %v657_v4  ;;  %v1389_v4 = vld [vmem:[#allocation7 + $0xf8] sm:$0xff] }
 0x182   :  { %v584_v39 = vpop.f32.mrf.mxu1  ;;  %v4105_v32 = vpop.f32.mrf.mxu0  ;;  %1430 = vmatprep.subr.mxu0 %v1389_v4  ;;  %v1377_v4 = vld [vmem:[#allocation7 + $0x98] sm:$0xff] }
 0x183   :  { %5961 = vst [vmem:[#allocation43_spill] sm:$0xff] %v4105_v32  ;;  %v4108_v11 = vadd.f32 %v584_v39, %v3862_v16  ;;  %v660_v53 = vadd.f32 %v4098_v41, %v4103_v21  ;;  %1431 = vmatpush1.msra.mxu0 %v1388_v25  ;;  %v1387_v32 = vld [vmem:[#allocation7 + $0xe8] sm:$0xff]  ;;  %v1386_v16 = vld [vmem:[#allocation7 + $0xe0] sm:$0xff]  ;;  %v1385_v39 = vld [vmem:[#allocation7 + $0xd8] sm:$0xff] }
 0x184   :  { %v3187_v28 = vpop.f32.mrf.mxu1  ;;  %v395_v46 = vpop.f32.mrf.mxu0  ;;  %1432 = vmatprep.subr.mxu0 %v1387_v32  ;;  %v1376_v25 = vld [vmem:[#allocation7 + $0x90] sm:$0xff]  ;;  %v1375_v32 = vld [vmem:[#allocation7 + $0x88] sm:$0xff] }
 0x185   :  { %v4113_v52 = vadd.f32 %v395_v46, %v3865_v18  ;;  %661 = vadd.xlane.f32.xlu1 %v660_v53  ;;  %1433 = vmatpush1.msra.mxu0 %v1386_v16  ;;  %v1384_v28 = vld [vmem:[#allocation7 + $0xd0] sm:$0xff]  ;;  %v1382_v18 = vld [vmem:[#allocation7 + $0xc0] sm:$0xff]  ;;  %v1381_v46 = vld [vmem:[#allocation7 + $0xb8] sm:$0xff] }
 0x186   :  { %1434 = vmatprep.subr.mxu0 %v1385_v39  ;;  %v1380_v53 = vld [vmem:[#allocation7 + $0xb0] sm:$0xff]  ;;  %v1374_v16 = vld [vmem:[#allocation7 + $0x80] sm:$0xff] }
 0x187   :  { %v663_v60 = vadd.f32 %v4108_v11, %v4113_v52  ;;  %1435 = vmatpush1.msra.mxu0 %v1384_v28  ;;  %v1372_v39 = vld [vmem:[#allocation7 + $0x70] sm:$0xff]  ;;  %v1371_v28 = vld [vmem:[#allocation7 + $0x68] sm:$0xff] }
 0x188   :  { %1436 = vmatprep.subr.mxu0 %v1383_v19  ;;  %v1370_v19 = vld [vmem:[#allocation7 + $0x60] sm:$0xff] }
 0x189   :  { %664 = vadd.xlane.f32.xlu1 %v663_v60  ;;  %1437 = vmatpush1.msra.mxu0 %v1382_v18  ;;  %v1379_v60 = vld [vmem:[#allocation7 + $0xa8] sm:$0xff]  ;;  %v1369_v18 = vld [vmem:[#allocation7 + $0x58] sm:$0xff] }
 0x18a   :  { %1438 = vmatprep.subr.mxu0 %v1381_v46  ;;  %v1368_v46 = vld [vmem:[#allocation7 + $0x50] sm:$0xff] }
 0x18b   :  { %1439 = vmatpush1.msra.mxu0 %v1380_v53  ;;  %v1367_v53 = vld [vmem:[#allocation7 + $0x48] sm:$0xff] }
 0x18c   :  { %1440 = vmatprep.subr.mxu0 %v1379_v60  ;;  %v1366_v60 = vld [vmem:[#allocation7 + $0x40] sm:$0xff] }
 0x18d   :  { %1441 = vmatpush1.msra.mxu0 %v1378_v13  ;;  %v1365_v13 = vld [vmem:[#allocation7 + $0x38] sm:$0xff] }
 0x18e   :  { %1442 = vmatprep.subr.mxu0 %v1377_v4  ;;  %v1364_v4 = vld [vmem:[#allocation7 + $0x30] sm:$0xff] }
 0x18f   :  { %1443 = vmatpush1.msra.mxu0 %v1376_v25  ;;  %v1363_v25 = vld [vmem:[#allocation7 + $0x28] sm:$0xff] }
 0x190   :  { %1444 = vmatprep.subr.mxu0 %v1375_v32  ;;  %v1362_v32 = vld [vmem:[#allocation7 + $0x20] sm:$0xff] }
 0x191   :  { %1445 = vmatpush1.msra.mxu0 %v1374_v16  ;;  %v1361_v16 = vld [vmem:[#allocation7 + $0x18] sm:$0xff] }
 0x192   :  { %1446 = vmatprep.subr.mxu0 %v1373_v14  ;;  %v1360_v14 = vld [vmem:[#allocation7 + $0x10] sm:$0xff] }
 0x193   :  { %1447 = vmatpush1.msra.mxu0 %v1372_v39  ;;  %v1359_v39 = vld [vmem:[#allocation7 + $0x8] sm:$0xff] }
 0x194   :  { %1448 = vmatprep.subr.mxu0 %v1371_v28  ;;  %v1358_v28 = vld [vmem:[#allocation7] sm:$0xff] }
 0x195   :  { %1449 = vmatpush1.msra.mxu0 %v1370_v19  ;;  %v1421_v19 = vld [vmem:[#allocation7 + $0x1f8] sm:$0xff] }
 0x196   :  { %1450 = vmatprep.subr.mxu0 %v1369_v18  ;;  %v1420_v18 = vld [vmem:[#allocation7 + $0x1f0] sm:$0xff] }
 0x197   :  { %1451 = vmatpush1.msra.mxu0 %v1368_v46  ;;  %v1419_v46 = vld [vmem:[#allocation7 + $0x1e8] sm:$0xff] }
 0x198   :  { %1452 = vmatprep.subr.mxu0 %v1367_v53 }
 0x199   :  { %1453 = vmatpush1.msra.mxu0 %v1366_v60  ;;  %v1418_v60 = vld [vmem:[#allocation7 + $0x1e0] sm:$0xff] }
 0x19a   :  { %1454 = vmatprep.subr.mxu0 %v1365_v13 }
 0x19b   :  { %1455 = vmatpush1.msra.mxu0 %v1364_v4 }
 0x19c   :  { %1456 = vmatprep.subr.mxu0 %v1363_v25 }
 0x19d   :  { %1457 = vmatpush1.msra.mxu0 %v1362_v32 }
 0x19e   :  { %1458 = vmatprep.subr.mxu0 %v1361_v16 }
 0x19f   :  { %1459 = vmatpush1.msra.mxu0 %v1360_v14 }
 0x1a0   :  { %1460 = vmatprep.subr.mxu0 %v1359_v39 }
 0x1a1   :  { %1461 = vmatpush1.msra.mxu0 %v1358_v28 }
 0x1a2   :  { %1462 = vmatprep.subr.mxu0 %v1421_v19 }
 0x1a3   :  { %1463 = vmatpush2.msra.mxu0 %v1420_v18 }
 0x1a4   :  { %1464 = vmatprep.subr.mxu0 %v1419_v46 }
 0x1a5   :  { %1465 = vmatpush2.msra.mxu0 %v1418_v60 }
 0x1b2   :  { %v593_v53 = vpop.xlane.xlu0 %592 }
 0x1b3   :  { %v667_v12 = vmul.f32 0.00390625, %v593_v53 }
 0x1b5   :  { %v4118_v13 = vsub.f32 %v3873_v23, %v667_v12  ;;  %v4121_v4 = vsub.f32 %v3870_v20, %v667_v12 }
 0x1b6   :  { %v596_v25 = vpop.xlane.xlu0 %595 }
 0x1b7   :  { %v668_v32 = vmul.f32 0.00390625, %v596_v25  ;;  %v742_v16 = vmul.f32 %v4118_v13, %v4118_v13  ;;  %v743_v14 = vmul.f32 %v4121_v4, %v4121_v4 }
 0x1b9   :  { %v4128_v39 = vsub.f32 %v3883_v30, %v668_v32  ;;  %v4131_v28 = vsub.f32 %v3878_v26, %v668_v32  ;;  %v792_v23 = vadd.f32 %v743_v14, %v742_v16 }
 0x1ba   :  { %v599_v19 = vpop.xlane.xlu1 %598 }
 0x1bb   :  { %v669_v18 = vmul.f32 0.00390625, %v599_v19  ;;  %793 = vadd.xlane.f32.xlu0 %v792_v23  ;;  %v744_v12 = vmul.f32 %v4128_v39, %v4128_v39  ;;  %v745_v20 = vmul.f32 %v4131_v28, %v4131_v28 }
 0x1bd   :  { %v4138_v46 = vsub.f32 %v3893_v37, %v669_v18  ;;  %v4141_v53 = vsub.f32 %v3888_v33, %v669_v18  ;;  %v795_v30 = vadd.f32 %v745_v20, %v744_v12 }
 0x1be   :  { %v602_v60 = vpop.xlane.xlu1 %601 }
 0x1bf   :  { %v670_v26 = vmul.f32 0.00390625, %v602_v60  ;;  %796 = vadd.xlane.f32.xlu0 %v795_v30  ;;  %v746_v25 = vmul.f32 %v4138_v46, %v4138_v46  ;;  %v747_v32 = vmul.f32 %v4141_v53, %v4141_v53 }
 0x1c1   :  { %v4148_v16 = vsub.f32 %v3903_v44, %v670_v26  ;;  %v4151_v14 = vsub.f32 %v3898_v40, %v670_v26  ;;  %v798_v37 = vadd.f32 %v747_v32, %v746_v25 }
 0x1c2   :  { %v605_v23 = vpop.xlane.xlu0 %604 }
 0x1c3   :  { %v671_v33 = vmul.f32 0.00390625, %v605_v23  ;;  %799 = vadd.xlane.f32.xlu0 %v798_v37  ;;  %v748_v19 = vmul.f32 %v4148_v16, %v4148_v16  ;;  %v749_v18 = vmul.f32 %v4151_v14, %v4151_v14 }
 0x1c5   :  { %v4158_v12 = vsub.f32 %v3913_v51, %v671_v33  ;;  %v4161_v20 = vsub.f32 %v3908_v47, %v671_v33  ;;  %v801_v44 = vadd.f32 %v749_v18, %v748_v19 }
 0x1c6   :  { %v608_v30 = vpop.xlane.xlu1 %607 }
 0x1c7   :  { %v672_v40 = vmul.f32 0.00390625, %v608_v30  ;;  %802 = vadd.xlane.f32.xlu0 %v801_v44  ;;  %v750_v60 = vmul.f32 %v4158_v12, %v4158_v12  ;;  %v751_v26 = vmul.f32 %v4161_v20, %v4161_v20 }
 0x1c9   :  { %v4168_v25 = vsub.f32 %v3923_v58, %v672_v40  ;;  %v4171_v32 = vsub.f32 %v3918_v54, %v672_v40  ;;  %v804_v51 = vadd.f32 %v751_v26, %v750_v60 }
 0x1ca   :  { %v611_v37 = vpop.xlane.xlu0 %610 }
 0x1cb   :  { %v673_v47 = vmul.f32 0.00390625, %v611_v37  ;;  %805 = vadd.xlane.f32.xlu0 %v804_v51  ;;  %v752_v23 = vmul.f32 %v4168_v25, %v4168_v25  ;;  %v753_v33 = vmul.f32 %v4171_v32, %v4171_v32 }
 0x1cd   :  { %v4178_v19 = vsub.f32 %v3933_v2, %v673_v47  ;;  %v4181_v18 = vsub.f32 %v3928_v61, %v673_v47  ;;  %v807_v58 = vadd.f32 %v753_v33, %v752_v23 }
 0x1ce   :  { %v614_v44 = vpop.xlane.xlu1 %613 }
 0x1cf   :  { %v674_v54 = vmul.f32 0.00390625, %v614_v44  ;;  %808 = vadd.xlane.f32.xlu0 %v807_v58  ;;  %v754_v30 = vmul.f32 %v4178_v19, %v4178_v19  ;;  %v755_v40 = vmul.f32 %v4181_v18, %v4181_v18  ;;  %v1417_v58 = vld [vmem:[#allocation7 + $0x1d8] sm:$0xff]  ;;  %v1416_v44 = vld [vmem:[#allocation7 + $0x1d0] sm:$0xff] }
 0x1d0   :  { %1466 = vmatprep.subr.mxu0 %v1417_v58 }
 0x1d1   :  { %v4188_v60 = vsub.f32 %v3943_v9, %v674_v54  ;;  %v4191_v26 = vsub.f32 %v3938_v5, %v674_v54  ;;  %v810_v2 = vadd.f32 %v755_v40, %v754_v30  ;;  %1467 = vmatpush2.msra.mxu0 %v1416_v44 }
 0x1d2   :  { %v617_v51 = vpop.xlane.xlu0 %616 }
 0x1d3   :  { %v675_v61 = vmul.f32 0.00390625, %v617_v51  ;;  %811 = vadd.xlane.f32.xlu1 %v810_v2  ;;  %v756_v37 = vmul.f32 %v4188_v60, %v4188_v60  ;;  %v757_v47 = vmul.f32 %v4191_v26, %v4191_v26  ;;  %v1415_v2 = vld [vmem:[#allocation7 + $0x1c8] sm:$0xff]  ;;  %v1413_v51 = vld [vmem:[#allocation7 + $0x1b8] sm:$0xff] }
 0x1d4   :  { %1468 = vmatprep.subr.mxu0 %v1415_v2 }
 0x1d5   :  { %v4198_v23 = vsub.f32 %v3953_v24, %v675_v61  ;;  %v4201_v33 = vsub.f32 %v3948_v15, %v675_v61  ;;  %v813_v9 = vadd.f32 %v757_v47, %v756_v37  ;;  %v1414_v24 = vld [vmem:[#allocation7 + $0x1c0] sm:$0xff]  ;;  %v1412_v15 = vld [vmem:[#allocation7 + $0x1b0] sm:$0xff] }
 0x1d6   :  { %v620_v5 = vpop.xlane.xlu1 %619  ;;  %1469 = vmatpush2.msra.mxu0 %v1414_v24 }
 0x1d7   :  { %5962 = vst [vmem:[#allocation44_spill] sm:$0xff] %v4198_v23  ;;  %5963 = vst [vmem:[#allocation45_spill] sm:$0xff] %v4201_v33  ;;  %v676_v54 = vmul.f32 0.00390625, %v620_v5  ;;  %814 = vadd.xlane.f32.xlu0 %v813_v9  ;;  %v758_v30 = vmul.f32 %v4198_v23, %v4198_v23  ;;  %v759_v40 = vmul.f32 %v4201_v33, %v4201_v33  ;;  %v1411_v9 = vld [vmem:[#allocation7 + $0x1a8] sm:$0xff]  ;;  %1470 = vmatprep.subr.mxu0 %v1413_v51  ;;  %v1410_v5 = vld [vmem:[#allocation7 + $0x1a0] sm:$0xff] }
 0x1d8   :  { %1471 = vmatpush2.msra.mxu0 %v1412_v15  ;;  %v1408_v33 = vld [vmem:[#allocation7 + $0x190] sm:$0xff]  ;;  %v1406_v51 = vld [vmem:[#allocation7 + $0x180] sm:$0xff] }
 0x1d9   :  { %v4208_v61 = vsub.f32 %v3963_v36, %v676_v54  ;;  %v4211_v37 = vsub.f32 %v3958_v29, %v676_v54  ;;  %v816_v47 = vadd.f32 %v759_v40, %v758_v30  ;;  %v1409_v36 = vld [vmem:[#allocation7 + $0x198] sm:$0xff]  ;;  %1472 = vmatprep.subr.mxu0 %v1411_v9  ;;  %v1407_v40 = vld [vmem:[#allocation7 + $0x188] sm:$0xff] }
 0x1da   :  { %v623_v58 = vpop.xlane.xlu0 %622  ;;  %1473 = vmatpush2.msra.mxu0 %v1410_v5 }
 0x1db   :  { %v677_v23 = vmul.f32 0.00390625, %v623_v58  ;;  %817 = vadd.xlane.f32.xlu1 %v816_v47  ;;  %v760_v44 = vmul.f32 %v4208_v61, %v4208_v61  ;;  %v761_v2 = vmul.f32 %v4211_v37, %v4211_v37  ;;  %1474 = vmatprep.subr.mxu0 %v1409_v36  ;;  %v1404_v58 = vld [vmem:[#allocation7 + $0x170] sm:$0xff]  ;;  %v1402_v36 = vld [vmem:[#allocation7 + $0x160] sm:$0xff] }
 0x1dc   :  { %1475 = vmatpush2.msra.mxu0 %v1408_v33 }
 0x1dd   :  { %v4218_v29 = vsub.f32 %v3973_v49, %v677_v23  ;;  %v4221_v54 = vsub.f32 %v3968_v42, %v677_v23  ;;  %v819_v30 = vadd.f32 %v761_v2, %v760_v44  ;;  %v1405_v49 = vld [vmem:[#allocation7 + $0x178] sm:$0xff]  ;;  %1476 = vmatprep.subr.mxu0 %v1407_v40  ;;  %v1403_v44 = vld [vmem:[#allocation7 + $0x168] sm:$0xff] }
 0x1de   :  { %v626_v24 = vpop.xlane.xlu1 %625  ;;  %1477 = vmatpush2.msra.mxu0 %v1406_v51 }
 0x1df   :  { %v678_v47 = vmul.f32 0.00390625, %v626_v24  ;;  %820 = vadd.xlane.f32.xlu0 %v819_v30  ;;  %v762_v15 = vmul.f32 %v4218_v29, %v4218_v29  ;;  %v763_v9 = vmul.f32 %v4221_v54, %v4221_v54  ;;  %1478 = vmatprep.subr.mxu0 %v1405_v49  ;;  %v1400_v24 = vld [vmem:[#allocation7 + $0x150] sm:$0xff]  ;;  %v1398_v49 = vld [vmem:[#allocation7 + $0x140] sm:$0xff] }
 0x1e0   :  { %1479 = vmatpush2.msra.mxu0 %v1404_v58 }
 0x1e1   :  { %v4228_v42 = vsub.f32 %v3983_v62, %v678_v47  ;;  %v4231_v23 = vsub.f32 %v3978_v55, %v678_v47  ;;  %v822_v5 = vadd.f32 %v763_v9, %v762_v15  ;;  %v1401_v62 = vld [vmem:[#allocation7 + $0x158] sm:$0xff]  ;;  %1480 = vmatprep.subr.mxu0 %v1403_v44  ;;  %v1399_v15 = vld [vmem:[#allocation7 + $0x148] sm:$0xff] }
 0x1e2   :  { %v629_v2 = vpop.xlane.xlu0 %628  ;;  %1481 = vmatpush2.msra.mxu0 %v1402_v36  ;;  %v1397_v36 = vld [vmem:[#allocation7 + $0x138] sm:$0xff] }
 0x1e3   :  { %v679_v30 = vmul.f32 0.00390625, %v629_v2  ;;  %823 = vadd.xlane.f32.xlu1 %v822_v5  ;;  %v764_v33 = vmul.f32 %v4228_v42, %v4228_v42  ;;  %v765_v40 = vmul.f32 %v4231_v23, %v4231_v23  ;;  %1482 = vmatprep.subr.mxu0 %v1401_v62 }
 0x1e4   :  { %1483 = vmatpush2.msra.mxu0 %v1400_v24 }
 0x1e5   :  { %v4238_v55 = vsub.f32 %v3993_v10, %v679_v30  ;;  %v4241_v51 = vsub.f32 %v3988_v3, %v679_v30  ;;  %v825_v47 = vadd.f32 %v765_v40, %v764_v33  ;;  %1484 = vmatprep.subr.mxu0 %v1399_v15  ;;  %v1396_v30 = vld [vmem:[#allocation7 + $0x130] sm:$0xff]  ;;  %v1395_v33 = vld [vmem:[#allocation7 + $0x128] sm:$0xff] }
 0x1e6   :  { %v632_v9 = vpop.xlane.xlu1 %631  ;;  %1485 = vmatpush2.msra.mxu0 %v1398_v49  ;;  %v1393_v49 = vld [vmem:[#allocation7 + $0x118] sm:$0xff] }
 0x1e7   :  { %v680_v5 = vmul.f32 0.00390625, %v632_v9  ;;  %826 = vadd.xlane.f32.xlu0 %v825_v47  ;;  %v766_v58 = vmul.f32 %v4238_v55, %v4238_v55  ;;  %v767_v44 = vmul.f32 %v4241_v51, %v4241_v51  ;;  %1486 = vmatprep.subr.mxu0 %v1397_v36 }
 0x1e8   :  { %1487 = vmatpush2.msra.mxu0 %v1396_v30  ;;  %v1390_v30 = vld [vmem:[#allocation7 + $0x100] sm:$0xff] }
 0x1e9   :  { %v4248_v10 = vsub.f32 %v4003_v35, %v680_v5  ;;  %v4251_v3 = vsub.f32 %v3998_v22, %v680_v5  ;;  %v828_v2 = vadd.f32 %v767_v44, %v766_v58  ;;  %1488 = vmatprep.subr.mxu0 %v1395_v33  ;;  %v1394_v35 = vld [vmem:[#allocation7 + $0x120] sm:$0xff]  ;;  %v1392_v5 = vld [vmem:[#allocation7 + $0x110] sm:$0xff] }
 0x1ea   :  { %v635_v40 = vpop.xlane.xlu0 %634  ;;  %1489 = vmatpush2.msra.mxu0 %v1394_v35 }
 0x1eb   :  { %v681_v62 = vmul.f32 0.00390625, %v635_v40  ;;  %829 = vadd.xlane.f32.xlu1 %v828_v2  ;;  %v768_v47 = vmul.f32 %v4248_v10, %v4248_v10  ;;  %v769_v24 = vmul.f32 %v4251_v3, %v4251_v3  ;;  %1490 = vmatprep.subr.mxu0 %v1393_v49 }
 0x1ec   :  { %1491 = vmatpush2.msra.mxu0 %v1392_v5 }
 0x1ed   :  { %v4258_v22 = vsub.f32 %v4013_v57, %v681_v62  ;;  %v4261_v15 = vsub.f32 %v4008_v45, %v681_v62  ;;  %v831_v9 = vadd.f32 %v769_v24, %v768_v47  ;;  %v1391_v57 = vld [vmem:[#allocation7 + $0x108] sm:$0xff] }
 0x1ee   :  { %v638_v58 = vpop.xlane.xlu1 %637  ;;  %1492 = vmatprep.subr.mxu0 %v1391_v57 }
 0x1ef   :  { %v682_v44 = vmul.f32 0.00390625, %v638_v58  ;;  %832 = vadd.xlane.f32.xlu0 %v831_v9  ;;  %v770_v2 = vmul.f32 %v4258_v22, %v4258_v22  ;;  %v771_v36 = vmul.f32 %v4261_v15, %v4261_v15  ;;  %1493 = vmatpush2.msra.mxu0 %v1390_v30 }
 0x1f1   :  { %v4268_v45 = vsub.f32 %v4023_v27, %v682_v44  ;;  %v4271_v33 = vsub.f32 %v4018_v6, %v682_v44  ;;  %v834_v40 = vadd.f32 %v771_v36, %v770_v2 }
 0x1f2   :  { %v641_v62 = vpop.xlane.xlu0 %640 }
 0x1f3   :  { %v683_v47 = vmul.f32 0.00390625, %v641_v62  ;;  %835 = vadd.xlane.f32.xlu1 %v834_v40  ;;  %v772_v24 = vmul.f32 %v4268_v45, %v4268_v45  ;;  %v773_v35 = vmul.f32 %v4271_v33, %v4271_v33 }
 0x1f5   :  { %v4278_v9 = vsub.f32 %v4033_v59, %v683_v47  ;;  %v4281_v27 = vsub.f32 %v4028_v38, %v683_v47  ;;  %v837_v49 = vadd.f32 %v773_v35, %v772_v24 }
 0x1f6   :  { %v644_v6 = vpop.xlane.xlu1 %643 }
 0x1f7   :  { %v684_v5 = vmul.f32 0.00390625, %v644_v6  ;;  %838 = vadd.xlane.f32.xlu0 %v837_v49  ;;  %v774_v58 = vmul.f32 %v4278_v9, %v4278_v9  ;;  %v775_v44 = vmul.f32 %v4281_v27, %v4281_v27 }
 0x1f9   :  { %v4288_v2 = vsub.f32 %v4043_v48, %v684_v5  ;;  %v4291_v36 = vsub.f32 %v4038_v8, %v684_v5  ;;  %v840_v59 = vadd.f32 %v775_v44, %v774_v58 }
 0x1fa   :  { %v647_v57 = vpop.xlane.xlu0 %646 }
 0x1fb   :  { %v685_v38 = vmul.f32 0.00390625, %v647_v57  ;;  %841 = vadd.xlane.f32.xlu1 %v840_v59  ;;  %v776_v30 = vmul.f32 %v4288_v2, %v4288_v2  ;;  %v777_v40 = vmul.f32 %v4291_v36, %v4291_v36 }
 0x1fd   :  { %v4298_v62 = vsub.f32 %v4053_v17, %v685_v38  ;;  %v4301_v47 = vsub.f32 %v4048_v50, %v685_v38  ;;  %v843_v48 = vadd.f32 %v777_v40, %v776_v30 }
 0x1fe   :  { %v650_v24 = vpop.xlane.xlu1 %649 }
 0x1ff   :  { %v686_v8 = vmul.f32 0.00390625, %v650_v24  ;;  %844 = vadd.xlane.f32.xlu0 %v843_v48  ;;  %v778_v35 = vmul.f32 %v4298_v62, %v4298_v62  ;;  %v779_v49 = vmul.f32 %v4301_v47, %v4301_v47 }
 0x201   :  { %v4308_v6 = vsub.f32 %v4063_v56, %v686_v8  ;;  %v4311_v5 = vsub.f32 %v4058_v34, %v686_v8  ;;  %v846_v17 = vadd.f32 %v779_v49, %v778_v35 }
 0x202   :  { %v653_v58 = vpop.xlane.xlu1 %652 }
 0x203   :  { %v687_v50 = vmul.f32 0.00390625, %v653_v58  ;;  %847 = vadd.xlane.f32.xlu1 %v846_v17  ;;  %v780_v44 = vmul.f32 %v4308_v6, %v4308_v6  ;;  %v781_v59 = vmul.f32 %v4311_v5, %v4311_v5 }
 0x205   :  { %v4318_v57 = vsub.f32 %v4073_v31, %v687_v50  ;;  %v4321_v38 = vsub.f32 %v4068_v0, %v687_v50  ;;  %v849_v56 = vadd.f32 %v781_v59, %v780_v44 }
 0x206   :  { %v656_v30 = vpop.xlane.xlu1 %655 }
 0x207   :  { %5964 = vst [vmem:[#allocation46_spill] sm:$0xff] %v4318_v57  ;;  %5965 = vst [vmem:[#allocation47_spill] sm:$0xff] %v4321_v38  ;;  %v688_v34 = vmul.f32 0.00390625, %v656_v30  ;;  %850 = vadd.xlane.f32.xlu0 %v849_v56  ;;  %v782_v40 = vmul.f32 %v4318_v57, %v4318_v57  ;;  %v783_v48 = vmul.f32 %v4321_v38, %v4321_v38 }
 0x209   :  { %v4328_v24 = vsub.f32 %v4083_v7, %v688_v34  ;;  %v4331_v8 = vsub.f32 %v4078_v43, %v688_v34  ;;  %v852_v31 = vadd.f32 %v783_v48, %v782_v40 }
 0x20a   :  { %v659_v35 = vpop.xlane.xlu1 %658 }
 0x20b   :  { %5966 = vst [vmem:[#allocation48_spill] sm:$0xff] %v4328_v24  ;;  %5967 = vst [vmem:[#allocation49_spill] sm:$0xff] %v4331_v8  ;;  %v689_v0 = vmul.f32 0.00390625, %v659_v35  ;;  %853 = vadd.xlane.f32.xlu1 %v852_v31  ;;  %v784_v49 = vmul.f32 %v4328_v24, %v4328_v24  ;;  %v785_v17 = vmul.f32 %v4331_v8, %v4331_v8 }
 0x20d   :  { %v4338_v58 = vsub.f32 %v4093_v63, %v689_v0  ;;  %v4341_v50 = vsub.f32 %v4088_v1, %v689_v0  ;;  %v855_v7 = vadd.f32 %v785_v17, %v784_v49 }
 0x20e   :  { %v662_v44 = vpop.xlane.xlu1 %661 }
 0x20f   :  { %5968 = vst [vmem:[#allocation50_spill] sm:$0xff] %v4338_v58  ;;  %5969 = vst [vmem:[#allocation51_spill] sm:$0xff] %v4341_v50  ;;  %v690_v43 = vmul.f32 0.00390625, %v662_v44  ;;  %856 = vadd.xlane.f32.xlu0 %v855_v7  ;;  %v786_v59 = vmul.f32 %v4338_v58, %v4338_v58  ;;  %v787_v56 = vmul.f32 %v4341_v50, %v4341_v50 }
 0x211   :  { %v4348_v30 = vsub.f32 %v4103_v21, %v690_v43  ;;  %v4351_v34 = vsub.f32 %v4098_v41, %v690_v43  ;;  %v858_v63 = vadd.f32 %v787_v56, %v786_v59 }
 0x212   :  { %v665_v40 = vpop.xlane.xlu1 %664 }
 0x213   :  { %5970 = vst [vmem:[#allocation52_spill] sm:$0xff] %v4348_v30  ;;  %5971 = vst [vmem:[#allocation53_spill] sm:$0xff] %v4351_v34  ;;  %v691_v1 = vmul.f32 0.00390625, %v665_v40  ;;  %859 = vadd.xlane.f32.xlu1 %v858_v63  ;;  %v788_v48 = vmul.f32 %v4348_v30, %v4348_v30  ;;  %v789_v31 = vmul.f32 %v4351_v34, %v4351_v34 }
 0x215   :  { %v4358_v35 = vsub.f32 %v4113_v52, %v691_v1  ;;  %v4361_v0 = vsub.f32 %v4108_v11, %v691_v1  ;;  %v861_v21 = vadd.f32 %v789_v31, %v788_v48  ;;  %v588_v1 = vld [vmem:[#allocation10] sm:$0x1f]  ;;  %v589_v31 = vld [vmem:[#allocation10 + $0x8] sm:$0x1f] }
 0x217   :  { %5972 = vst [vmem:[#allocation54_spill] sm:$0xff] %v4358_v35  ;;  %5973 = vst [vmem:[#allocation55_spill] sm:$0xff] %v4361_v0  ;;  %862 = vadd.xlane.f32.xlu0 %v861_v21  ;;  %v790_v41 = vmul.f32 %v4358_v35, %v4358_v35  ;;  %v791_v49 = vmul.f32 %v4361_v0, %v4361_v0  ;;  %v5974_v21 = vld [vmem:[#allocation16_spill] sm:$0xff] }
 0x218   :  { %v4368_v35 = vsub.s32 0, %v5974_v21 }
 0x219   :  { %v864_v17 = vadd.f32 %v791_v49, %v790_v41 }
 0x21a   :  { %5975 = vst [vmem:[#allocation56_spill] sm:$0xff] %v4368_v35  ;;  %v4371_v49 = vrot.slane %v588_v1, %v4368_v35 }
 0x21b   :  { %865 = vadd.xlane.f32.xlu1 %v864_v17 }
 0x244   :  { %v794_v7 = vpop.xlane.xlu0 %793 }
 0x245   :  { %v867_v44 = vmul.f32 0.00390625, %v794_v7  ;;  %v4374_v7 = vrot.slane %v589_v31, %v4368_v35 }
 0x247   :  { %v892_v43 = vadd.f32 1e-05, %v867_v44 }
 0x248   :  { %v797_v59 = vpop.xlane.xlu0 %796 }
 0x249   :  { %3202 = vrsqrt.f32 %v892_v43  ;;  %v868_v52 = vmul.f32 0.00390625, %v797_v59 }
 0x24b   :  { %v893_v56 = vadd.f32 1e-05, %v868_v52  ;;  %v5976_v52 = vld [vmem:[#allocation18_spill] sm:$0xff] }
 0x24c   :  { %v800_v63 = vpop.xlane.xlu0 %799 }
 0x24d   :  { %3204 = vrsqrt.f32 %v893_v56  ;;  %v869_v11 = vmul.f32 0.00390625, %v800_v63  ;;  %v4377_v56 = vrot.slane %v589_v31, %v5976_v52 }
 0x24f   :  { %v894_v40 = vadd.f32 1e-05, %v869_v11 }
 0x250   :  { %v803_v48 = vpop.xlane.xlu0 %802 }
 0x251   :  { %3206 = vrsqrt.f32 %v894_v40  ;;  %v870_v41 = vmul.f32 0.00390625, %v803_v48  ;;  %v4382_v48 = vrot.slane %v588_v1, %v5976_v52 }
 0x253   :  { %v895_v17 = vadd.f32 1e-05, %v870_v41 }
 0x254   :  { %v806_v44 = vpop.xlane.xlu0 %805 }
 0x255   :  { %3208 = vrsqrt.f32 %v895_v17  ;;  %v871_v43 = vmul.f32 0.00390625, %v806_v44 }
 0x256   :  { %v3203_v59 = vpop.eup %3202 }
 0x257   :  { %v950_v63 = vmul.f32 %v3203_v59, %v4371_v49  ;;  %v896_v11 = vadd.f32 1e-05, %v871_v43  ;;  %v951_v40 = vmul.f32 %v3203_v59, %v4374_v7 }
 0x258   :  { %v809_v21 = vpop.xlane.xlu0 %808 }
 0x259   :  { %3210 = vrsqrt.f32 %v896_v11  ;;  %v872_v41 = vmul.f32 0.00390625, %v809_v21  ;;  %v1001_v35 = vmul.f32 %v951_v40, %v4121_v4  ;;  %v1000_v17 = vmul.f32 %v950_v63, %v4118_v13 }
 0x25a   :  { %v3205_v44 = vpop.eup %3204 }
 0x25b   :  { %v897_v0 = vadd.f32 1e-05, %v872_v41  ;;  %v1059_v31 = vadd.f32 %v4377_v56, %v1001_v35  ;;  %v1058_v30 = vadd.f32 %v4382_v48, %v1000_v17  ;;  %v953_v43 = vmul.f32 %v3205_v44, %v4374_v7 }
 0x25c   :  { %v812_v34 = vpop.xlane.xlu1 %811  ;;  %v952_v59 = vmul.f32 %v3205_v44, %v4371_v49 }
 0x25d   :  { %3212 = vrsqrt.f32 %v897_v0  ;;  %v873_v1 = vmul.f32 0.00390625, %v812_v34  ;;  %v1159_v52 = vmul.f32 0.70710677, %v1059_v31  ;;  %v1158_v21 = vmul.f32 0.70710677, %v1058_v30 }
 0x25e   :  { %v3207_v11 = vpop.eup %3206  ;;  %v1003_v4 = vmul.f32 %v953_v43, %v4131_v28  ;;  %v1002_v13 = vmul.f32 %v952_v59, %v4128_v39 }
 0x25f   :  { %v898_v63 = vadd.f32 1e-05, %v873_v1  ;;  %3214 = verf.f32 %v1159_v52  ;;  %v955_v35 = vmul.f32 %v3207_v11, %v4374_v7  ;;  %v954_v40 = vmul.f32 %v3207_v11, %v4371_v49 }
 0x260   :  { %v815_v41 = vpop.xlane.xlu0 %814  ;;  %3216 = verf.f32 %v1158_v21  ;;  %v1061_v17 = vadd.f32 %v4377_v56, %v1003_v4  ;;  %v1060_v0 = vadd.f32 %v4382_v48, %v1002_v13 }
 0x261   :  { %3218 = vrsqrt.f32 %v898_v63  ;;  %v874_v34 = vmul.f32 0.00390625, %v815_v41  ;;  %v1005_v44 = vmul.f32 %v955_v35, %v4141_v53  ;;  %v1004_v28 = vmul.f32 %v954_v40, %v4138_v46 }
 0x262   :  { %v3209_v43 = vpop.eup %3208  ;;  %v1161_v39 = vmul.f32 0.70710677, %v1061_v17  ;;  %v1160_v59 = vmul.f32 0.70710677, %v1060_v0  ;;  %v1110_v50 = vmul.f32 0.5, %v1060_v0 }
 0x263   :  { %v4399_v52 = vadd.f32 %v4377_v56, %v1005_v44  ;;  %v4402_v1 = vadd.f32 %v4382_v48, %v1004_v28  ;;  %v957_v11 = vmul.f32 %v3209_v43, %v4374_v7  ;;  %v956_v4 = vmul.f32 %v3209_v43, %v4371_v49 }
 0x264   :  { %v818_v21 = vpop.xlane.xlu1 %817  ;;  %3220 = verf.f32 %v1161_v39  ;;  %v899_v13 = vadd.f32 1e-05, %v874_v34 }
 0x265   :  { %v875_v63 = vmul.f32 0.00390625, %v818_v21  ;;  %v1163_v53 = vmul.f32 0.70710677, %v4399_v52  ;;  %3222 = verf.f32 %v1160_v59  ;;  %v1162_v35 = vmul.f32 0.70710677, %v4402_v1 }
 0x266   :  { %v3211_v46 = vpop.eup %3210  ;;  %v1007_v40 = vmul.f32 %v957_v11, %v4151_v14  ;;  %v1006_v44 = vmul.f32 %v956_v4, %v4148_v16  ;;  %v1109_v4 = vmul.f32 0.5, %v1059_v31 }
 0x267   :  { %v900_v41 = vadd.f32 1e-05, %v875_v63  ;;  %3224 = verf.f32 %v1163_v53  ;;  %v959_v28 = vmul.f32 %v3211_v46, %v4374_v7  ;;  %v958_v34 = vmul.f32 %v3211_v46, %v4371_v49 }
 0x268   :  { %v821_v58 = vpop.xlane.xlu0 %820  ;;  %3226 = verf.f32 %v1162_v35  ;;  %v4412_v43 = vadd.f32 %v4377_v56, %v1007_v40  ;;  %v4416_v59 = vadd.f32 %v4382_v48, %v1006_v44  ;;  %v1108_v63 = vmul.f32 0.5, %v1058_v30 }
 0x269   :  { %3228 = vrsqrt.f32 %v899_v13  ;;  %v876_v39 = vmul.f32 0.00390625, %v821_v58  ;;  %v1009_v14 = vmul.f32 %v959_v28, %v4161_v20  ;;  %v1008_v21 = vmul.f32 %v958_v34, %v4158_v12 }
 0x26a   :  { %v3213_v11 = vpop.eup %3212  ;;  %3230 = vrsqrt.f32 %v900_v41  ;;  %v1165_v16 = vmul.f32 0.70710677, %v4412_v43  ;;  %v1164_v53 = vmul.f32 0.70710677, %v4416_v59  ;;  %v1111_v30 = vmul.f32 0.5, %v1061_v17 }
 0x26b   :  { %v4423_v35 = vadd.f32 %v4377_v56, %v1009_v14  ;;  %v4426_v46 = vadd.f32 %v4382_v48, %v1008_v21  ;;  %v961_v20 = vmul.f32 %v3213_v11, %v4374_v7  ;;  %v960_v40 = vmul.f32 %v3213_v11, %v4371_v49 }
 0x26c   :  { %v3215_v13 = vpop.eup %3214  ;;  %v824_v58 = vpop.xlane.xlu1 %823  ;;  %3232 = verf.f32 %v1165_v16  ;;  %v901_v44 = vadd.f32 1e-05, %v876_v39 }
 0x26d   :  { %v3217_v41 = vpop.eup %3216  ;;  %v877_v12 = vmul.f32 0.00390625, %v824_v58  ;;  %v1259_v31 = vadd.f32 1.0, %v3215_v13  ;;  %3234 = verf.f32 %v1164_v53  ;;  %v1167_v14 = vmul.f32 0.70710677, %v4423_v35 }
 0x26e   :  { %v3219_v28 = vpop.eup %3218  ;;  %v1258_v34 = vadd.f32 1.0, %v3217_v41  ;;  %v1166_v21 = vmul.f32 0.70710677, %v4426_v46  ;;  %v1011_v8 = vmul.f32 %v961_v20, %v4171_v32  ;;  %v1010_v39 = vmul.f32 %v960_v40, %v4168_v25 }
 0x26f   :  { %v902_v24 = vadd.f32 1e-05, %v877_v12  ;;  %v1309_v16 = vmul.f32 %v1259_v31, %v1109_v4  ;;  %3236 = verf.f32 %v1167_v14  ;;  %v963_v11 = vmul.f32 %v3219_v28, %v4374_v7 }
 0x270   :  { %v827_v57 = vpop.xlane.xlu0 %826  ;;  %v1308_v38 = vmul.f32 %v1258_v34, %v1108_v63  ;;  %3238 = vrsqrt.f32 %v901_v44  ;;  %v4436_v0 = vadd.f32 %v4377_v56, %v1011_v8  ;;  %v962_v4 = vmul.f32 %v3219_v28, %v4371_v49 }
 0x271   :  { %v3221_v17 = vpop.eup %3220  ;;  %v878_v13 = vmul.f32 0.00390625, %v827_v57  ;;  %1494 = vmatprep.mubr.f32.mxu0 %v1309_v16  ;;  %3240 = verf.f32 %v1166_v21  ;;  %v4440_v32 = vadd.f32 %v4382_v48, %v1010_v39  ;;  %v1013_v63 = vmul.f32 %v963_v11, %v4181_v18 }
 0x272   :  { %1495 = vmatmul.mubr.f32.vlgmr.msra.gmra.mxu0 %v1308_v38  ;;  %v1261_v53 = vadd.f32 1.0, %v3221_v17  ;;  %v3223_v25 = vpop.eup %3222  ;;  %3242 = vrsqrt.f32 %v902_v24  ;;  %v1113_v58 = vmul.f32 0.5, %v4399_v52  ;;  %v1169_v57 = vmul.f32 0.70710677, %v4436_v0 }
 0x273   :  { %v1012_v20 = vmul.f32 %v962_v4, %v4178_v19  ;;  %v903_v40 = vadd.f32 1e-05, %v878_v13  ;;  %v1260_v38 = vadd.f32 1.0, %v3223_v25  ;;  %v1168_v12 = vmul.f32 0.70710677, %v4440_v32 }
 0x274   :  { %v3225_v8 = vpop.eup %3224  ;;  %v830_v41 = vpop.xlane.xlu1 %829  ;;  %v1311_v44 = vmul.f32 %v1261_v53, %v1111_v30  ;;  %v1112_v18 = vmul.f32 0.5, %v4402_v1  ;;  %v4449_v24 = vadd.f32 %v4377_v56, %v1013_v63  ;;  %3244 = verf.f32 %v1169_v57 }
 0x275   :  { %v3227_v31 = vpop.eup %3226  ;;  %v879_v28 = vmul.f32 0.00390625, %v830_v41  ;;  %v1263_v34 = vadd.f32 1.0, %v3225_v8  ;;  %v1310_v14 = vmul.f32 %v1260_v38, %v1110_v50  ;;  %v4452_v19 = vadd.f32 %v4382_v48, %v1012_v20 }
 0x276   :  { %v3229_v52 = vpop.eup %3228  ;;  %1500 = vmatprep.mubr.f32.mxu0 %v1311_v44  ;;  %v1262_v16 = vadd.f32 1.0, %v3227_v31  ;;  %v1115_v11 = vmul.f32 0.5, %v4412_v43  ;;  %3246 = verf.f32 %v1168_v12  ;;  %v1171_v13 = vmul.f32 0.70710677, %v4449_v24  ;;  %v5977_v31 = vld [vmem:[#allocation45_spill] sm:$0xff] }
 0x277   :  { %v3231_v30 = vpop.eup %3230  ;;  %v904_v21 = vadd.f32 1e-05, %v879_v28  ;;  %v1313_v39 = vmul.f32 %v1263_v34, %v1113_v58  ;;  %3248 = vrsqrt.f32 %v903_v40  ;;  %1501 = vmatmul.mubr.f32.gmra.mxu0 %v1310_v14  ;;  %v1170_v4 = vmul.f32 0.70710677, %v4452_v19  ;;  %v5978_v34 = vld [vmem:[#allocation44_spill] sm:$0xff] }
 0x278   :  { %v833_v1 = vpop.xlane.xlu0 %832  ;;  %v1312_v17 = vmul.f32 %v1262_v16, %v1112_v18  ;;  %v965_v63 = vmul.f32 %v3229_v52, %v4374_v7  ;;  %v964_v25 = vmul.f32 %v3229_v52, %v4371_v49  ;;  %v967_v43 = vmul.f32 %v3231_v30, %v4374_v7 }
 0x279   :  { %v3233_v50 = vpop.eup %3232  ;;  %3250 = vrsqrt.f32 %v904_v21  ;;  %v880_v53 = vmul.f32 0.00390625, %v833_v1  ;;  %1506 = vmatprep.mubr.f32.mxu0 %v1313_v39  ;;  %v966_v57 = vmul.f32 %v3231_v30, %v4371_v49  ;;  %v1114_v8 = vmul.f32 0.5, %v4416_v59 }
 0x27a   :  { %v1265_v58 = vadd.f32 1.0, %v3233_v50  ;;  %3252 = verf.f32 %v1171_v13  ;;  %v3235_v20 = vpop.eup %3234  ;;  %v1015_v40 = vmul.f32 %v965_v63, %v4191_v26  ;;  %v1014_v41 = vmul.f32 %v964_v25, %v4188_v60 }
 0x27b   :  { %3254 = verf.f32 %v1170_v4  ;;  %1507 = vmatmul.mubr.f32.gmra.mxu0 %v1312_v17  ;;  %v1264_v12 = vadd.f32 1.0, %v3235_v20  ;;  %v1017_v28 = vmul.f32 %v967_v43, %v5977_v31  ;;  %v1016_v18 = vmul.f32 %v966_v57, %v5978_v34 }
 0x27c   :  { %v836_v44 = vpop.xlane.xlu1 %835  ;;  %v1315_v38 = vmul.f32 %v1265_v58, %v1115_v11  ;;  %v3237_v52 = vpop.eup %3236  ;;  %v905_v14 = vadd.f32 1e-05, %v880_v53  ;;  %v1117_v16 = vmul.f32 0.5, %v4423_v35  ;;  %v4468_v30 = vadd.f32 %v4377_v56, %v1015_v40 }
 0x27d   :  { %v4471_v59 = vadd.f32 %v4382_v48, %v1014_v41  ;;  %v3239_v26 = vpop.eup %3238  ;;  %v1314_v60 = vmul.f32 %v1264_v12, %v1114_v8  ;;  %v1267_v21 = vadd.f32 1.0, %v3237_v52  ;;  %v4474_v39 = vadd.f32 %v4377_v56, %v1017_v28 }
 0x27e   :  { %1512 = vmatprep.mubr.f32.mxu0 %v1315_v38  ;;  %v4477_v11 = vadd.f32 %v4382_v48, %v1016_v18  ;;  %v3241_v1 = vpop.eup %3240  ;;  %v881_v17 = vmul.f32 0.00390625, %v836_v44  ;;  %v1116_v35 = vmul.f32 0.5, %v4426_v46  ;;  %v1119_v13 = vmul.f32 0.5, %v4436_v0 }
 0x27f   :  { %v1173_v4 = vmul.f32 0.70710677, %v4468_v30  ;;  %v3243_v50 = vpop.eup %3242  ;;  %1513 = vmatmul.mubr.f32.gmra.mxu0 %v1314_v60  ;;  %v1317_v63 = vmul.f32 %v1267_v21, %v1117_v16  ;;  %v1266_v25 = vadd.f32 1.0, %v3241_v1  ;;  %v1118_v58 = vmul.f32 0.5, %v4440_v32 }
 0x280   :  { %v839_v53 = vpop.xlane.xlu0 %838  ;;  %v1172_v43 = vmul.f32 0.70710677, %v4471_v59  ;;  %3256 = vrsqrt.f32 %v905_v14  ;;  %v1121_v20 = vmul.f32 0.5, %v4449_v24  ;;  %v1175_v8 = vmul.f32 0.70710677, %v4474_v39 }
 0x281   :  { %v882_v57 = vmul.f32 0.00390625, %v839_v53  ;;  %1518 = vmatprep.mubr.f32.mxu0 %v1317_v63  ;;  %v1316_v46 = vmul.f32 %v1266_v25, %v1116_v35  ;;  %3258 = verf.f32 %v1173_v4  ;;  %v1174_v0 = vmul.f32 0.70710677, %v4477_v11  ;;  %v3245_v41 = vpop.eup %3244 }
 0x282   :  { %v969_v40 = vmul.f32 %v3239_v26, %v4374_v7  ;;  %v906_v44 = vadd.f32 1e-05, %v881_v17  ;;  %3260 = verf.f32 %v1172_v43  ;;  %v968_v32 = vmul.f32 %v3239_v26, %v4371_v49 }
 0x283   :  { %v971_v38 = vmul.f32 %v3243_v50, %v4374_v7  ;;  %v3247_v12 = vpop.eup %3246  ;;  %1519 = vmatmul.mubr.f32.gmra.mxu0 %v1316_v46  ;;  %v1269_v24 = vadd.f32 1.0, %v3245_v41  ;;  %3262 = verf.f32 %v1175_v8  ;;  %v970_v34 = vmul.f32 %v3243_v50, %v4371_v49 }
 0x284   :  { %v842_v31 = vpop.xlane.xlu1 %841  ;;  %v1019_v28 = vmul.f32 %v969_v40, %v4211_v37  ;;  %v3249_v18 = vpop.eup %3248  ;;  %v907_v52 = vadd.f32 1e-05, %v882_v57  ;;  %v1268_v16 = vadd.f32 1.0, %v3247_v12  ;;  %v1018_v60 = vmul.f32 %v968_v32, %v4208_v61 }
 0x285   :  { %v883_v14 = vmul.f32 0.00390625, %v842_v31  ;;  %v1319_v1 = vmul.f32 %v1269_v24, %v1119_v13  ;;  %3264 = verf.f32 %v1174_v0  ;;  %v1021_v17 = vmul.f32 %v971_v38, %v4221_v54 }
 0x286   :  { %v3251_v21 = vpop.eup %3250  ;;  %v1077_v26 = vadd.f32 %v4377_v56, %v1019_v28  ;;  %v1318_v4 = vmul.f32 %v1268_v16, %v1118_v58  ;;  %v1120_v53 = vmul.f32 0.5, %v4452_v19  ;;  %v1076_v37 = vadd.f32 %v4382_v48, %v1018_v60 }
 0x287   :  { %v3253_v35 = vpop.eup %3252  ;;  %v1020_v50 = vmul.f32 %v970_v34, %v4218_v29  ;;  %3266 = vrsqrt.f32 %v906_v44  ;;  %1524 = vmatprep.mubr.f32.mxu0 %v1319_v1  ;;  %v1079_v13 = vadd.f32 %v4377_v56, %v1021_v17  ;;  %v1123_v54 = vmul.f32 0.5, %v4468_v30 }
 0x288   :  { %v3255_v63 = vpop.eup %3254  ;;  %v845_v25 = vpop.xlane.xlu0 %844  ;;  %v1271_v61 = vadd.f32 1.0, %v3253_v35  ;;  %v1177_v43 = vmul.f32 0.70710677, %v1077_v26  ;;  %3268 = vrsqrt.f32 %v907_v52  ;;  %1525 = vmatmul.mubr.f32.gmra.mxu0 %v1318_v4  ;;  %v1122_v58 = vmul.f32 0.5, %v4471_v59 }
 0x289   :  { %v1270_v57 = vadd.f32 1.0, %v3255_v63  ;;  %v908_v19 = vadd.f32 1e-05, %v883_v14  ;;  %v1176_v46 = vmul.f32 0.70710677, %v1076_v37  ;;  %v884_v29 = vmul.f32 0.00390625, %v845_v25 }
 0x28a   :  { %v1321_v8 = vmul.f32 %v1271_v61, %v1121_v20  ;;  %3270 = verf.f32 %v1177_v43  ;;  %v1179_v40 = vmul.f32 0.70710677, %v1079_v13  ;;  %v1078_v41 = vadd.f32 %v4382_v48, %v1020_v50 }
 0x28b   :  { %v1320_v0 = vmul.f32 %v1270_v57, %v1120_v53  ;;  %3272 = verf.f32 %v1176_v46  ;;  %v973_v32 = vmul.f32 %v3249_v18, %v4374_v7  ;;  %v972_v38 = vmul.f32 %v3249_v18, %v4371_v49 }
 0x28c   :  { %1530 = vmatprep.mubr.f32.mxu0 %v1321_v8  ;;  %v848_v44 = vpop.xlane.xlu1 %847  ;;  %v975_v30 = vmul.f32 %v3251_v21, %v4374_v7  ;;  %v1125_v20 = vmul.f32 0.5, %v4474_v39  ;;  %v1124_v12 = vmul.f32 0.5, %v4477_v11  ;;  %v1178_v31 = vmul.f32 0.70710677, %v1078_v41 }
 0x28d   :  { %1531 = vmatmul.mubr.f32.gmra.mxu0 %v1320_v0  ;;  %v885_v59 = vmul.f32 0.00390625, %v848_v44  ;;  %v3257_v24 = vpop.eup %3256  ;;  %3274 = verf.f32 %v1179_v40  ;;  %v1023_v28 = vmul.f32 %v973_v32, %v4231_v23  ;;  %v1022_v34 = vmul.f32 %v972_v38, %v4228_v42 }
 0x28e   :  { %v1025_v52 = vmul.f32 %v975_v30, %v4241_v51  ;;  %v3259_v14 = vpop.eup %3258  ;;  %v909_v16 = vadd.f32 1e-05, %v884_v29  ;;  %v1127_v18 = vmul.f32 0.5, %v1077_v26  ;;  %3276 = verf.f32 %v1178_v31 }
 0x28f   :  { %v974_v60 = vmul.f32 %v3251_v21, %v4371_v49  ;;  %v3261_v1 = vpop.eup %3260  ;;  %3278 = vrsqrt.f32 %v908_v19  ;;  %v1273_v39 = vadd.f32 1.0, %v3259_v14  ;;  %v1081_v11 = vadd.f32 %v4377_v56, %v1023_v28 }
 0x290   :  { %v4513_v17 = vadd.f32 %v4382_v48, %v1022_v34  ;;  %v3263_v35 = vpop.eup %3262  ;;  %v910_v23 = vadd.f32 1e-05, %v885_v59  ;;  %v1272_v4 = vadd.f32 1.0, %v3261_v1  ;;  %v4516_v42 = vadd.f32 %v4377_v56, %v1025_v52  ;;  %v851_v53 = vpop.xlane.xlu0 %850 }
 0x291   :  { %v1024_v51 = vmul.f32 %v974_v60, %v4238_v55  ;;  %v1323_v26 = vmul.f32 %v1273_v39, %v1123_v54  ;;  %v1275_v50 = vadd.f32 1.0, %v3263_v35  ;;  %v1181_v21 = vmul.f32 0.70710677, %v1081_v11 }
 0x292   :  { %v977_v63 = vmul.f32 %v3257_v24, %v4374_v7  ;;  %v3265_v25 = vpop.eup %3264  ;;  %3280 = vrsqrt.f32 %v909_v16  ;;  %v1322_v61 = vmul.f32 %v1272_v4, %v1122_v58  ;;  %v1126_v43 = vmul.f32 0.5, %v1076_v37 }
 0x293   :  { %v1180_v57 = vmul.f32 0.70710677, %v4513_v17  ;;  %1536 = vmatprep.mubr.f32.mxu0 %v1323_v26  ;;  %v1325_v19 = vmul.f32 %v1275_v50, %v1125_v20  ;;  %v1274_v8 = vadd.f32 1.0, %v3265_v25  ;;  %v1129_v29 = vmul.f32 0.5, %v1079_v13 }
 0x294   :  { %v854_v46 = vpop.xlane.xlu1 %853  ;;  %3282 = verf.f32 %v1181_v21  ;;  %v3267_v0 = vpop.eup %3266  ;;  %1537 = vmatmul.mubr.f32.gmra.mxu0 %v1322_v61  ;;  %v886_v55 = vmul.f32 0.00390625, %v851_v53  ;;  %v1183_v54 = vmul.f32 0.70710677, %v4516_v42  ;;  %v4523_v40 = vadd.f32 %v4382_v48, %v1024_v51 }
 0x295   :  { %3284 = vrsqrt.f32 %v910_v23  ;;  %v3269_v44 = vpop.eup %3268  ;;  %1542 = vmatprep.mubr.f32.mxu0 %v1325_v19  ;;  %v1324_v37 = vmul.f32 %v1274_v8, %v1124_v12  ;;  %v1027_v58 = vmul.f32 %v977_v63, %v4251_v3  ;;  %v976_v32 = vmul.f32 %v3257_v24, %v4371_v49 }
 0x296   :  { %3286 = verf.f32 %v1180_v57  ;;  %v887_v13 = vmul.f32 0.00390625, %v854_v46  ;;  %v1128_v30 = vmul.f32 0.5, %v1078_v41  ;;  %v1182_v59 = vmul.f32 0.70710677, %v4523_v40 }
 0x297   :  { %v3271_v38 = vpop.eup %3270  ;;  %3288 = verf.f32 %v1183_v54  ;;  %v4529_v28 = vadd.f32 %v4377_v56, %v1027_v58  ;;  %v1026_v34 = vmul.f32 %v976_v32, %v4248_v10  ;;  %v979_v12 = vmul.f32 %v3267_v0, %v4374_v7 }
 0x298   :  { %v1277_v20 = vadd.f32 1.0, %v3271_v38  ;;  %v857_v31 = vpop.xlane.xlu0 %856  ;;  %v3273_v52 = vpop.eup %3272  ;;  %v911_v14 = vadd.f32 1e-05, %v886_v55  ;;  %1543 = vmatmul.mubr.f32.gmra.mxu0 %v1324_v37  ;;  %v978_v24 = vmul.f32 %v3267_v0, %v4371_v49  ;;  %v981_v41 = vmul.f32 %v3269_v44, %v4374_v7 }
 0x299   :  { %v888_v3 = vmul.f32 0.00390625, %v857_v31  ;;  %v1276_v60 = vadd.f32 1.0, %v3273_v52  ;;  %v1131_v1 = vmul.f32 0.5, %v1081_v11  ;;  %3290 = verf.f32 %v1182_v59 }
 0x29a   :  { %v1327_v16 = vmul.f32 %v1277_v20, %v1127_v18  ;;  %v3275_v39 = vpop.eup %3274  ;;  %v912_v35 = vadd.f32 1e-05, %v887_v13  ;;  %v1185_v23 = vmul.f32 0.70710677, %v4529_v28  ;;  %v4537_v10 = vadd.f32 %v4382_v48, %v1026_v34 }
 0x29b   :  { %v1029_v4 = vmul.f32 %v979_v12, %v4261_v15  ;;  %v3277_v51 = vpop.eup %3276  ;;  %v1326_v26 = vmul.f32 %v1276_v60, %v1126_v43  ;;  %v1279_v53 = vadd.f32 1.0, %v3275_v39  ;;  %v1028_v21 = vmul.f32 %v978_v24, %v4258_v22 }
 0x29c   :  { %1548 = vmatprep.mubr.f32.mxu0 %v1327_v16  ;;  %v860_v50 = vpop.xlane.xlu1 %859  ;;  %v1031_v18 = vmul.f32 %v981_v41, %v4271_v33  ;;  %v3279_v11 = vpop.eup %3278  ;;  %3292 = vrsqrt.f32 %v911_v14  ;;  %v913_v63 = vadd.f32 1e-05, %v888_v3  ;;  %v1278_v25 = vadd.f32 1.0, %v3277_v51 }
 0x29d   :  { %v889_v61 = vmul.f32 0.00390625, %v860_v50  ;;  %1549 = vmatmul.mubr.f32.gmra.mxu0 %v1326_v26  ;;  %v1329_v57 = vmul.f32 %v1279_v53, %v1129_v29  ;;  %3294 = verf.f32 %v1185_v23  ;;  %v1184_v19 = vmul.f32 0.70710677, %v4537_v10 }
 0x29e   :  { %v4544_v15 = vadd.f32 %v4377_v56, %v1029_v4  ;;  %3296 = vrsqrt.f32 %v912_v35  ;;  %v1328_v43 = vmul.f32 %v1278_v25, %v1128_v30  ;;  %v4547_v8 = vadd.f32 %v4382_v48, %v1028_v21 }
 0x29f   :  { %v4550_v22 = vadd.f32 %v4377_v56, %v1031_v18  ;;  %v3281_v33 = vpop.eup %3280  ;;  %1554 = vmatprep.mubr.f32.mxu0 %v1329_v57  ;;  %v1130_v46 = vmul.f32 0.5, %v4513_v17  ;;  %3298 = verf.f32 %v1184_v19  ;;  %v980_v55 = vmul.f32 %v3269_v44, %v4371_v49 }
 0x2a0   :  { %v863_v0 = vpop.xlane.xlu0 %862  ;;  %v1187_v29 = vmul.f32 0.70710677, %v4544_v15  ;;  %3300 = vrsqrt.f32 %v913_v63  ;;  %v914_v37 = vadd.f32 1e-05, %v889_v61  ;;  %v1186_v32 = vmul.f32 0.70710677, %v4547_v8 }
 0x2a1   :  { %v3283_v54 = vpop.eup %3282  ;;  %v890_v58 = vmul.f32 0.00390625, %v863_v0  ;;  %1555 = vmatmul.mubr.f32.gmra.mxu0 %v1328_v43  ;;  %v1133_v30 = vmul.f32 0.5, %v4516_v42  ;;  %v1189_v17 = vmul.f32 0.70710677, %v4550_v22  ;;  %v1132_v20 = vmul.f32 0.5, %v4523_v40 }
 0x2a2   :  { %v3285_v38 = vpop.eup %3284  ;;  %v1281_v13 = vadd.f32 1.0, %v3283_v54  ;;  %3302 = verf.f32 %v1187_v29  ;;  %v1030_v44 = vmul.f32 %v980_v55, %v4268_v45  ;;  %v983_v31 = vmul.f32 %v3279_v11, %v4374_v7 }
 0x2a3   :  { %v3287_v59 = vpop.eup %3286  ;;  %3304 = verf.f32 %v1186_v32  ;;  %v982_v3 = vmul.f32 %v3279_v11, %v4371_v49  ;;  %v915_v42 = vadd.f32 1e-05, %v890_v58  ;;  %v985_v60 = vmul.f32 %v3281_v33, %v4374_v7 }
 0x2a4   :  { %v3289_v34 = vpop.eup %3288  ;;  %v1331_v12 = vmul.f32 %v1281_v13, %v1131_v1  ;;  %v1280_v52 = vadd.f32 1.0, %v3287_v59  ;;  %v866_v14 = vpop.xlane.xlu1 %865  ;;  %3306 = verf.f32 %v1189_v17  ;;  %v4563_v41 = vadd.f32 %v4382_v48, %v1030_v44 }
 0x2a5   :  { %3308 = vrsqrt.f32 %v914_v37  ;;  %v1283_v24 = vadd.f32 1.0, %v3289_v34  ;;  %v1033_v16 = vmul.f32 %v983_v31, %v4281_v27  ;;  %v1032_v45 = vmul.f32 %v982_v3, %v4278_v9 }
 0x2a6   :  { %1560 = vmatprep.mubr.f32.mxu0 %v1331_v12  ;;  %v1330_v40 = vmul.f32 %v1280_v52, %v1130_v46  ;;  %v3291_v1 = vpop.eup %3290  ;;  %v891_v35 = vmul.f32 0.00390625, %v866_v14  ;;  %v1135_v23 = vmul.f32 0.5, %v4529_v28  ;;  %v1188_v4 = vmul.f32 0.70710677, %v4563_v41 }
 0x2a7   :  { %v1333_v39 = vmul.f32 %v1283_v24, %v1133_v30  ;;  %v1282_v51 = vadd.f32 1.0, %v3291_v1  ;;  %v4571_v26 = vadd.f32 %v4377_v56, %v1033_v16  ;;  %v4574_v53 = vadd.f32 %v4382_v48, %v1032_v45 }
 0x2a8   :  { %1561 = vmatmul.mubr.f32.gmra.mxu0 %v1330_v40  ;;  %v1035_v27 = vmul.f32 %v985_v60, %v4291_v36  ;;  %3310 = vrsqrt.f32 %v915_v42  ;;  %v984_v9 = vmul.f32 %v3281_v33, %v4371_v49  ;;  %v987_v50 = vmul.f32 %v3285_v38, %v4374_v7 }
 0x2a9   :  { %1566 = vmatprep.mubr.f32.mxu0 %v1333_v39  ;;  %v986_v28 = vmul.f32 %v3285_v38, %v4371_v49  ;;  %v3293_v21 = vpop.eup %3292  ;;  %v1332_v18 = vmul.f32 %v1282_v51, %v1132_v20  ;;  %v1134_v11 = vmul.f32 0.5, %v4537_v10  ;;  %3312 = verf.f32 %v1188_v4  ;;  %v5979_v39 = vld [vmem:[#allocation47_spill] sm:$0xff] }
 0x2aa   :  { %v1191_v63 = vmul.f32 0.70710677, %v4571_v26  ;;  %v3295_v25 = vpop.eup %3294  ;;  %v916_v61 = vadd.f32 1e-05, %v891_v35  ;;  %v1190_v57 = vmul.f32 0.70710677, %v4574_v53  ;;  %v4584_v36 = vadd.f32 %v4377_v56, %v1035_v27 }
 0x2ab   :  { %v1034_v19 = vmul.f32 %v984_v9, %v4288_v2  ;;  %v3297_v43 = vpop.eup %3296  ;;  %v1285_v33 = vadd.f32 1.0, %v3295_v25  ;;  %v1037_v46 = vmul.f32 %v987_v50, %v4301_v47  ;;  %v1036_v10 = vmul.f32 %v986_v28, %v4298_v62  ;;  %v5980_v9 = vld [vmem:[#allocation46_spill] sm:$0xff]  ;;  %v5981_v28 = vld [vmem:[#allocation49_spill] sm:$0xff] }
 0x2ac   :  { %1567 = vmatmul.mubr.f32.gmra.mxu0 %v1332_v18  ;;  %3314 = verf.f32 %v1191_v63  ;;  %v3299_v0 = vpop.eup %3298  ;;  %v1137_v29 = vmul.f32 0.5, %v4544_v15  ;;  %v1193_v55 = vmul.f32 0.70710677, %v4584_v36  ;;  %v1136_v62 = vmul.f32 0.5, %v4547_v8  ;;  %v5982_v63 = vld [vmem:[#allocation48_spill] sm:$0xff] }
 0x2ad   :  { %3316 = verf.f32 %v1190_v57  ;;  %v4592_v54 = vadd.f32 %v4382_v48, %v1034_v19  ;;  %v3301_v37 = vpop.eup %3300  ;;  %v1335_v58 = vmul.f32 %v1285_v33, %v1135_v23  ;;  %v1284_v2 = vadd.f32 1.0, %v3299_v0 }
 0x2ae   :  { %v4595_v32 = vadd.f32 %v4377_v56, %v1037_v46  ;;  %v4598_v38 = vadd.f32 %v4382_v48, %v1036_v10  ;;  %3318 = verf.f32 %v1193_v55  ;;  %v989_v13 = vmul.f32 %v3293_v21, %v4374_v7 }
 0x2af   :  { %v3303_v47 = vpop.eup %3302  ;;  %v1192_v15 = vmul.f32 0.70710677, %v4592_v54  ;;  %3320 = vrsqrt.f32 %v916_v61  ;;  %1572 = vmatprep.mubr.f32.mxu0 %v1335_v58  ;;  %v1334_v17 = vmul.f32 %v1284_v2, %v1134_v11  ;;  %v1139_v34 = vmul.f32 0.5, %v4550_v22  ;;  %v5983_v61 = vld [vmem:[#allocation51_spill] sm:$0xff] }
 0x2b0   :  { %v3305_v30 = vpop.eup %3304  ;;  %v1287_v59 = vadd.f32 1.0, %v3303_v47  ;;  %v1195_v20 = vmul.f32 0.70710677, %v4595_v32  ;;  %v1194_v12 = vmul.f32 0.70710677, %v4598_v38  ;;  %v1039_v3 = vmul.f32 %v989_v13, %v4311_v5 }
 0x2b1   :  { %v3307_v44 = vpop.eup %3306  ;;  %v1286_v31 = vadd.f32 1.0, %v3305_v30  ;;  %3322 = verf.f32 %v1192_v15  ;;  %1573 = vmatmul.mubr.f32.gmra.mxu0 %v1334_v17  ;;  %v988_v24 = vmul.f32 %v3293_v21, %v4371_v49  ;;  %v991_v40 = vmul.f32 %v3297_v43, %v4374_v7 }
 0x2b2   :  { %v3309_v8 = vpop.eup %3308  ;;  %v1337_v52 = vmul.f32 %v1287_v59, %v1137_v29  ;;  %v1289_v14 = vadd.f32 1.0, %v3307_v44  ;;  %3324 = verf.f32 %v1195_v20  ;;  %v4610_v22 = vadd.f32 %v4377_v56, %v1039_v3 }
 0x2b3   :  { %v1336_v42 = vmul.f32 %v1286_v31, %v1136_v62  ;;  %3326 = verf.f32 %v1194_v12  ;;  %v990_v45 = vmul.f32 %v3297_v43, %v4371_v49  ;;  %v993_v60 = vmul.f32 %v3301_v37, %v4374_v7 }
 0x2b4   :  { %1578 = vmatprep.mubr.f32.mxu0 %v1337_v52  ;;  %v1339_v16 = vmul.f32 %v1289_v14, %v1139_v34  ;;  %v1038_v1 = vmul.f32 %v988_v24, %v4308_v6  ;;  %v1041_v35 = vmul.f32 %v991_v40, %v5979_v39  ;;  %v992_v5 = vmul.f32 %v3301_v37, %v4371_v49  ;;  %v5984_v24 = vld [vmem:[#allocation50_spill] sm:$0xff] }
 0x2b5   :  { %v995_v23 = vmul.f32 %v3309_v8, %v4374_v7  ;;  %v3311_v4 = vpop.eup %3310  ;;  %1579 = vmatmul.mubr.f32.gmra.mxu0 %v1336_v42  ;;  %v1138_v51 = vmul.f32 0.5, %v4563_v41  ;;  %v1197_v27 = vmul.f32 0.70710677, %v4610_v22  ;;  %v1040_v50 = vmul.f32 %v990_v45, %v5980_v9 }
 0x2b6   :  { %v1043_v21 = vmul.f32 %v993_v60, %v5981_v28  ;;  %v3313_v18 = vpop.eup %3312  ;;  %1584 = vmatprep.mubr.f32.mxu0 %v1339_v16  ;;  %v4623_v6 = vadd.f32 %v4382_v48, %v1038_v1  ;;  %v4626_v11 = vadd.f32 %v4377_v56, %v1041_v35  ;;  %v1042_v25 = vmul.f32 %v992_v5, %v5982_v63  ;;  %v5985_v35 = vld [vmem:[#allocation53_spill] sm:$0xff] }
 0x2b7   :  { %v1045_v57 = vmul.f32 %v995_v23, %v5983_v61  ;;  %v1288_v19 = vadd.f32 1.0, %v3313_v18  ;;  %3328 = verf.f32 %v1197_v27  ;;  %v4631_v41 = vadd.f32 %v4382_v48, %v1040_v50  ;;  %v5986_v23 = vld [vmem:[#allocation52_spill] sm:$0xff]  ;;  %v5987_v18 = vld [vmem:[#allocation55_spill] sm:$0xff]  ;;  %v5988_v61 = vld [vmem:[#allocation54_spill] sm:$0xff] }
 0x2b8   :  { %v4634_v43 = vadd.f32 %v4377_v56, %v1043_v21  ;;  %v1141_v46 = vmul.f32 0.5, %v4571_v26  ;;  %v1140_v10 = vmul.f32 0.5, %v4574_v53  ;;  %v1196_v0 = vmul.f32 0.70710677, %v4623_v6 }
 0x2b9   :  { %v3315_v33 = vpop.eup %3314  ;;  %v1199_v29 = vmul.f32 0.70710677, %v4626_v11  ;;  %v1338_v37 = vmul.f32 %v1288_v19, %v1138_v51  ;;  %v1143_v2 = vmul.f32 0.5, %v4584_v36  ;;  %v1198_v47 = vmul.f32 0.70710677, %v4631_v41 }
 0x2ba   :  { %v3317_v55 = vpop.eup %3316  ;;  %v1291_v58 = vadd.f32 1.0, %v3315_v33  ;;  %v1142_v15 = vmul.f32 0.5, %v4592_v54  ;;  %3330 = verf.f32 %v1196_v0  ;;  %v1201_v13 = vmul.f32 0.70710677, %v4634_v43 }
 0x2bb   :  { %v1290_v62 = vadd.f32 1.0, %v3317_v55  ;;  %v3319_v26 = vpop.eup %3318  ;;  %1585 = vmatmul.mubr.f32.gmra.mxu0 %v1338_v37  ;;  %3332 = verf.f32 %v1199_v29  ;;  %v4645_v30 = vadd.f32 %v4382_v48, %v1042_v25  ;;  %v4648_v17 = vadd.f32 %v4377_v56, %v1045_v57 }
 0x2bc   :  { %v1341_v53 = vmul.f32 %v1291_v58, %v1141_v46  ;;  %v3321_v59 = vpop.eup %3320  ;;  %v1293_v20 = vadd.f32 1.0, %v3319_v26  ;;  %3334 = verf.f32 %v1198_v47  ;;  %v994_v44 = vmul.f32 %v3309_v8, %v4371_v49 }
 0x2bd   :  { %v1340_v36 = vmul.f32 %v1290_v62, %v1140_v10  ;;  %v1145_v31 = vmul.f32 0.5, %v4595_v32  ;;  %v1144_v34 = vmul.f32 0.5, %v4598_v38  ;;  %3336 = verf.f32 %v1201_v13 }
 0x2be   :  { %v3323_v54 = vpop.eup %3322  ;;  %1590 = vmatprep.mubr.f32.mxu0 %v1341_v53  ;;  %v1200_v12 = vmul.f32 0.70710677, %v4645_v30  ;;  %v1343_v14 = vmul.f32 %v1293_v20, %v1143_v2  ;;  %v1203_v42 = vmul.f32 0.70710677, %v4648_v17  ;;  %v1044_v40 = vmul.f32 %v994_v44, %v5984_v24 }
 0x2bf   :  { %v3325_v52 = vpop.eup %3324  ;;  %v1292_v3 = vadd.f32 1.0, %v3323_v54  ;;  %1591 = vmatmul.mubr.f32.gmra.mxu0 %v1340_v36  ;;  %v997_v8 = vmul.f32 %v3311_v4, %v4374_v7  ;;  %v996_v32 = vmul.f32 %v3311_v4, %v4371_v49  ;;  %v999_v27 = vmul.f32 %v3321_v59, %v4374_v7 }
 0x2c0   :  { %v3327_v16 = vpop.eup %3326  ;;  %v1295_v45 = vadd.f32 1.0, %v3325_v52  ;;  %3338 = verf.f32 %v1200_v12  ;;  %1596 = vmatprep.mubr.f32.mxu0 %v1343_v14  ;;  %v1102_v1 = vadd.f32 %v4382_v48, %v1044_v40  ;;  %v998_v50 = vmul.f32 %v3321_v59, %v4371_v49 }
 0x2c1   :  { %v1342_v38 = vmul.f32 %v1292_v3, %v1142_v15  ;;  %v1294_v60 = vadd.f32 1.0, %v3327_v16  ;;  %3340 = verf.f32 %v1203_v42  ;;  %v1047_v5 = vmul.f32 %v997_v8, %v5985_v35 }
 0x2c2   :  { %v1345_v39 = vmul.f32 %v1295_v45, %v1145_v31  ;;  %v1046_v51 = vmul.f32 %v996_v32, %v5986_v23  ;;  %v1202_v9 = vmul.f32 0.70710677, %v1102_v1  ;;  %v1049_v63 = vmul.f32 %v999_v27, %v5987_v18  ;;  %v4676_v27 = vld [vmem:[#allocation10] sm:$0x1f] }
 0x2c3   :  { %1597 = vmatmul.mubr.f32.gmra.mxu0 %v1342_v38  ;;  %v1344_v28 = vmul.f32 %v1294_v60, %v1144_v34  ;;  %v1105_v4 = vadd.f32 %v4377_v56, %v1047_v5  ;;  %v1048_v57 = vmul.f32 %v998_v50, %v5988_v61  ;;  %v1147_v19 = vmul.f32 0.5, %v4610_v22 }
 0x2c4   :  { %v1104_v21 = vadd.f32 %v4382_v48, %v1046_v51  ;;  %v3329_v25 = vpop.eup %3328  ;;  %1602 = vmatprep.mubr.f32.mxu0 %v1345_v39  ;;  %3342 = verf.f32 %v1202_v9  ;;  %v1107_v49 = vadd.f32 %v4377_v56, %v1049_v63  ;;  %v1146_v37 = vmul.f32 0.5, %v4623_v6  ;;  %v5989_v9 = vld [vmem:[#allocation17_spill] sm:$0xff] }
 0x2c5   :  { %v1297_v33 = vadd.f32 1.0, %v3329_v25  ;;  %v1205_v7 = vmul.f32 0.70710677, %v1105_v4  ;;  %v1106_v10 = vadd.f32 %v4382_v48, %v1048_v57  ;;  %v1149_v22 = vmul.f32 0.5, %v4626_v11 }
 0x2c6   :  { %v1204_v46 = vmul.f32 0.70710677, %v1104_v21  ;;  %v1207_v2 = vmul.f32 0.70710677, %v1107_v49  ;;  %v1148_v48 = vmul.f32 0.5, %v4631_v41  ;;  %v1151_v59 = vmul.f32 0.5, %v4634_v43 }
 0x2c7   :  { %v3331_v0 = vpop.eup %3330  ;;  %1603 = vmatmul.mubr.f32.gmra.mxu0 %v1344_v28  ;;  %v1347_v29 = vmul.f32 %v1297_v33, %v1147_v19  ;;  %3344 = verf.f32 %v1205_v7  ;;  %v1206_v15 = vmul.f32 0.70710677, %v1106_v10  ;;  %v1150_v31 = vmul.f32 0.5, %v4645_v30  ;;  %v4682_v28 = vld [vmem:[#allocation10 + $0x8] sm:$0x1f] }
 0x2c8   :  { %v3333_v55 = vpop.eup %3332  ;;  %v1296_v58 = vadd.f32 1.0, %v3331_v0  ;;  %3346 = verf.f32 %v1204_v46  ;;  %v1153_v12 = vmul.f32 0.5, %v4648_v17  ;;  %v1152_v43 = vmul.f32 0.5, %v1102_v1 }
 0x2c9   :  { %v3335_v47 = vpop.eup %3334  ;;  %1608 = vmatprep.mubr.f32.mxu0 %v1347_v29  ;;  %v1299_v62 = vadd.f32 1.0, %v3333_v55  ;;  %3348 = verf.f32 %v1207_v2  ;;  %v1155_v16 = vmul.f32 0.5, %v1105_v4  ;;  %v1154_v8 = vmul.f32 0.5, %v1104_v21 }
 0x2ca   :  { %v3337_v13 = vpop.eup %3336  ;;  %v1346_v56 = vmul.f32 %v1296_v58, %v1146_v37  ;;  %v1298_v26 = vadd.f32 1.0, %v3335_v47  ;;  %3350 = verf.f32 %v1206_v15  ;;  %v1157_v39 = vmul.f32 0.5, %v1107_v49 }
 0x2cb   :  { %v1349_v53 = vmul.f32 %v1299_v62, %v1149_v22  ;;  %v1301_v36 = vadd.f32 1.0, %v3337_v13  ;;  %v1156_v23 = vmul.f32 0.5, %v1106_v10  ;;  %v4680_v50 = vrot.slane %v4676_v27, %v5989_v9 }
 0x2cc   :  { %1609 = vmatmul.mubr.f32.gmra.mxu0 %v1346_v56  ;;  %v1348_v20 = vmul.f32 %v1298_v26, %v1148_v48  ;;  %v4686_v4 = vrot.slane %v4682_v28, %v5989_v9 }
 0x2cd   :  { %v3339_v6 = vpop.eup %3338  ;;  %1614 = vmatprep.mubr.f32.mxu0 %v1349_v53  ;;  %v1351_v54 = vmul.f32 %v1301_v36, %v1151_v59 }
 0x2ce   :  { %v3341_v44 = vpop.eup %3340  ;;  %v1300_v11 = vadd.f32 1.0, %v3339_v6 }
 0x2cf   :  { %v1303_v34 = vadd.f32 1.0, %v3341_v44 }
 0x2d0   :  { %1615 = vmatmul.mubr.f32.gmra.mxu0 %v1348_v20  ;;  %v1350_v41 = vmul.f32 %v1300_v11, %v1150_v31 }
 0x2d1   :  { %v3343_v52 = vpop.eup %3342  ;;  %1620 = vmatprep.mubr.f32.mxu0 %v1351_v54  ;;  %v1353_v14 = vmul.f32 %v1303_v34, %v1153_v12 }
 0x2d2   :  { %v1302_v3 = vadd.f32 1.0, %v3343_v52 }
 0x2d4   :  { %v3345_v42 = vpop.eup %3344  ;;  %1621 = vmatmul.mubr.f32.gmra.mxu0 %v1350_v41  ;;  %v1352_v24 = vmul.f32 %v1302_v3, %v1152_v43 }
 0x2d5   :  { %v3347_v40 = vpop.eup %3346  ;;  %1626 = vmatprep.mubr.f32.mxu0 %v1353_v14  ;;  %v1305_v45 = vadd.f32 1.0, %v3345_v42 }
 0x2d6   :  { %v1304_v32 = vadd.f32 1.0, %v3347_v40  ;;  %v3349_v30 = vpop.eup %3348 }
 0x2d7   :  { %v1355_v38 = vmul.f32 %v1305_v45, %v1155_v16  ;;  %v3351_v60 = vpop.eup %3350  ;;  %v1307_v35 = vadd.f32 1.0, %v3349_v30 }
 0x2d8   :  { %1627 = vmatmul.mubr.f32.gmra.mxu0 %v1352_v24  ;;  %v1354_v17 = vmul.f32 %v1304_v32, %v1154_v8  ;;  %v1306_v5 = vadd.f32 1.0, %v3351_v60 }
 0x2d9   :  { %1632 = vmatprep.mubr.f32.mxu0 %v1355_v38  ;;  %v1357_v1 = vmul.f32 %v1307_v35, %v1157_v39 }
 0x2da   :  { %v1356_v51 = vmul.f32 %v1306_v5, %v1156_v23 }
 0x2dc   :  { %1633 = vmatmul.mubr.f32.gmra.mxu0 %v1354_v17 }
 0x2dd   :  { %1638 = vmatprep.mubr.f32.mxu0 %v1357_v1 }
 0x2e0   :  { %1639 = vmatmul.mubr.f32.gmra.mxu0 %v1356_v51 }
 0x332   :  { %v1496_v21 = vpop.f32.mrf.mxu0 }
 0x333   :  { %v4689_v63 = vadd.f32 %v1496_v21, %v4680_v50 }
 0x334   :  { %v1498_v18 = vpop.f32.mrf.mxu0 }
 0x335   :  { %v4692_v25 = vadd.f32 %v1498_v18, %v4686_v4 }
 0x337   :  { %v1645_v61 = vadd.f32 %v4692_v25, %v4689_v63  ;;  %v1502_v57 = vpop.f32.mrf.mxu0 }
 0x338   :  { %v4697_v33 = vadd.f32 %v1502_v57, %v4680_v50 }
 0x339   :  { %1646 = vadd.xlane.f32.xlu0 %v1645_v61  ;;  %v1504_v19 = vpop.f32.mrf.mxu0 }
 0x33a   :  { %v4700_v7 = vadd.f32 %v1504_v19, %v4686_v4 }
 0x33b   :  { %v1508_v46 = vpop.f32.mrf.mxu0 }
 0x33c   :  { %v1648_v49 = vadd.f32 %v4700_v7, %v4697_v33  ;;  %v4705_v0 = vadd.f32 %v1508_v46, %v4680_v50 }
 0x33d   :  { %v1510_v10 = vpop.f32.mrf.mxu0 }
 0x33e   :  { %v4708_v29 = vadd.f32 %v1510_v10, %v4686_v4  ;;  %1649 = vadd.xlane.f32.xlu1 %v1648_v49 }
 0x33f   :  { %v1514_v55 = vpop.f32.mrf.mxu0 }
 0x340   :  { %v1651_v37 = vadd.f32 %v4708_v29, %v4705_v0  ;;  %v4713_v2 = vadd.f32 %v1514_v55, %v4680_v50 }
 0x341   :  { %v1516_v58 = vpop.f32.mrf.mxu0 }
 0x342   :  { %v4716_v47 = vadd.f32 %v1516_v58, %v4686_v4  ;;  %1652 = vadd.xlane.f32.xlu0 %v1651_v37 }
 0x343   :  { %v1520_v22 = vpop.f32.mrf.mxu0 }
 0x344   :  { %v1654_v62 = vadd.f32 %v4716_v47, %v4713_v2  ;;  %v4721_v13 = vadd.f32 %v1520_v22, %v4680_v50 }
 0x345   :  { %v1522_v15 = vpop.f32.mrf.mxu0 }
 0x346   :  { %v4724_v56 = vadd.f32 %v1522_v15, %v4686_v4  ;;  %1655 = vadd.xlane.f32.xlu1 %v1654_v62 }
 0x348   :  { %v1526_v48 = vpop.f32.mrf.mxu0  ;;  %v1657_v26 = vadd.f32 %v4724_v56, %v4721_v13 }
 0x349   :  { %v4729_v59 = vadd.f32 %v1526_v48, %v4680_v50 }
 0x34a   :  { %v1528_v53 = vpop.f32.mrf.mxu0  ;;  %1658 = vadd.xlane.f32.xlu0 %v1657_v26 }
 0x34b   :  { %v4732_v36 = vadd.f32 %v1528_v53, %v4686_v4 }
 0x34d   :  { %v1532_v6 = vpop.f32.mrf.mxu0  ;;  %v1660_v20 = vadd.f32 %v4732_v36, %v4729_v59 }
 0x34e   :  { %v4737_v54 = vadd.f32 %v1532_v6, %v4680_v50 }
 0x34f   :  { %v1534_v44 = vpop.f32.mrf.mxu0  ;;  %1661 = vadd.xlane.f32.xlu1 %v1660_v20 }
 0x350   :  { %v4740_v11 = vadd.f32 %v1534_v44, %v4686_v4 }
 0x352   :  { %v1663_v31 = vadd.f32 %v4740_v11, %v4737_v54 }
 0x354   :  { %1664 = vadd.xlane.f32.xlu0 %v1663_v31  ;;  %v1538_v34 = vpop.f32.mrf.mxu0 }
 0x355   :  { %v4745_v41 = vadd.f32 %v1538_v34, %v4680_v50 }
 0x356   :  { %v1540_v12 = vpop.f32.mrf.mxu0 }
 0x357   :  { %v4748_v52 = vadd.f32 %v1540_v12, %v4686_v4 }
 0x358   :  { %v1544_v14 = vpop.f32.mrf.mxu0 }
 0x359   :  { %v1666_v43 = vadd.f32 %v4748_v52, %v4745_v41  ;;  %v4753_v42 = vadd.f32 %v1544_v14, %v4680_v50 }
 0x35a   :  { %v1546_v3 = vpop.f32.mrf.mxu0 }
 0x35b   :  { %v4756_v24 = vadd.f32 %v1546_v3, %v4686_v4  ;;  %1667 = vadd.xlane.f32.xlu1 %v1666_v43 }
 0x35d   :  { %v1550_v40 = vpop.f32.mrf.mxu0  ;;  %v1669_v16 = vadd.f32 %v4756_v24, %v4753_v42 }
 0x35e   :  { %v4761_v8 = vadd.f32 %v1550_v40, %v4680_v50 }
 0x35f   :  { %v1552_v45 = vpop.f32.mrf.mxu0  ;;  %1670 = vadd.xlane.f32.xlu0 %v1669_v16 }
 0x360   :  { %v4764_v32 = vadd.f32 %v1552_v45, %v4686_v4 }
 0x361   :  { %v1556_v30 = vpop.f32.mrf.mxu0 }
 0x362   :  { %v1672_v38 = vadd.f32 %v4764_v32, %v4761_v8  ;;  %v4769_v17 = vadd.f32 %v1556_v30, %v4680_v50 }
 0x363   :  { %v1558_v60 = vpop.f32.mrf.mxu0 }
 0x364   :  { %v4772_v39 = vadd.f32 %v1558_v60, %v4686_v4  ;;  %1673 = vadd.xlane.f32.xlu1 %v1672_v38 }
 0x366   :  { %v1675_v35 = vadd.f32 %v4772_v39, %v4769_v17 }
 0x368   :  { %v1562_v5 = vpop.f32.mrf.mxu0  ;;  %1676 = vadd.xlane.f32.xlu0 %v1675_v35 }
 0x369   :  { %v4777_v23 = vadd.f32 %v1562_v5, %v4680_v50 }
 0x36a   :  { %v1564_v1 = vpop.f32.mrf.mxu0 }
 0x36b   :  { %v4780_v51 = vadd.f32 %v1564_v1, %v4686_v4 }
 0x36c   :  { %v1568_v21 = vpop.f32.mrf.mxu0 }
 0x36d   :  { %v1678_v18 = vadd.f32 %v4780_v51, %v4777_v23  ;;  %v4785_v57 = vadd.f32 %v1568_v21, %v4680_v50 }
 0x36e   :  { %v1570_v61 = vpop.f32.mrf.mxu0 }
 0x36f   :  { %v4788_v19 = vadd.f32 %v1570_v61, %v4686_v4  ;;  %1679 = vadd.xlane.f32.xlu1 %v1678_v18 }
 0x371   :  { %v1681_v46 = vadd.f32 %v4788_v19, %v4785_v57  ;;  %v1574_v49 = vpop.f32.mrf.mxu0 }
 0x372   :  { %v4793_v55 = vadd.f32 %v1574_v49, %v4680_v50 }
 0x373   :  { %1682 = vadd.xlane.f32.xlu0 %v1681_v46  ;;  %v1576_v10 = vpop.f32.mrf.mxu0 }
 0x374   :  { %v4796_v37 = vadd.f32 %v1576_v10, %v4686_v4 }
 0x375   :  { %v1580_v58 = vpop.f32.mrf.mxu0 }
 0x376   :  { %v1684_v22 = vadd.f32 %v4796_v37, %v4793_v55  ;;  %v4801_v15 = vadd.f32 %v1580_v58, %v4680_v50 }
 0x377   :  { %v1582_v62 = vpop.f32.mrf.mxu0 }
 0x378   :  { %v4804_v48 = vadd.f32 %v1582_v62, %v4686_v4  ;;  %1685 = vadd.xlane.f32.xlu1 %v1684_v22 }
 0x37a   :  { %v1687_v26 = vadd.f32 %v4804_v48, %v4801_v15 }
 0x37b   :  { %v1586_v53 = vpop.f32.mrf.mxu0 }
 0x37c   :  { %1688 = vadd.xlane.f32.xlu0 %v1687_v26  ;;  %v4809_v20 = vadd.f32 %v1586_v53, %v4680_v50 }
 0x37d   :  { %v1588_v6 = vpop.f32.mrf.mxu0 }
 0x37e   :  { %v4812_v44 = vadd.f32 %v1588_v6, %v4686_v4 }
 0x37f   :  { %v1592_v31 = vpop.f32.mrf.mxu0 }
 0x380   :  { %v1690_v34 = vadd.f32 %v4812_v44, %v4809_v20  ;;  %v4817_v14 = vadd.f32 %v1592_v31, %v4680_v50 }
 0x381   :  { %v1594_v12 = vpop.f32.mrf.mxu0 }
 0x382   :  { %v4820_v43 = vadd.f32 %v1594_v12, %v4686_v4  ;;  %1691 = vadd.xlane.f32.xlu1 %v1690_v34 }
 0x383   :  { %v1598_v3 = vpop.f32.mrf.mxu0 }
 0x384   :  { %v1693_v40 = vadd.f32 %v4820_v43, %v4817_v14  ;;  %v4825_v45 = vadd.f32 %v1598_v3, %v4680_v50 }
 0x385   :  { %v1600_v16 = vpop.f32.mrf.mxu0 }
 0x386   :  { %v4828_v30 = vadd.f32 %v1600_v16, %v4686_v4  ;;  %1694 = vadd.xlane.f32.xlu0 %v1693_v40 }
 0x387   :  { %v1604_v38 = vpop.f32.mrf.mxu0 }
 0x388   :  { %v1696_v60 = vadd.f32 %v4828_v30, %v4825_v45  ;;  %v4833_v5 = vadd.f32 %v1604_v38, %v4680_v50 }
 0x389   :  { %v1606_v35 = vpop.f32.mrf.mxu0 }
 0x38a   :  { %v4836_v1 = vadd.f32 %v1606_v35, %v4686_v4  ;;  %1697 = vadd.xlane.f32.xlu1 %v1696_v60 }
 0x38c   :  { %v1610_v21 = vpop.f32.mrf.mxu0  ;;  %v1699_v18 = vadd.f32 %v4836_v1, %v4833_v5 }
 0x38d   :  { %v4841_v46 = vadd.f32 %v1610_v21, %v4680_v50 }
 0x38e   :  { %v1612_v61 = vpop.f32.mrf.mxu0  ;;  %1700 = vadd.xlane.f32.xlu0 %v1699_v18 }
 0x38f   :  { %v4844_v49 = vadd.f32 %v1612_v61, %v4686_v4 }
 0x390   :  { %v1616_v10 = vpop.f32.mrf.mxu0 }
 0x391   :  { %v1702_v58 = vadd.f32 %v4844_v49, %v4841_v46  ;;  %v4849_v62 = vadd.f32 %v1616_v10, %v4680_v50 }
 0x392   :  { %v1618_v22 = vpop.f32.mrf.mxu0 }
 0x393   :  { %v4852_v26 = vadd.f32 %v1618_v22, %v4686_v4  ;;  %1703 = vadd.xlane.f32.xlu1 %v1702_v58 }
 0x394   :  { %v1622_v53 = vpop.f32.mrf.mxu0 }
 0x395   :  { %v1705_v6 = vadd.f32 %v4852_v26, %v4849_v62  ;;  %v4857_v34 = vadd.f32 %v1622_v53, %v4680_v50 }
 0x396   :  { %v1624_v31 = vpop.f32.mrf.mxu0 }
 0x397   :  { %v4860_v12 = vadd.f32 %v1624_v31, %v4686_v4  ;;  %1706 = vadd.xlane.f32.xlu1 %v1705_v6 }
 0x398   :  { %v1628_v3 = vpop.f32.mrf.mxu0 }
 0x399   :  { %v1708_v40 = vadd.f32 %v4860_v12, %v4857_v34  ;;  %v4865_v38 = vadd.f32 %v1628_v3, %v4680_v50 }
 0x39a   :  { %v1630_v16 = vpop.f32.mrf.mxu0 }
 0x39b   :  { %v4868_v60 = vadd.f32 %v1630_v16, %v4686_v4  ;;  %1709 = vadd.xlane.f32.xlu1 %v1708_v40  ;;  %v2426_v40 = vld [vmem:[#allocation8 + $0x78] sm:$0xff]  ;;  %v5990_v16 = vmov 0.0  }
 0x39c   :  { %v1634_v35 = vpop.f32.mrf.mxu0  ;;  %2448 = vmatpush1.msra.mxu1 %v2426_v40  ;;  %v2417_v40 = vld [vmem:[#allocation8 + $0x30] sm:$0xff] }
 0x39d   :  { %v1711_v21 = vadd.f32 %v4868_v60, %v4865_v38  ;;  %v4873_v61 = vadd.f32 %v1634_v35, %v4680_v50  ;;  %2449 = vmatprep.subr.mxu1 %v5990_v16  ;;  %v2425_v35 = vld [vmem:[#allocation8 + $0x70] sm:$0xff] }
 0x39e   :  { %v1636_v18 = vpop.f32.mrf.mxu0  ;;  %2450 = vmatpush1.msra.mxu1 %v2425_v35 }
 0x39f   :  { %v4876_v10 = vadd.f32 %v1636_v18, %v4686_v4  ;;  %1712 = vadd.xlane.f32.xlu1 %v1711_v21  ;;  %2451 = vmatprep.subr.mxu1 %v5990_v16  ;;  %v2424_v21 = vld [vmem:[#allocation8 + $0x68] sm:$0xff]  ;;  %v2423_v18 = vld [vmem:[#allocation8 + $0x60] sm:$0xff] }
 0x3a0   :  { %v1640_v58 = vpop.f32.mrf.mxu0  ;;  %2452 = vmatpush1.msra.mxu1 %v2424_v21  ;;  %v2416_v21 = vld [vmem:[#allocation8 + $0x28] sm:$0xff] }
 0x3a1   :  { %v1714_v22 = vadd.f32 %v4876_v10, %v4873_v61  ;;  %v4881_v6 = vadd.f32 %v1640_v58, %v4680_v50  ;;  %2453 = vmatprep.subr.mxu1 %v5990_v16  ;;  %v2422_v50 = vld [vmem:[#allocation8 + $0x58] sm:$0xff]  ;;  %v2420_v58 = vld [vmem:[#allocation8 + $0x48] sm:$0xff] }
 0x3a2   :  { %v1642_v53 = vpop.f32.mrf.mxu0  ;;  %2454 = vmatpush1.msra.mxu1 %v2423_v18 }
 0x3a3   :  { %v4884_v31 = vadd.f32 %v1642_v53, %v4686_v4  ;;  %1715 = vadd.xlane.f32.xlu1 %v1714_v22  ;;  %2455 = vmatprep.subr.mxu1 %v5990_v16  ;;  %v2421_v4 = vld [vmem:[#allocation8 + $0x50] sm:$0xff]  ;;  %v2419_v22 = vld [vmem:[#allocation8 + $0x40] sm:$0xff]  ;;  %v2418_v53 = vld [vmem:[#allocation8 + $0x38] sm:$0xff] }
 0x3a4   :  { %2456 = vmatpush1.msra.mxu1 %v2422_v50 }
 0x3a5   :  { %v1717_v3 = vadd.f32 %v4884_v31, %v4881_v6  ;;  %2457 = vmatprep.subr.mxu1 %v5990_v16 }
 0x3a6   :  { %2458 = vmatpush1.msra.mxu1 %v2421_v4  ;;  %v2415_v4 = vld [vmem:[#allocation8 + $0x20] sm:$0xff] }
 0x3a7   :  { %1718 = vadd.xlane.f32.xlu1 %v1717_v3  ;;  %2459 = vmatprep.subr.mxu1 %v5990_v16 }
 0x3a8   :  { %2460 = vmatpush1.msra.mxu1 %v2420_v58 }
 0x3a9   :  { %2461 = vmatprep.subr.mxu1 %v5990_v16 }
 0x3aa   :  { %2462 = vmatpush1.msra.mxu1 %v2419_v22 }
 0x3ab   :  { %2463 = vmatprep.subr.mxu1 %v5990_v16 }
 0x3ac   :  { %2464 = vmatpush1.msra.mxu1 %v2418_v53 }
 0x3ad   :  { %2465 = vmatprep.subr.mxu1 %v5990_v16 }
 0x3ae   :  { %2466 = vmatpush1.msra.mxu1 %v2417_v40 }
 0x3af   :  { %2467 = vmatprep.subr.mxu1 %v5990_v16 }
 0x3b0   :  { %2468 = vmatpush1.msra.mxu1 %v2416_v21  ;;  %v2412_v21 = vld [vmem:[#allocation8 + $0x8] sm:$0xff] }
 0x3b1   :  { %2469 = vmatprep.subr.mxu1 %v5990_v16 }
 0x3b2   :  { %2470 = vmatpush1.msra.mxu1 %v2415_v4 }
 0x3b3   :  { %2471 = vmatprep.subr.mxu1 %v5990_v16 }
 0x3c2   :  { %v1647_v3 = vpop.xlane.xlu0 %1646 }
 0x3c3   :  { %v1720_v35 = vmul.f32 0.00390625, %v1647_v3  ;;  %v2414_v3 = vld [vmem:[#allocation8 + $0x18] sm:$0xff] }
 0x3c4   :  { %2472 = vmatpush1.msra.mxu1 %v2414_v3 }
 0x3c5   :  { %v4898_v18 = vsub.f32 %v4689_v63, %v1720_v35  ;;  %v4901_v50 = vsub.f32 %v4692_v25, %v1720_v35  ;;  %v2413_v25 = vld [vmem:[#allocation8 + $0x10] sm:$0xff]  ;;  %2473 = vmatprep.subr.mxu1 %v5990_v16 }
 0x3c6   :  { %2474 = vmatpush1.msra.mxu1 %v2413_v25 }
 0x3c7   :  { %5991 = vst [vmem:[#allocation45_spill] sm:$0xff] %v4898_v18  ;;  %5992 = vst [vmem:[#allocation44_spill] sm:$0xff] %v4901_v50  ;;  %v1795_v58 = vmul.f32 %v4898_v18, %v4898_v18  ;;  %v1796_v22 = vmul.f32 %v4901_v50, %v4901_v50  ;;  %v1650_v53 = vpop.xlane.xlu1 %1649  ;;  %2475 = vmatprep.subr.mxu1 %v5990_v16 }
 0x3c8   :  { %v1721_v63 = vmul.f32 0.00390625, %v1650_v53  ;;  %2476 = vmatpush1.msra.mxu1 %v2412_v21 }
 0x3c9   :  { %v1845_v9 = vadd.f32 %v1796_v22, %v1795_v58  ;;  %2477 = vmatprep.subr.mxu1 %v5990_v16 }
 0x3ca   :  { %v4911_v40 = vsub.f32 %v4697_v33, %v1721_v63  ;;  %v4914_v35 = vsub.f32 %v4700_v7, %v1721_v63  ;;  %v2411_v33 = vld [vmem:[#allocation8] sm:$0xff] }
 0x3cb   :  { %1846 = vadd.xlane.f32.xlu0 %v1845_v9  ;;  %v1653_v50 = vpop.xlane.xlu0 %1652  ;;  %2478 = vmatpush1.msra.mxu1 %v2411_v33 }
 0x3cc   :  { %v1722_v18 = vmul.f32 0.00390625, %v1653_v50  ;;  %v1797_v58 = vmul.f32 %v4911_v40, %v4911_v40  ;;  %v1798_v4 = vmul.f32 %v4914_v35, %v4914_v35  ;;  %v2442_v50 = vld [vmem:[#allocation8 + $0xf8] sm:$0xff]  ;;  %2479 = vmatprep.subr.mxu1 %v5990_v16 }
 0x3cd   :  { %2480 = vmatpush2.msra.mxu1 %v2442_v50 }
 0x3ce   :  { %v4923_v7 = vsub.f32 %v4705_v0, %v1722_v18  ;;  %v4926_v9 = vsub.f32 %v4708_v29, %v1722_v18  ;;  %v1848_v22 = vadd.f32 %v1798_v4, %v1797_v58  ;;  %v2441_v0 = vld [vmem:[#allocation8 + $0xf0] sm:$0xff]  ;;  %2481 = vmatprep.subr.mxu1 %v5990_v16 }
 0x3cf   :  { %v1656_v53 = vpop.xlane.xlu1 %1655  ;;  %2482 = vmatpush2.msra.mxu1 %v2441_v0 }
 0x3d0   :  { %v1723_v3 = vmul.f32 0.00390625, %v1656_v53  ;;  %1849 = vadd.xlane.f32.xlu0 %v1848_v22  ;;  %v1799_v63 = vmul.f32 %v4923_v7, %v4923_v7  ;;  %v1800_v25 = vmul.f32 %v4926_v9, %v4926_v9  ;;  %2483 = vmatprep.subr.mxu1 %v5990_v16 }
 0x3d2   :  { %v4935_v29 = vsub.f32 %v4713_v2, %v1723_v3  ;;  %v4938_v18 = vsub.f32 %v4716_v47, %v1723_v3  ;;  %v1851_v21 = vadd.f32 %v1800_v25, %v1799_v63 }
 0x3d3   :  { %v1659_v58 = vpop.xlane.xlu0 %1658 }
 0x3d4   :  { %v1724_v4 = vmul.f32 0.00390625, %v1659_v58  ;;  %1852 = vadd.xlane.f32.xlu0 %v1851_v21  ;;  %v1801_v22 = vmul.f32 %v4935_v29, %v4935_v29  ;;  %v1802_v33 = vmul.f32 %v4938_v18, %v4938_v18 }
 0x3d6   :  { %v4947_v2 = vsub.f32 %v4721_v13, %v1724_v4  ;;  %v4950_v47 = vsub.f32 %v4724_v56, %v1724_v4  ;;  %v1854_v53 = vadd.f32 %v1802_v33, %v1801_v22 }
 0x3d8   :  { %v1662_v50 = vpop.xlane.xlu1 %1661  ;;  %1855 = vadd.xlane.f32.xlu0 %v1854_v53  ;;  %v1803_v3 = vmul.f32 %v4947_v2, %v4947_v2  ;;  %v1804_v63 = vmul.f32 %v4950_v47, %v4950_v47 }
 0x3d9   :  { %v1725_v25 = vmul.f32 0.00390625, %v1662_v50 }
 0x3da   :  { %v1857_v21 = vadd.f32 %v1804_v63, %v1803_v3 }
 0x3db   :  { %v4957_v0 = vsub.f32 %v4729_v59, %v1725_v25  ;;  %v4960_v13 = vsub.f32 %v4732_v36, %v1725_v25 }
 0x3dc   :  { %1858 = vadd.xlane.f32.xlu0 %v1857_v21 }
 0x3dd   :  { %v1665_v58 = vpop.xlane.xlu0 %1664  ;;  %v1805_v4 = vmul.f32 %v4957_v0, %v4957_v0  ;;  %v1806_v22 = vmul.f32 %v4960_v13, %v4960_v13 }
 0x3de   :  { %v1726_v56 = vmul.f32 0.00390625, %v1665_v58  ;;  %v2440_v58 = vld [vmem:[#allocation8 + $0xe8] sm:$0xff] }
 0x3df   :  { %v1860_v59 = vadd.f32 %v1806_v22, %v1805_v4  ;;  %2484 = vmatpush2.msra.mxu1 %v2440_v58 }
 0x3e0   :  { %v4967_v33 = vsub.f32 %v4737_v54, %v1726_v56  ;;  %v4970_v53 = vsub.f32 %v4740_v11, %v1726_v56  ;;  %v2439_v56 = vld [vmem:[#allocation8 + $0xe0] sm:$0xff]  ;;  %2485 = vmatprep.subr.mxu1 %v5990_v16 }
 0x3e1   :  { %1861 = vadd.xlane.f32.xlu0 %v1860_v59  ;;  %2486 = vmatpush2.msra.mxu1 %v2439_v56 }
 0x3e2   :  { %v1807_v36 = vmul.f32 %v4967_v33, %v4967_v33  ;;  %v1808_v50 = vmul.f32 %v4970_v53, %v4970_v53  ;;  %2487 = vmatprep.subr.mxu1 %v5990_v16 }
 0x3e4   :  { %v1863_v3 = vadd.f32 %v1808_v50, %v1807_v36  ;;  %v1668_v63 = vpop.xlane.xlu1 %1667  ;;  %v2438_v36 = vld [vmem:[#allocation8 + $0xd8] sm:$0xff] }
 0x3e5   :  { %v1727_v25 = vmul.f32 0.00390625, %v1668_v63  ;;  %2488 = vmatpush2.msra.mxu1 %v2438_v36 }
 0x3e6   :  { %1864 = vadd.xlane.f32.xlu1 %v1863_v3  ;;  %v2437_v3 = vld [vmem:[#allocation8 + $0xd0] sm:$0xff]  ;;  %2489 = vmatprep.subr.mxu1 %v5990_v16 }
 0x3e7   :  { %v4977_v21 = vsub.f32 %v4745_v41, %v1727_v25  ;;  %v4980_v54 = vsub.f32 %v4748_v52, %v1727_v25  ;;  %2490 = vmatpush2.msra.mxu1 %v2437_v3 }
 0x3e8   :  { %v1671_v11 = vpop.xlane.xlu0 %1670  ;;  %2491 = vmatprep.subr.mxu1 %v5990_v16 }
 0x3e9   :  { %v1728_v4 = vmul.f32 0.00390625, %v1671_v11  ;;  %v1809_v22 = vmul.f32 %v4977_v21, %v4977_v21  ;;  %v1810_v59 = vmul.f32 %v4980_v54, %v4980_v54 }
 0x3eb   :  { %v4988_v41 = vsub.f32 %v4753_v42, %v1728_v4  ;;  %v4991_v52 = vsub.f32 %v4756_v24, %v1728_v4  ;;  %v1866_v50 = vadd.f32 %v1810_v59, %v1809_v22  ;;  %v2436_v42 = vld [vmem:[#allocation8 + $0xc8] sm:$0xff]  ;;  %v2435_v22 = vld [vmem:[#allocation8 + $0xc0] sm:$0xff] }
 0x3ec   :  { %2492 = vmatpush2.msra.mxu1 %v2436_v42 }
 0x3ed   :  { %v1674_v63 = vpop.xlane.xlu1 %1673  ;;  %1867 = vadd.xlane.f32.xlu0 %v1866_v50  ;;  %v1811_v25 = vmul.f32 %v4988_v41, %v4988_v41  ;;  %v1812_v11 = vmul.f32 %v4991_v52, %v4991_v52  ;;  %2493 = vmatprep.subr.mxu1 %v5990_v16 }
 0x3ee   :  { %v1729_v58 = vmul.f32 0.00390625, %v1674_v63  ;;  %2494 = vmatpush2.msra.mxu1 %v2435_v22 }
 0x3ef   :  { %v1869_v24 = vadd.f32 %v1812_v11, %v1811_v25  ;;  %2495 = vmatprep.subr.mxu1 %v5990_v16  ;;  %v2433_v11 = vld [vmem:[#allocation8 + $0xb0] sm:$0xff] }
 0x3f0   :  { %v5000_v56 = vsub.f32 %v4761_v8, %v1729_v58  ;;  %v5003_v4 = vsub.f32 %v4764_v32, %v1729_v58  ;;  %v2434_v8 = vld [vmem:[#allocation8 + $0xb8] sm:$0xff] }
 0x3f1   :  { %v1677_v59 = vpop.xlane.xlu0 %1676  ;;  %1870 = vadd.xlane.f32.xlu1 %v1869_v24  ;;  %2496 = vmatpush2.msra.mxu1 %v2434_v8  ;;  %v2432_v24 = vld [vmem:[#allocation8 + $0xa8] sm:$0xff] }
 0x3f2   :  { %v1730_v50 = vmul.f32 0.00390625, %v1677_v59  ;;  %v1813_v36 = vmul.f32 %v5000_v56, %v5000_v56  ;;  %v1814_v63 = vmul.f32 %v5003_v4, %v5003_v4  ;;  %2497 = vmatprep.subr.mxu1 %v5990_v16 }
 0x3f3   :  { %2498 = vmatpush2.msra.mxu1 %v2433_v11 }
 0x3f4   :  { %v5012_v32 = vsub.f32 %v4769_v17, %v1730_v50  ;;  %v5015_v3 = vsub.f32 %v4772_v39, %v1730_v50  ;;  %v1872_v25 = vadd.f32 %v1814_v63, %v1813_v36  ;;  %2499 = vmatprep.subr.mxu1 %v5990_v16  ;;  %v2431_v63 = vld [vmem:[#allocation8 + $0xa0] sm:$0xff] }
 0x3f5   :  { %2500 = vmatpush2.msra.mxu1 %v2432_v24 }
 0x3f6   :  { %1873 = vadd.xlane.f32.xlu0 %v1872_v25  ;;  %v1815_v58 = vmul.f32 %v5012_v32, %v5012_v32  ;;  %v1816_v42 = vmul.f32 %v5015_v3, %v5015_v3  ;;  %2501 = vmatprep.subr.mxu1 %v5990_v16 }
 0x3f7   :  { %2502 = vmatpush2.msra.mxu1 %v2431_v63  ;;  %v2429_v63 = vld [vmem:[#allocation8 + $0x90] sm:$0xff] }
 0x3f8   :  { %v1680_v17 = vpop.xlane.xlu1 %1679  ;;  %v1875_v39 = vadd.f32 %v1816_v42, %v1815_v58  ;;  %2503 = vmatprep.subr.mxu1 %v5990_v16  ;;  %v2430_v42 = vld [vmem:[#allocation8 + $0x98] sm:$0xff] }
 0x3f9   :  { %v1731_v22 = vmul.f32 0.00390625, %v1680_v17  ;;  %2504 = vmatpush2.msra.mxu1 %v2430_v42 }
 0x3fa   :  { %1876 = vadd.xlane.f32.xlu1 %v1875_v39  ;;  %2505 = vmatprep.subr.mxu1 %v5990_v16 }
 0x3fb   :  { %v5025_v59 = vsub.f32 %v4777_v23, %v1731_v22  ;;  %v5028_v50 = vsub.f32 %v4780_v51, %v1731_v22  ;;  %2506 = vmatpush2.msra.mxu1 %v2429_v63 }
 0x3fc   :  { %v1683_v36 = vpop.xlane.xlu0 %1682  ;;  %2507 = vmatprep.subr.mxu1 %v5990_v16 }
 0x3fd   :  { %v1732_v8 = vmul.f32 0.00390625, %v1683_v36  ;;  %v1817_v25 = vmul.f32 %v5025_v59, %v5025_v59  ;;  %v1818_v11 = vmul.f32 %v5028_v50, %v5028_v50 }
 0x3ff   :  { %v5037_v23 = vsub.f32 %v4785_v57, %v1732_v8  ;;  %v5040_v51 = vsub.f32 %v4788_v19, %v1732_v8  ;;  %v1878_v58 = vadd.f32 %v1818_v11, %v1817_v25  ;;  %v2428_v8 = vld [vmem:[#allocation8 + $0x88] sm:$0xff] }
 0x400   :  { %2508 = vmatpush2.msra.mxu1 %v2428_v8 }
 0x401   :  { %1879 = vadd.xlane.f32.xlu0 %v1878_v58  ;;  %v1819_v24 = vmul.f32 %v5037_v23, %v5037_v23  ;;  %v1820_v17 = vmul.f32 %v5040_v51, %v5040_v51  ;;  %v1686_v22 = vpop.xlane.xlu1 %1685  ;;  %2509 = vmatprep.subr.mxu1 %v5990_v16 }
 0x402   :  { %v1733_v39 = vmul.f32 0.00390625, %v1686_v22 }
 0x403   :  { %v1881_v36 = vadd.f32 %v1820_v17, %v1819_v24  ;;  %v2427_v17 = vld [vmem:[#allocation8 + $0x80] sm:$0xff] }
 0x404   :  { %v5048_v57 = vsub.f32 %v4793_v55, %v1733_v39  ;;  %v5051_v19 = vsub.f32 %v4796_v37, %v1733_v39  ;;  %2510 = vmatpush2.msra.mxu1 %v2427_v17 }
 0x405   :  { %1882 = vadd.xlane.f32.xlu1 %v1881_v36  ;;  %v1689_v25 = vpop.xlane.xlu0 %1688 }
 0x406   :  { %v1734_v11 = vmul.f32 0.00390625, %v1689_v25  ;;  %v1821_v58 = vmul.f32 %v5048_v57, %v5048_v57  ;;  %v1822_v42 = vmul.f32 %v5051_v19, %v5051_v19 }
 0x408   :  { %v5059_v55 = vsub.f32 %v4801_v15, %v1734_v11  ;;  %v5062_v37 = vsub.f32 %v4804_v48, %v1734_v11  ;;  %v1884_v24 = vadd.f32 %v1822_v42, %v1821_v58 }
 0x40a   :  { %1885 = vadd.xlane.f32.xlu0 %v1884_v24  ;;  %v1823_v22 = vmul.f32 %v5059_v55, %v5059_v55  ;;  %v1824_v39 = vmul.f32 %v5062_v37, %v5062_v37 }
 0x40b   :  { %v1692_v36 = vpop.xlane.xlu1 %1691 }
 0x40c   :  { %v1735_v63 = vmul.f32 0.00390625, %v1692_v36  ;;  %v1887_v8 = vadd.f32 %v1824_v39, %v1823_v22 }
 0x40e   :  { %v5070_v15 = vsub.f32 %v4809_v20, %v1735_v63  ;;  %v5073_v48 = vsub.f32 %v4812_v44, %v1735_v63  ;;  %1888 = vadd.xlane.f32.xlu1 %v1887_v8 }
 0x40f   :  { %v1695_v16 = vpop.xlane.xlu0 %1694 }
 0x410   :  { %v1736_v25 = vmul.f32 0.00390625, %v1695_v16  ;;  %v1825_v11 = vmul.f32 %v5070_v15, %v5070_v15  ;;  %v1826_v58 = vmul.f32 %v5073_v48, %v5073_v48 }
 0x412   :  { %v5080_v42 = vsub.f32 %v4817_v14, %v1736_v25  ;;  %v5083_v24 = vsub.f32 %v4820_v43, %v1736_v25  ;;  %v1890_v20 = vadd.f32 %v1826_v58, %v1825_v11 }
 0x413   :  { %v1698_v17 = vpop.xlane.xlu1 %1697 }
 0x414   :  { %v1737_v22 = vmul.f32 0.00390625, %v1698_v17  ;;  %1891 = vadd.xlane.f32.xlu0 %v1890_v20  ;;  %v1827_v44 = vmul.f32 %v5080_v42, %v5080_v42  ;;  %v1828_v39 = vmul.f32 %v5083_v24, %v5083_v24 }
 0x416   :  { %v5090_v36 = vsub.f32 %v4825_v45, %v1737_v22  ;;  %v5093_v63 = vsub.f32 %v4828_v30, %v1737_v22  ;;  %v1893_v14 = vadd.f32 %v1828_v39, %v1827_v44 }
 0x417   :  { %v1701_v8 = vpop.xlane.xlu0 %1700 }
 0x418   :  { %v1738_v43 = vmul.f32 0.00390625, %v1701_v8  ;;  %1894 = vadd.xlane.f32.xlu1 %v1893_v14  ;;  %v1829_v16 = vmul.f32 %v5090_v36, %v5090_v36  ;;  %v1830_v25 = vmul.f32 %v5093_v63, %v5093_v63 }
 0x41a   :  { %v5100_v11 = vsub.f32 %v4833_v5, %v1738_v43  ;;  %v5103_v58 = vsub.f32 %v4836_v1, %v1738_v43  ;;  %v1896_v45 = vadd.f32 %v1830_v25, %v1829_v16 }
 0x41c   :  { %v1704_v20 = vpop.xlane.xlu1 %1703  ;;  %1897 = vadd.xlane.f32.xlu0 %v1896_v45  ;;  %v1831_v30 = vmul.f32 %v5100_v11, %v5100_v11  ;;  %v1832_v17 = vmul.f32 %v5103_v58, %v5103_v58 }
 0x41d   :  { %v1739_v22 = vmul.f32 0.00390625, %v1704_v20 }
 0x41e   :  { %v1899_v44 = vadd.f32 %v1832_v17, %v1831_v30 }
 0x41f   :  { %v5110_v39 = vsub.f32 %v4841_v46, %v1739_v22  ;;  %v5113_v5 = vsub.f32 %v4844_v49, %v1739_v22 }
 0x420   :  { %v1707_v14 = vpop.xlane.xlu1 %1706  ;;  %1900 = vadd.xlane.f32.xlu1 %v1899_v44 }
 0x421   :  { %v1740_v1 = vmul.f32 0.00390625, %v1707_v14  ;;  %v1833_v8 = vmul.f32 %v5110_v39, %v5110_v39  ;;  %v1834_v43 = vmul.f32 %v5113_v5, %v5113_v5 }
 0x423   :  { %v5120_v16 = vsub.f32 %v4849_v62, %v1740_v1  ;;  %v5123_v25 = vsub.f32 %v4852_v26, %v1740_v1  ;;  %v1902_v46 = vadd.f32 %v1834_v43, %v1833_v8 }
 0x424   :  { %v1710_v45 = vpop.xlane.xlu1 %1709 }
 0x425   :  { %v1741_v20 = vmul.f32 0.00390625, %v1710_v45  ;;  %1903 = vadd.xlane.f32.xlu0 %v1902_v46  ;;  %v1835_v49 = vmul.f32 %v5120_v16, %v5120_v16  ;;  %v1836_v30 = vmul.f32 %v5123_v25, %v5123_v25 }
 0x427   :  { %v5130_v17 = vsub.f32 %v4857_v34, %v1741_v20  ;;  %v5133_v22 = vsub.f32 %v4860_v12, %v1741_v20  ;;  %v1905_v62 = vadd.f32 %v1836_v30, %v1835_v49 }
 0x428   :  { %v1713_v44 = vpop.xlane.xlu1 %1712 }
 0x429   :  { %5993 = vst [vmem:[#allocation47_spill] sm:$0xff] %v5130_v17  ;;  %5994 = vst [vmem:[#allocation46_spill] sm:$0xff] %v5133_v22  ;;  %v1742_v26 = vmul.f32 0.00390625, %v1713_v44  ;;  %1906 = vadd.xlane.f32.xlu1 %v1905_v62  ;;  %v1837_v14 = vmul.f32 %v5130_v17, %v5130_v17  ;;  %v1838_v1 = vmul.f32 %v5133_v22, %v5133_v22 }
 0x42b   :  { %v5140_v8 = vsub.f32 %v4865_v38, %v1742_v26  ;;  %v5143_v43 = vsub.f32 %v4868_v60, %v1742_v26  ;;  %v1908_v34 = vadd.f32 %v1838_v1, %v1837_v14 }
 0x42c   :  { %v1716_v46 = vpop.xlane.xlu1 %1715 }
 0x42d   :  { %5995 = vst [vmem:[#allocation49_spill] sm:$0xff] %v5140_v8  ;;  %5996 = vst [vmem:[#allocation48_spill] sm:$0xff] %v5143_v43  ;;  %v1743_v12 = vmul.f32 0.00390625, %v1716_v46  ;;  %1909 = vadd.xlane.f32.xlu0 %v1908_v34  ;;  %v1839_v45 = vmul.f32 %v5140_v8, %v5140_v8  ;;  %v1840_v20 = vmul.f32 %v5143_v43, %v5143_v43 }
 0x42f   :  { %v5150_v49 = vsub.f32 %v4873_v61, %v1743_v12  ;;  %v5153_v30 = vsub.f32 %v4876_v10, %v1743_v12  ;;  %v1911_v38 = vadd.f32 %v1840_v20, %v1839_v45 }
 0x430   :  { %v1719_v62 = vpop.xlane.xlu1 %1718 }
 0x431   :  { %5997 = vst [vmem:[#allocation51_spill] sm:$0xff] %v5150_v49  ;;  %5998 = vst [vmem:[#allocation50_spill] sm:$0xff] %v5153_v30  ;;  %v1841_v60 = vmul.f32 %v5150_v49, %v5150_v49  ;;  %v1842_v44 = vmul.f32 %v5153_v30, %v5153_v30  ;;  %v1744_v26 = vmul.f32 0.00390625, %v1719_v62  ;;  %1912 = vadd.xlane.f32.xlu1 %v1911_v38 }
 0x433   :  { %v5160_v14 = vsub.f32 %v4881_v6, %v1744_v26  ;;  %v5163_v1 = vsub.f32 %v4884_v31, %v1744_v26  ;;  %v1914_v61 = vadd.f32 %v1842_v44, %v1841_v60  ;;  %v6001_v31 = vld [vmem:[#allocation16_spill] sm:$0xff] }
 0x434   :  { %v1997_v26 = vsub.s32 3, %v6001_v31  ;;  %v2105_v30 = vsub.s32 4, %v6001_v31  ;;  %v6002_v31 = vld [vmem:[#allocation45_spill] sm:$0xff] }
 0x435   :  { %5999 = vst [vmem:[#allocation53_spill] sm:$0xff] %v5160_v14  ;;  %6000 = vst [vmem:[#allocation52_spill] sm:$0xff] %v5163_v1  ;;  %v1843_v10 = vmul.f32 %v5160_v14, %v5160_v14  ;;  %v1844_v34 = vmul.f32 %v5163_v1, %v5163_v1  ;;  %1915 = vadd.xlane.f32.xlu0 %v1914_v61 }
 0x436   :  { %v5172_v61 = vrot.slane %v4676_v27, %v1997_v26 }
 0x437   :  { %v1917_v46 = vadd.f32 %v1844_v34, %v1843_v10  ;;  %v5175_v34 = vrot.slane %v4682_v28, %v1997_v26  ;;  %v6003_v26 = vld [vmem:[#allocation44_spill] sm:$0xff] }
 0x439   :  { %1918 = vadd.xlane.f32.xlu1 %v1917_v46 }
 0x454   :  { %v1847_v12 = vpop.xlane.xlu0 %1846 }
 0x455   :  { %v1920_v45 = vmul.f32 0.00390625, %v1847_v12 }
 0x457   :  { %v1945_v20 = vadd.f32 1e-05, %v1920_v45 }
 0x459   :  { %3352 = vrsqrt.f32 %v1945_v20  ;;  %v1850_v38 = vpop.xlane.xlu0 %1849  ;;  %v5178_v20 = vrot.slane %v4676_v27, %v2105_v30 }
 0x45a   :  { %v1921_v6 = vmul.f32 0.00390625, %v1850_v38 }
 0x45c   :  { %v1946_v62 = vadd.f32 1e-05, %v1921_v6 }
 0x45d   :  { %v1853_v49 = vpop.xlane.xlu0 %1852 }
 0x45e   :  { %3354 = vrsqrt.f32 %v1946_v62  ;;  %v1922_v60 = vmul.f32 0.00390625, %v1853_v49  ;;  %v5181_v49 = vrot.slane %v4682_v28, %v2105_v30 }
 0x460   :  { %v1947_v44 = vadd.f32 1e-05, %v1922_v60 }
 0x461   :  { %v1856_v14 = vpop.xlane.xlu0 %1855 }
 0x462   :  { %3356 = vrsqrt.f32 %v1947_v44  ;;  %v1923_v10 = vmul.f32 0.00390625, %v1856_v14 }
 0x464   :  { %v1948_v46 = vadd.f32 1e-05, %v1923_v10 }
 0x465   :  { %v1859_v45 = vpop.xlane.xlu0 %1858 }
 0x466   :  { %v3353_v12 = vpop.eup %3352  ;;  %3358 = vrsqrt.f32 %v1948_v46  ;;  %v1924_v6 = vmul.f32 0.00390625, %v1859_v45 }
 0x467   :  { %v2003_v38 = vmul.f32 %v3353_v12, %v5172_v61  ;;  %v2004_v62 = vmul.f32 %v3353_v12, %v5175_v34 }
 0x468   :  { %v1949_v60 = vadd.f32 1e-05, %v1924_v6 }
 0x469   :  { %v2053_v14 = vmul.f32 %v2003_v38, %v6002_v31  ;;  %v2054_v44 = vmul.f32 %v2004_v62, %v6003_v26 }
 0x46a   :  { %3360 = vrsqrt.f32 %v1949_v60  ;;  %v1862_v10 = vpop.xlane.xlu0 %1861 }
 0x46b   :  { %v2112_v1 = vadd.f32 %v5181_v49, %v2054_v44  ;;  %v5189_v27 = vadd.f32 %v5178_v20, %v2053_v14  ;;  %v3355_v28 = vpop.eup %3354  ;;  %v1925_v30 = vmul.f32 0.00390625, %v1862_v10 }
 0x46c   :  { %v2006_v12 = vmul.f32 %v3355_v28, %v5175_v34  ;;  %v2005_v38 = vmul.f32 %v3355_v28, %v5172_v61 }
 0x46d   :  { %v2212_v8 = vmul.f32 0.70710677, %v2112_v1  ;;  %v2211_v46 = vmul.f32 0.70710677, %v5189_v27  ;;  %v1950_v45 = vadd.f32 1e-05, %v1925_v30 }
 0x46e   :  { %v2056_v60 = vmul.f32 %v2006_v12, %v4914_v35  ;;  %v2055_v14 = vmul.f32 %v2005_v38, %v4911_v40 }
 0x46f   :  { %v1865_v6 = vpop.xlane.xlu1 %1864  ;;  %3362 = verf.f32 %v2212_v8  ;;  %v3357_v62 = vpop.eup %3356 }
 0x470   :  { %3364 = vrsqrt.f32 %v1950_v45  ;;  %v1926_v31 = vmul.f32 0.00390625, %v1865_v6  ;;  %v2008_v26 = vmul.f32 %v3357_v62, %v5175_v34  ;;  %v2007_v44 = vmul.f32 %v3357_v62, %v5172_v61 }
 0x471   :  { %3366 = verf.f32 %v2211_v46  ;;  %v2114_v30 = vadd.f32 %v5181_v49, %v2056_v60  ;;  %v5200_v43 = vadd.f32 %v5178_v20, %v2055_v14 }
 0x472   :  { %v1951_v10 = vadd.f32 1e-05, %v1926_v31  ;;  %v2058_v8 = vmul.f32 %v2008_v26, %v4926_v9  ;;  %v2057_v28 = vmul.f32 %v2007_v44, %v4923_v7 }
 0x473   :  { %v3359_v45 = vpop.eup %3358  ;;  %v2214_v35 = vmul.f32 0.70710677, %v2114_v30  ;;  %v2213_v40 = vmul.f32 0.70710677, %v5200_v43  ;;  %v2164_v22 = vmul.f32 0.5, %v2114_v30 }
 0x474   :  { %3368 = vrsqrt.f32 %v1951_v10  ;;  %v5206_v46 = vadd.f32 %v5181_v49, %v2058_v8  ;;  %v5209_v12 = vadd.f32 %v5178_v20, %v2057_v28  ;;  %v2010_v38 = vmul.f32 %v3359_v45, %v5175_v34 }
 0x475   :  { %3370 = verf.f32 %v2214_v35  ;;  %v2009_v6 = vmul.f32 %v3359_v45, %v5172_v61 }
 0x476   :  { %v1868_v62 = vpop.xlane.xlu0 %1867  ;;  %3372 = verf.f32 %v2213_v40  ;;  %v2216_v7 = vmul.f32 0.70710677, %v5206_v46  ;;  %v2215_v60 = vmul.f32 0.70710677, %v5209_v12  ;;  %v2060_v14 = vmul.f32 %v2010_v38, %v4938_v18 }
 0x477   :  { %v3361_v9 = vpop.eup %3360  ;;  %v1927_v31 = vmul.f32 0.00390625, %v1868_v62  ;;  %v2059_v26 = vmul.f32 %v2009_v6, %v4935_v29 }
 0x478   :  { %3374 = verf.f32 %v2216_v7  ;;  %v2012_v44 = vmul.f32 %v3361_v9, %v5175_v34  ;;  %v2011_v10 = vmul.f32 %v3361_v9, %v5172_v61  ;;  %v5220_v28 = vadd.f32 %v5181_v49, %v2060_v14 }
 0x479   :  { %v1952_v8 = vadd.f32 1e-05, %v1927_v31  ;;  %3376 = verf.f32 %v2215_v60  ;;  %v5223_v45 = vadd.f32 %v5178_v20, %v2059_v26  ;;  %v2162_v7 = vmul.f32 0.5, %v2112_v1 }
 0x47a   :  { %v1871_v35 = vpop.xlane.xlu1 %1870  ;;  %v2062_v40 = vmul.f32 %v2012_v44, %v4950_v47  ;;  %v2061_v18 = vmul.f32 %v2011_v10, %v4947_v2  ;;  %v2218_v6 = vmul.f32 0.70710677, %v5220_v28  ;;  %v2161_v10 = vmul.f32 0.5, %v5189_v27 }
 0x47b   :  { %3378 = vrsqrt.f32 %v1952_v8  ;;  %v1928_v29 = vmul.f32 0.00390625, %v1871_v35  ;;  %v2217_v31 = vmul.f32 0.70710677, %v5223_v45 }
 0x47c   :  { %v3363_v38 = vpop.eup %3362  ;;  %v5230_v60 = vadd.f32 %v5181_v49, %v2062_v40  ;;  %3380 = verf.f32 %v2218_v6  ;;  %v5233_v47 = vadd.f32 %v5178_v20, %v2061_v18 }
 0x47d   :  { %v3365_v62 = vpop.eup %3364  ;;  %v2312_v9 = vadd.f32 1.0, %v3363_v38  ;;  %v1953_v26 = vadd.f32 1e-05, %v1928_v29  ;;  %3382 = verf.f32 %v2217_v31 }
 0x47e   :  { %v3367_v14 = vpop.eup %3366  ;;  %v2014_v2 = vmul.f32 %v3365_v62, %v5175_v34  ;;  %v2220_v35 = vmul.f32 0.70710677, %v5230_v60  ;;  %v2219_v40 = vmul.f32 0.70710677, %v5233_v47  ;;  %v2013_v6 = vmul.f32 %v3365_v62, %v5172_v61 }
 0x47f   :  { %v2362_v44 = vmul.f32 %v2312_v9, %v2162_v7  ;;  %v2311_v8 = vadd.f32 1.0, %v3367_v14  ;;  %3384 = vrsqrt.f32 %v1953_v26  ;;  %v1874_v1 = vpop.xlane.xlu0 %1873  ;;  %v2163_v62 = vmul.f32 0.5, %v5200_v43 }
 0x480   :  { %v1929_v17 = vmul.f32 0.00390625, %v1874_v1  ;;  %v2064_v18 = vmul.f32 %v2014_v2, %v4960_v13  ;;  %3386 = verf.f32 %v2220_v35  ;;  %v2063_v26 = vmul.f32 %v2013_v6, %v4957_v0 }
 0x481   :  { %v3369_v38 = vpop.eup %3368  ;;  %2511 = vmatprep.mubr.f32.mxu1 %v2362_v44  ;;  %v2361_v29 = vmul.f32 %v2311_v8, %v2161_v10  ;;  %3388 = verf.f32 %v2219_v40 }
 0x482   :  { %v2016_v27 = vmul.f32 %v3369_v38, %v5175_v34  ;;  %v2015_v7 = vmul.f32 %v3369_v38, %v5172_v61  ;;  %v3371_v9 = vpop.eup %3370  ;;  %v1954_v31 = vadd.f32 1e-05, %v1929_v17  ;;  %v5244_v14 = vadd.f32 %v5181_v49, %v2064_v18 }
 0x483   :  { %2512 = vmatmul.mubr.f32.vlgmr.msra.gmra.mxu1 %v2361_v29  ;;  %v3373_v44 = vpop.eup %3372  ;;  %v1877_v10 = vpop.xlane.xlu1 %1876  ;;  %v2314_v13 = vadd.f32 1.0, %v3371_v9  ;;  %v2166_v17 = vmul.f32 0.5, %v5206_v46  ;;  %v5253_v0 = vadd.f32 %v5178_v20, %v2063_v26  ;;  %v2165_v46 = vmul.f32 0.5, %v5209_v12 }
 0x484   :  { %v2066_v30 = vmul.f32 %v2016_v27, %v4970_v53  ;;  %v2065_v2 = vmul.f32 %v2015_v7, %v4967_v33  ;;  %3390 = vrsqrt.f32 %v1954_v31  ;;  %v1930_v8 = vmul.f32 0.00390625, %v1877_v10 }
 0x485   :  { %v2313_v1 = vadd.f32 1.0, %v3373_v44  ;;  %v3375_v35 = vpop.eup %3374  ;;  %v2364_v40 = vmul.f32 %v2314_v13, %v2164_v22  ;;  %v2222_v38 = vmul.f32 0.70710677, %v5244_v14  ;;  %v2221_v22 = vmul.f32 0.70710677, %v5253_v0 }
 0x486   :  { %v5256_v29 = vadd.f32 %v5181_v49, %v2066_v30  ;;  %v3377_v43 = vpop.eup %3376  ;;  %v1955_v18 = vadd.f32 1e-05, %v1930_v8  ;;  %v2316_v6 = vadd.f32 1.0, %v3375_v35  ;;  %v5259_v33 = vadd.f32 %v5178_v20, %v2065_v2 }
 0x487   :  { %v2363_v53 = vmul.f32 %v2313_v1, %v2163_v62  ;;  %2516 = vmatprep.mubr.f32.mxu1 %v2364_v40  ;;  %v2315_v27 = vadd.f32 1.0, %v3377_v43  ;;  %3392 = verf.f32 %v2222_v38  ;;  %v2168_v8 = vmul.f32 0.5, %v5220_v28 }
 0x488   :  { %v3379_v7 = vpop.eup %3378  ;;  %3394 = vrsqrt.f32 %v1955_v18  ;;  %v2366_v9 = vmul.f32 %v2316_v6, %v2166_v17  ;;  %v2224_v31 = vmul.f32 0.70710677, %v5256_v29  ;;  %v2223_v10 = vmul.f32 0.70710677, %v5259_v33 }
 0x489   :  { %2517 = vmatmul.mubr.f32.gmra.mxu1 %v2363_v53  ;;  %v2365_v44 = vmul.f32 %v2315_v27, %v2165_v46  ;;  %3396 = verf.f32 %v2221_v22  ;;  %v3381_v13 = vpop.eup %3380  ;;  %v2018_v12 = vmul.f32 %v3379_v7, %v5175_v34  ;;  %v2017_v30 = vmul.f32 %v3379_v7, %v5172_v61 }
 0x48a   :  { %v1880_v26 = vpop.xlane.xlu0 %1879  ;;  %2521 = vmatprep.mubr.f32.mxu1 %v2366_v9  ;;  %3398 = verf.f32 %v2224_v31  ;;  %v3383_v2 = vpop.eup %3382  ;;  %v2318_v1 = vadd.f32 1.0, %v3381_v13  ;;  %v2167_v17 = vmul.f32 0.5, %v5223_v45  ;;  %v2170_v46 = vmul.f32 0.5, %v5230_v60 }
 0x48b   :  { %v1931_v62 = vmul.f32 0.00390625, %v1880_v26  ;;  %3400 = verf.f32 %v2223_v10  ;;  %v2317_v38 = vadd.f32 1.0, %v3383_v2  ;;  %v2068_v43 = vmul.f32 %v2018_v12, %v4980_v54 }
 0x48c   :  { %v3385_v35 = vpop.eup %3384  ;;  %v2067_v18 = vmul.f32 %v2017_v30, %v4977_v21  ;;  %v2368_v6 = vmul.f32 %v2318_v1, %v2168_v8  ;;  %v2169_v10 = vmul.f32 0.5, %v5233_v47  ;;  %v2172_v2 = vmul.f32 0.5, %v5244_v14 }
 0x48d   :  { %v1956_v40 = vadd.f32 1e-05, %v1931_v62  ;;  %2522 = vmatmul.mubr.f32.gmra.mxu1 %v2365_v44  ;;  %v2020_v27 = vmul.f32 %v3385_v35, %v5175_v34  ;;  %v2019_v28 = vmul.f32 %v3385_v35, %v5172_v61  ;;  %v3387_v22 = vpop.eup %3386  ;;  %v2367_v7 = vmul.f32 %v2317_v38, %v2167_v17 }
 0x48e   :  { %v1883_v53 = vpop.xlane.xlu1 %1882  ;;  %v5275_v9 = vadd.f32 %v5181_v49, %v2068_v43  ;;  %v3389_v31 = vpop.eup %3388  ;;  %2526 = vmatprep.mubr.f32.mxu1 %v2368_v6  ;;  %v2320_v54 = vadd.f32 1.0, %v3387_v22  ;;  %v5278_v21 = vadd.f32 %v5178_v20, %v2067_v18  ;;  %v2171_v35 = vmul.f32 0.5, %v5253_v0 }
 0x48f   :  { %3402 = vrsqrt.f32 %v1956_v40  ;;  %v1932_v45 = vmul.f32 0.00390625, %v1883_v53  ;;  %v2070_v26 = vmul.f32 %v2020_v27, %v4991_v52  ;;  %v2069_v60 = vmul.f32 %v2019_v28, %v4988_v41 }
 0x490   :  { %v2319_v13 = vadd.f32 1.0, %v3389_v31  ;;  %v2226_v62 = vmul.f32 0.70710677, %v5275_v9  ;;  %v2370_v30 = vmul.f32 %v2320_v54, %v2170_v46  ;;  %v2225_v8 = vmul.f32 0.70710677, %v5278_v21 }
 0x491   :  { %v1957_v44 = vadd.f32 1e-05, %v1932_v45  ;;  %2527 = vmatmul.mubr.f32.gmra.mxu1 %v2367_v7  ;;  %v3391_v12 = vpop.eup %3390  ;;  %v5287_v1 = vadd.f32 %v5181_v49, %v2070_v26  ;;  %v5290_v41 = vadd.f32 %v5178_v20, %v2069_v60  ;;  %v2174_v18 = vmul.f32 0.5, %v5256_v29 }
 0x492   :  { %v2369_v52 = vmul.f32 %v2319_v13, %v2169_v10  ;;  %v2022_v17 = vmul.f32 %v3391_v12, %v5175_v34  ;;  %2531 = vmatprep.mubr.f32.mxu1 %v2370_v30  ;;  %v2021_v14 = vmul.f32 %v3391_v12, %v5172_v61  ;;  %v2173_v12 = vmul.f32 0.5, %v5259_v33 }
 0x493   :  { %3404 = vrsqrt.f32 %v1957_v44  ;;  %v1886_v47 = vpop.xlane.xlu0 %1885  ;;  %v2228_v40 = vmul.f32 0.70710677, %v5287_v1  ;;  %v2227_v53 = vmul.f32 0.70710677, %v5290_v41 }
 0x494   :  { %3406 = verf.f32 %v2226_v62  ;;  %v3393_v38 = vpop.eup %3392  ;;  %v1933_v43 = vmul.f32 0.00390625, %v1886_v47  ;;  %v2072_v27 = vmul.f32 %v2022_v17, %v5003_v4  ;;  %v2071_v0 = vmul.f32 %v2021_v14, %v5000_v56 }
 0x495   :  { %2532 = vmatmul.mubr.f32.gmra.mxu1 %v2369_v52  ;;  %3408 = verf.f32 %v2225_v8  ;;  %v3395_v6 = vpop.eup %3394  ;;  %v2322_v46 = vadd.f32 1.0, %v3393_v38 }
 0x496   :  { %3410 = verf.f32 %v2228_v40  ;;  %v3397_v28 = vpop.eup %3396  ;;  %v1958_v22 = vadd.f32 1e-05, %v1933_v43  ;;  %v2024_v45 = vmul.f32 %v3395_v6, %v5175_v34  ;;  %v2023_v7 = vmul.f32 %v3395_v6, %v5172_v61 }
 0x497   :  { %3412 = verf.f32 %v2227_v53  ;;  %v3399_v31 = vpop.eup %3398  ;;  %v1889_v54 = vpop.xlane.xlu1 %1888  ;;  %v2372_v29 = vmul.f32 %v2322_v46, %v2172_v2  ;;  %v2321_v26 = vadd.f32 1.0, %v3397_v28  ;;  %v5303_v60 = vadd.f32 %v5181_v49, %v2072_v27 }
 0x498   :  { %v5306_v44 = vadd.f32 %v5178_v20, %v2071_v0  ;;  %v3401_v4 = vpop.eup %3400  ;;  %3414 = vrsqrt.f32 %v1958_v22  ;;  %v1934_v56 = vmul.f32 0.00390625, %v1889_v54  ;;  %v2324_v10 = vadd.f32 1.0, %v3399_v31 }
 0x499   :  { %v2074_v13 = vmul.f32 %v2024_v45, %v5015_v3  ;;  %2536 = vmatprep.mubr.f32.mxu1 %v2372_v29  ;;  %v2371_v62 = vmul.f32 %v2321_v26, %v2171_v35  ;;  %v2323_v30 = vadd.f32 1.0, %v3401_v4  ;;  %v2230_v2 = vmul.f32 0.70710677, %v5303_v60 }
 0x49a   :  { %v1959_v8 = vadd.f32 1e-05, %v1934_v56  ;;  %v2374_v52 = vmul.f32 %v2324_v10, %v2174_v18  ;;  %v2229_v17 = vmul.f32 0.70710677, %v5306_v44  ;;  %v2073_v3 = vmul.f32 %v2023_v7, %v5012_v32 }
 0x49b   :  { %2537 = vmatmul.mubr.f32.gmra.mxu1 %v2371_v62  ;;  %v2373_v40 = vmul.f32 %v2323_v30, %v2173_v12  ;;  %3416 = verf.f32 %v2230_v2  ;;  %v5313_v14 = vadd.f32 %v5181_v49, %v2074_v13  ;;  %v2176_v32 = vmul.f32 0.5, %v5275_v9 }
 0x49c   :  { %v3403_v47 = vpop.eup %3402  ;;  %3418 = vrsqrt.f32 %v1959_v8  ;;  %2541 = vmatprep.mubr.f32.mxu1 %v2374_v52  ;;  %v5320_v18 = vadd.f32 %v5178_v20, %v2073_v3  ;;  %v2175_v45 = vmul.f32 0.5, %v5278_v21  ;;  %v2178_v21 = vmul.f32 0.5, %v5287_v1 }
 0x49d   :  { %v2026_v33 = vmul.f32 %v3403_v47, %v5175_v34  ;;  %v2025_v35 = vmul.f32 %v3403_v47, %v5172_v61  ;;  %v1892_v38 = vpop.xlane.xlu0 %1891  ;;  %3420 = verf.f32 %v2229_v17  ;;  %v2232_v43 = vmul.f32 0.70710677, %v5313_v14 }
 0x49e   :  { %v1935_v53 = vmul.f32 0.00390625, %v1892_v38  ;;  %v2231_v0 = vmul.f32 0.70710677, %v5320_v18  ;;  %v2177_v12 = vmul.f32 0.5, %v5290_v41 }
 0x49f   :  { %v2076_v6 = vmul.f32 %v2026_v33, %v5028_v50  ;;  %v2075_v46 = vmul.f32 %v2025_v35, %v5025_v59  ;;  %2542 = vmatmul.mubr.f32.gmra.mxu1 %v2373_v40  ;;  %3422 = verf.f32 %v2232_v43 }
 0x4a0   :  { %v3405_v27 = vpop.eup %3404  ;;  %v1960_v22 = vadd.f32 1e-05, %v1935_v53  ;;  %3424 = verf.f32 %v2231_v0  ;;  %v2180_v0 = vmul.f32 0.5, %v5303_v60 }
 0x4a1   :  { %v3407_v28 = vpop.eup %3406  ;;  %v5328_v7 = vadd.f32 %v5181_v49, %v2076_v6  ;;  %v5331_v31 = vadd.f32 %v5178_v20, %v2075_v46  ;;  %v1895_v54 = vpop.xlane.xlu1 %1894  ;;  %v2028_v29 = vmul.f32 %v3405_v27, %v5175_v34  ;;  %v2027_v9 = vmul.f32 %v3405_v27, %v5172_v61 }
 0x4a2   :  { %v3409_v50 = vpop.eup %3408  ;;  %v2326_v59 = vadd.f32 1.0, %v3407_v28  ;;  %3426 = vrsqrt.f32 %v1960_v22  ;;  %v1936_v4 = vmul.f32 0.00390625, %v1895_v54  ;;  %v2179_v22 = vmul.f32 0.5, %v5306_v44 }
 0x4a3   :  { %v3411_v26 = vpop.eup %3410  ;;  %v2325_v56 = vadd.f32 1.0, %v3409_v50  ;;  %v2234_v30 = vmul.f32 0.70710677, %v5328_v7  ;;  %v2233_v17 = vmul.f32 0.70710677, %v5331_v31  ;;  %v2078_v33 = vmul.f32 %v2028_v29, %v5040_v51 }
 0x4a4   :  { %v3413_v10 = vpop.eup %3412  ;;  %v2376_v13 = vmul.f32 %v2326_v59, %v2176_v32  ;;  %v2328_v62 = vadd.f32 1.0, %v3411_v26  ;;  %v1961_v2 = vadd.f32 1e-05, %v1936_v4  ;;  %v2077_v1 = vmul.f32 %v2027_v9, %v5037_v23 }
 0x4a5   :  { %v2375_v8 = vmul.f32 %v2325_v56, %v2175_v45  ;;  %v2327_v52 = vadd.f32 1.0, %v3413_v10  ;;  %v3415_v47 = vpop.eup %3414  ;;  %v1898_v40 = vpop.xlane.xlu0 %1897  ;;  %3428 = verf.f32 %v2234_v30  ;;  %v5343_v43 = vadd.f32 %v5181_v49, %v2078_v33 }
 0x4a6   :  { %2546 = vmatprep.mubr.f32.mxu1 %v2376_v13  ;;  %v2378_v3 = vmul.f32 %v2328_v62, %v2178_v21  ;;  %3430 = vrsqrt.f32 %v1961_v2  ;;  %v1937_v35 = vmul.f32 0.00390625, %v1898_v40  ;;  %v2030_v38 = vmul.f32 %v3415_v47, %v5175_v34 }
 0x4a7   :  { %2547 = vmatmul.mubr.f32.gmra.mxu1 %v2375_v8  ;;  %v2377_v41 = vmul.f32 %v2327_v52, %v2177_v12  ;;  %3432 = verf.f32 %v2233_v17  ;;  %v5346_v53 = vadd.f32 %v5178_v20, %v2077_v1  ;;  %v2029_v6 = vmul.f32 %v3415_v47, %v5172_v61 }
 0x4a8   :  { %2551 = vmatprep.mubr.f32.mxu1 %v2378_v3  ;;  %v3417_v46 = vpop.eup %3416  ;;  %v1962_v51 = vadd.f32 1e-05, %v1937_v35  ;;  %v2080_v23 = vmul.f32 %v2030_v38, %v5051_v19  ;;  %v2236_v45 = vmul.f32 0.70710677, %v5343_v43  ;;  %v2182_v44 = vmul.f32 0.5, %v5313_v14 }
 0x4a9   :  { %v3419_v27 = vpop.eup %3418  ;;  %v1901_v32 = vpop.xlane.xlu1 %1900  ;;  %v2330_v28 = vadd.f32 1.0, %v3417_v46  ;;  %v2235_v59 = vmul.f32 0.70710677, %v5346_v53  ;;  %v2079_v26 = vmul.f32 %v2029_v6, %v5048_v57  ;;  %v2181_v57 = vmul.f32 0.5, %v5320_v18 }
 0x4aa   :  { %v3421_v50 = vpop.eup %3420  ;;  %3434 = vrsqrt.f32 %v1962_v51  ;;  %v1938_v54 = vmul.f32 0.00390625, %v1901_v32  ;;  %v5355_v29 = vadd.f32 %v5181_v49, %v2080_v23  ;;  %v2032_v62 = vmul.f32 %v3419_v27, %v5175_v34 }
 0x4ab   :  { %2552 = vmatmul.mubr.f32.gmra.mxu1 %v2377_v41  ;;  %v2380_v9 = vmul.f32 %v2330_v28, %v2180_v0  ;;  %v2329_v19 = vadd.f32 1.0, %v3421_v50  ;;  %3436 = verf.f32 %v2236_v45  ;;  %v5361_v13 = vadd.f32 %v5178_v20, %v2079_v26 }
 0x4ac   :  { %v3423_v60 = vpop.eup %3422  ;;  %v1963_v4 = vadd.f32 1e-05, %v1938_v54  ;;  %3438 = verf.f32 %v2235_v59  ;;  %v2238_v56 = vmul.f32 0.70710677, %v5355_v29  ;;  %v2031_v2 = vmul.f32 %v3419_v27, %v5172_v61 }
 0x4ad   :  { %2556 = vmatprep.mubr.f32.mxu1 %v2380_v9  ;;  %v2379_v21 = vmul.f32 %v2329_v19, %v2179_v22  ;;  %v2332_v10 = vadd.f32 1.0, %v3423_v60  ;;  %v3425_v12 = vpop.eup %3424  ;;  %v2237_v47 = vmul.f32 0.70710677, %v5361_v13  ;;  %v2082_v40 = vmul.f32 %v2032_v62, %v5062_v37 }
 0x4ae   :  { %3440 = vrsqrt.f32 %v1963_v4  ;;  %v1904_v30 = vpop.xlane.xlu0 %1903  ;;  %v2331_v17 = vadd.f32 1.0, %v3425_v12  ;;  %v2081_v3 = vmul.f32 %v2031_v2, %v5059_v55  ;;  %v2184_v35 = vmul.f32 0.5, %v5328_v7 }
 0x4af   :  { %v3427_v8 = vpop.eup %3426  ;;  %v1939_v14 = vmul.f32 0.00390625, %v1904_v30  ;;  %2557 = vmatmul.mubr.f32.gmra.mxu1 %v2379_v21  ;;  %v2382_v52 = vmul.f32 %v2332_v10, %v2182_v44  ;;  %3442 = verf.f32 %v2238_v56  ;;  %v5372_v6 = vadd.f32 %v5181_v49, %v2082_v40 }
 0x4b0   :  { %v2381_v1 = vmul.f32 %v2331_v17, %v2181_v57  ;;  %v2034_v18 = vmul.f32 %v3427_v8, %v5175_v34  ;;  %3444 = verf.f32 %v2237_v47  ;;  %v5375_v46 = vadd.f32 %v5178_v20, %v2081_v3 }
 0x4b1   :  { %v1964_v33 = vadd.f32 1e-05, %v1939_v14  ;;  %2561 = vmatprep.mubr.f32.mxu1 %v2382_v52  ;;  %v2033_v37 = vmul.f32 %v3427_v8, %v5172_v61  ;;  %v2183_v32 = vmul.f32 0.5, %v5331_v31  ;;  %v2240_v0 = vmul.f32 0.70710677, %v5372_v6 }
 0x4b2   :  { %v3429_v41 = vpop.eup %3428  ;;  %v1907_v38 = vpop.xlane.xlu1 %1906  ;;  %v2084_v7 = vmul.f32 %v2034_v18, %v5073_v48  ;;  %v2239_v28 = vmul.f32 0.70710677, %v5375_v46  ;;  %v2186_v4 = vmul.f32 0.5, %v5343_v43  ;;  %v2185_v43 = vmul.f32 0.5, %v5346_v53 }
 0x4b3   :  { %v3431_v51 = vpop.eup %3430  ;;  %3446 = vrsqrt.f32 %v1964_v33  ;;  %v1940_v55 = vmul.f32 0.00390625, %v1907_v38  ;;  %2562 = vmatmul.mubr.f32.gmra.mxu1 %v2381_v1  ;;  %v2334_v23 = vadd.f32 1.0, %v3429_v41  ;;  %v2083_v9 = vmul.f32 %v2033_v37, %v5070_v15 }
 0x4b4   :  { %v3433_v27 = vpop.eup %3432  ;;  %v5383_v54 = vadd.f32 %v5181_v49, %v2084_v7  ;;  %3448 = verf.f32 %v2240_v0  ;;  %v2036_v19 = vmul.f32 %v3431_v51, %v5175_v34  ;;  %v2035_v48 = vmul.f32 %v3431_v51, %v5172_v61 }
 0x4b5   :  { %v1965_v22 = vadd.f32 1e-05, %v1940_v55  ;;  %v2384_v45 = vmul.f32 %v2334_v23, %v2184_v35  ;;  %v2333_v50 = vadd.f32 1.0, %v3433_v27  ;;  %v5391_v21 = vadd.f32 %v5178_v20, %v2083_v9 }
 0x4b6   :  { %v1910_v59 = vpop.xlane.xlu0 %1909  ;;  %v2242_v56 = vmul.f32 0.70710677, %v5383_v54  ;;  %v2086_v15 = vmul.f32 %v2036_v19, %v5083_v24  ;;  %v2085_v30 = vmul.f32 %v2035_v48, %v5080_v42  ;;  %v2188_v1 = vmul.f32 0.5, %v5355_v29 }
 0x4b7   :  { %v3435_v26 = vpop.eup %3434  ;;  %3450 = vrsqrt.f32 %v1965_v22  ;;  %v1941_v31 = vmul.f32 0.00390625, %v1910_v59  ;;  %2566 = vmatprep.mubr.f32.mxu1 %v2384_v45  ;;  %v2383_v60 = vmul.f32 %v2333_v50, %v2183_v32  ;;  %v2241_v14 = vmul.f32 0.70710677, %v5391_v21 }
 0x4b8   :  { %v3437_v44 = vpop.eup %3436  ;;  %3452 = verf.f32 %v2239_v28  ;;  %v2038_v57 = vmul.f32 %v3435_v26, %v5175_v34  ;;  %v5399_v24 = vadd.f32 %v5181_v49, %v2086_v15  ;;  %v5402_v42 = vadd.f32 %v5178_v20, %v2085_v30 }
 0x4b9   :  { %v3439_v10 = vpop.eup %3438  ;;  %v1966_v62 = vadd.f32 1e-05, %v1941_v31  ;;  %2567 = vmatmul.mubr.f32.gmra.mxu1 %v2383_v60  ;;  %v2336_v12 = vadd.f32 1.0, %v3437_v44  ;;  %3454 = verf.f32 %v2242_v56  ;;  %v2187_v38 = vmul.f32 0.5, %v5361_v13 }
 0x4ba   :  { %v1913_v2 = vpop.xlane.xlu1 %1912  ;;  %v2335_v8 = vadd.f32 1.0, %v3439_v10  ;;  %v2088_v33 = vmul.f32 %v2038_v57, %v5093_v63  ;;  %v2244_v18 = vmul.f32 0.70710677, %v5399_v24  ;;  %v2243_v37 = vmul.f32 0.70710677, %v5402_v42 }
 0x4bb   :  { %v3441_v52 = vpop.eup %3440  ;;  %3456 = vrsqrt.f32 %v1966_v62  ;;  %v1942_v17 = vmul.f32 0.00390625, %v1913_v2  ;;  %v2386_v47 = vmul.f32 %v2336_v12, %v2186_v4  ;;  %v2037_v55 = vmul.f32 %v3435_v26, %v5172_v61 }
 0x4bc   :  { %v3443_v40 = vpop.eup %3442  ;;  %v2385_v3 = vmul.f32 %v2335_v8, %v2185_v43  ;;  %3458 = verf.f32 %v2241_v14  ;;  %v5410_v51 = vadd.f32 %v5181_v49, %v2088_v33  ;;  %v2040_v29 = vmul.f32 %v3441_v52, %v5175_v34 }
 0x4bd   :  { %v1967_v53 = vadd.f32 1e-05, %v1942_v17  ;;  %2571 = vmatprep.mubr.f32.mxu1 %v2386_v47  ;;  %v2338_v35 = vadd.f32 1.0, %v3443_v40  ;;  %v3445_v23 = vpop.eup %3444  ;;  %v2190_v0 = vmul.f32 0.5, %v5372_v6  ;;  %v2087_v22 = vmul.f32 %v2037_v55, %v5090_v36 }
 0x4be   :  { %v1916_v41 = vpop.xlane.xlu0 %1915  ;;  %2572 = vmatmul.mubr.f32.gmra.mxu1 %v2385_v3  ;;  %v2337_v32 = vadd.f32 1.0, %v3445_v23  ;;  %v2246_v13 = vmul.f32 0.70710677, %v5410_v51  ;;  %v2090_v45 = vmul.f32 %v2040_v29, %v5103_v58  ;;  %v2039_v9 = vmul.f32 %v3441_v52, %v5172_v61 }
 0x4bf   :  { %3460 = vrsqrt.f32 %v1967_v53  ;;  %v1943_v63 = vmul.f32 0.00390625, %v1916_v41  ;;  %v2388_v7 = vmul.f32 %v2338_v35, %v2188_v1  ;;  %v5421_v26 = vadd.f32 %v5178_v20, %v2087_v22 }
 0x4c0   :  { %v3447_v27 = vpop.eup %3446  ;;  %3462 = verf.f32 %v2244_v18  ;;  %v2387_v59 = vmul.f32 %v2337_v32, %v2187_v38  ;;  %v5424_v31 = vadd.f32 %v5181_v49, %v2090_v45  ;;  %v2089_v58 = vmul.f32 %v2039_v9, %v5100_v11 }
 0x4c1   :  { %v1968_v28 = vadd.f32 1e-05, %v1943_v63  ;;  %2576 = vmatprep.mubr.f32.mxu1 %v2388_v7  ;;  %3464 = verf.f32 %v2243_v37  ;;  %v2042_v19 = vmul.f32 %v3447_v27, %v5175_v34  ;;  %v3449_v48 = vpop.eup %3448  ;;  %v2041_v44 = vmul.f32 %v3447_v27, %v5172_v61  ;;  %v6004_v7 = vld [vmem:[#allocation46_spill] sm:$0xff]  ;;  %v6005_v27 = vld [vmem:[#allocation47_spill] sm:$0xff] }
 0x4c2   :  { %v1919_v50 = vpop.xlane.xlu1 %1918  ;;  %3466 = verf.f32 %v2246_v13  ;;  %2577 = vmatmul.mubr.f32.gmra.mxu1 %v2387_v59  ;;  %v2340_v36 = vadd.f32 1.0, %v3449_v48  ;;  %v2189_v10 = vmul.f32 0.5, %v5375_v46  ;;  %v2192_v62 = vmul.f32 0.5, %v5383_v54 }
 0x4c3   :  { %3468 = vrsqrt.f32 %v1968_v28  ;;  %v1944_v6 = vmul.f32 0.00390625, %v1919_v50  ;;  %v2092_v4 = vmul.f32 %v2042_v19, %v5113_v5  ;;  %v2245_v12 = vmul.f32 0.70710677, %v5421_v26 }
 0x4c4   :  { %v3451_v60 = vpop.eup %3450  ;;  %v2390_v30 = vmul.f32 %v2340_v36, %v2190_v0  ;;  %v2248_v2 = vmul.f32 0.70710677, %v5424_v31  ;;  %v5434_v43 = vadd.f32 %v5178_v20, %v2089_v58  ;;  %v2091_v8 = vmul.f32 %v2041_v44, %v5110_v39 }
 0x4c5   :  { %v3453_v56 = vpop.eup %3452  ;;  %v1969_v15 = vadd.f32 1e-05, %v1944_v6  ;;  %v5437_v5 = vadd.f32 %v5181_v49, %v2092_v4  ;;  %v2044_v46 = vmul.f32 %v3451_v60, %v5175_v34  ;;  %v2191_v17 = vmul.f32 0.5, %v5391_v21 }
 0x4c6   :  { %v2339_v57 = vadd.f32 1.0, %v3453_v56  ;;  %v3455_v11 = vpop.eup %3454  ;;  %2581 = vmatprep.mubr.f32.mxu1 %v2390_v30  ;;  %v2194_v40 = vmul.f32 0.5, %v5399_v24  ;;  %v2247_v3 = vmul.f32 0.70710677, %v5434_v43  ;;  %v5446_v1 = vadd.f32 %v5178_v20, %v2091_v8  ;;  %v6006_v56 = vld [vmem:[#allocation48_spill] sm:$0xff] }
 0x4c7   :  { %3470 = vrsqrt.f32 %v1969_v15  ;;  %v2342_v52 = vadd.f32 1.0, %v3455_v11  ;;  %v2250_v33 = vmul.f32 0.70710677, %v5437_v5  ;;  %v2094_v35 = vmul.f32 %v2044_v46, %v5123_v25 }
 0x4c8   :  { %v3457_v14 = vpop.eup %3456  ;;  %v2389_v54 = vmul.f32 %v2339_v57, %v2189_v10  ;;  %3472 = verf.f32 %v2245_v12  ;;  %v2043_v21 = vmul.f32 %v3451_v60, %v5172_v61  ;;  %v2193_v37 = vmul.f32 0.5, %v5402_v42  ;;  %v6007_v10 = vld [vmem:[#allocation49_spill] sm:$0xff] }
 0x4c9   :  { %v3459_v47 = vpop.eup %3458  ;;  %3474 = verf.f32 %v2248_v2  ;;  %v2392_v53 = vmul.f32 %v2342_v52, %v2192_v62  ;;  %v2046_v18 = vmul.f32 %v3457_v14, %v5175_v34  ;;  %v2045_v24 = vmul.f32 %v3457_v14, %v5172_v61 }
 0x4ca   :  { %2582 = vmatmul.mubr.f32.gmra.mxu1 %v2389_v54  ;;  %v2341_v39 = vadd.f32 1.0, %v3459_v47  ;;  %3476 = verf.f32 %v2247_v3  ;;  %v2249_v55 = vmul.f32 0.70710677, %v5446_v1  ;;  %v5455_v63 = vadd.f32 %v5181_v49, %v2094_v35 }
 0x4cb   :  { %2586 = vmatprep.mubr.f32.mxu1 %v2392_v53  ;;  %3478 = verf.f32 %v2250_v33  ;;  %v2093_v25 = vmul.f32 %v2043_v21, %v5120_v16  ;;  %v2096_v29 = vmul.f32 %v2046_v18, %v6004_v7  ;;  %v2095_v32 = vmul.f32 %v2045_v24, %v6005_v27 }
 0x4cc   :  { %v3461_v41 = vpop.eup %3460  ;;  %v2391_v38 = vmul.f32 %v2341_v39, %v2191_v17  ;;  %v2196_v28 = vmul.f32 0.5, %v5410_v51  ;;  %3480 = verf.f32 %v2249_v55  ;;  %v2252_v50 = vmul.f32 0.70710677, %v5455_v63  ;;  %v6010_v55 = vld [vmem:[#allocation52_spill] sm:$0xff] }
 0x4cd   :  { %v3463_v23 = vpop.eup %3462  ;;  %v2048_v42 = vmul.f32 %v3461_v41, %v5175_v34  ;;  %v5464_v59 = vadd.f32 %v5178_v20, %v2093_v25  ;;  %v2047_v16 = vmul.f32 %v3461_v41, %v5172_v61  ;;  %v5468_v6 = vadd.f32 %v5181_v49, %v2096_v29 }
 0x4ce   :  { %v3465_v0 = vpop.eup %3464  ;;  %2587 = vmatmul.mubr.f32.gmra.mxu1 %v2391_v38  ;;  %v2344_v13 = vadd.f32 1.0, %v3463_v23  ;;  %v5471_v51 = vadd.f32 %v5178_v20, %v2095_v32  ;;  %3482 = verf.f32 %v2252_v50  ;;  %v2195_v30 = vmul.f32 0.5, %v5421_v26  ;;  %v6008_v26 = vld [vmem:[#allocation50_spill] sm:$0xff] }
 0x4cf   :  { %v3467_v22 = vpop.eup %3466  ;;  %v2343_v45 = vadd.f32 1.0, %v3465_v0  ;;  %v2251_v36 = vmul.f32 0.70710677, %v5464_v59  ;;  %v2254_v4 = vmul.f32 0.70710677, %v5468_v6  ;;  %v2098_v15 = vmul.f32 %v2048_v42, %v6006_v56  ;;  %v6011_v42 = vld [vmem:[#allocation53_spill] sm:$0xff] }
 0x4d0   :  { %v3469_v9 = vpop.eup %3468  ;;  %v2394_v19 = vmul.f32 %v2344_v13, %v2194_v40  ;;  %v2346_v48 = vadd.f32 1.0, %v3467_v22  ;;  %v2253_v44 = vmul.f32 0.70710677, %v5471_v51  ;;  %v2097_v62 = vmul.f32 %v2047_v16, %v6007_v10  ;;  %v6009_v40 = vld [vmem:[#allocation51_spill] sm:$0xff] }
 0x4d1   :  { %v2393_v60 = vmul.f32 %v2343_v45, %v2193_v37  ;;  %3484 = verf.f32 %v2251_v36  ;;  %v2050_v57 = vmul.f32 %v3469_v9, %v5175_v34  ;;  %v2049_v2 = vmul.f32 %v3469_v9, %v5172_v61 }
 0x4d2   :  { %2591 = vmatprep.mubr.f32.mxu1 %v2394_v19  ;;  %v2396_v58 = vmul.f32 %v2346_v48, %v2196_v28  ;;  %3486 = verf.f32 %v2254_v4  ;;  %v5482_v8 = vadd.f32 %v5181_v49, %v2098_v15  ;;  %v5485_v46 = vadd.f32 %v5178_v20, %v2097_v62 }
 0x4d3   :  { %2592 = vmatmul.mubr.f32.gmra.mxu1 %v2393_v60  ;;  %3488 = verf.f32 %v2253_v44  ;;  %v2198_v17 = vmul.f32 0.5, %v5424_v31  ;;  %v2100_v47 = vmul.f32 %v2050_v57, %v6008_v26  ;;  %v2099_v3 = vmul.f32 %v2049_v2, %v6009_v40 }
 0x4d4   :  { %v3471_v12 = vpop.eup %3470  ;;  %2596 = vmatprep.mubr.f32.mxu1 %v2396_v58  ;;  %v2197_v53 = vmul.f32 0.5, %v5434_v43  ;;  %v2256_v39 = vmul.f32 0.70710677, %v5482_v8  ;;  %v2255_v24 = vmul.f32 0.70710677, %v5485_v46  ;;  %v2200_v43 = vmul.f32 0.5, %v5437_v5 }
 0x4d5   :  { %v3473_v11 = vpop.eup %3472  ;;  %v2052_v14 = vmul.f32 %v3471_v12, %v5175_v34  ;;  %v2051_v35 = vmul.f32 %v3471_v12, %v5172_v61  ;;  %v2158_v34 = vadd.f32 %v5181_v49, %v2100_v47  ;;  %v5497_v41 = vadd.f32 %v5178_v20, %v2099_v3 }
 0x4d6   :  { %v3475_v54 = vpop.eup %3474  ;;  %v2345_v52 = vadd.f32 1.0, %v3473_v11  ;;  %3490 = verf.f32 %v2256_v39  ;;  %v2199_v27 = vmul.f32 0.5, %v5446_v1  ;;  %v2202_v9 = vmul.f32 0.5, %v5455_v63 }
 0x4d7   :  { %v2348_v33 = vadd.f32 1.0, %v3475_v54  ;;  %v3477_v21 = vpop.eup %3476  ;;  %v2102_v23 = vmul.f32 %v2052_v14, %v6010_v55  ;;  %3492 = verf.f32 %v2255_v24  ;;  %v2258_v61 = vmul.f32 0.70710677, %v2158_v34  ;;  %v5516_v24 = vld [vmem:[%s5898_s6] sm:$0x7] }
 0x4d8   :  { %v2395_v18 = vmul.f32 %v2345_v52, %v2195_v30  ;;  %v3479_v31 = vpop.eup %3478  ;;  %v2347_v37 = vadd.f32 1.0, %v3477_v21  ;;  %v2257_v32 = vmul.f32 0.70710677, %v5497_v41  ;;  %v2101_v22 = vmul.f32 %v2051_v35, %v6011_v42 }
 0x4d9   :  { %v2398_v38 = vmul.f32 %v2348_v33, %v2198_v17  ;;  %v2350_v25 = vadd.f32 1.0, %v3479_v31  ;;  %v3481_v7 = vpop.eup %3480  ;;  %v2160_v0 = vadd.f32 %v5181_v49, %v2102_v23  ;;  %3494 = verf.f32 %v2258_v61 }
 0x4da   :  { %2597 = vmatmul.mubr.f32.gmra.mxu1 %v2395_v18  ;;  %v2397_v29 = vmul.f32 %v2347_v37, %v2197_v53  ;;  %v2349_v28 = vadd.f32 1.0, %v3481_v7  ;;  %3496 = verf.f32 %v2257_v32  ;;  %v2159_v16 = vadd.f32 %v5178_v20, %v2101_v22 }
 0x4db   :  { %2601 = vmatprep.mubr.f32.mxu1 %v2398_v38  ;;  %v2400_v13 = vmul.f32 %v2350_v25, %v2200_v43  ;;  %v2260_v45 = vmul.f32 0.70710677, %v2160_v0  ;;  %v3483_v5 = vpop.eup %3482  ;;  %v2201_v36 = vmul.f32 0.5, %v5464_v59  ;;  %v2204_v44 = vmul.f32 0.5, %v5468_v6 }
 0x4dc   :  { %v2399_v50 = vmul.f32 %v2349_v28, %v2199_v27  ;;  %v2352_v1 = vadd.f32 1.0, %v3483_v5  ;;  %v2259_v48 = vmul.f32 0.70710677, %v2159_v16  ;;  %v2203_v63 = vmul.f32 0.5, %v5471_v51 }
 0x4dd   :  { %3498 = verf.f32 %v2260_v45  ;;  %v2206_v59 = vmul.f32 0.5, %v5482_v8  ;;  %v2205_v2 = vmul.f32 0.5, %v5485_v46  ;;  %v2208_v17 = vmul.f32 0.5, %v2158_v34  ;;  %v6012_v34 = vld [vmem:[#allocation56_spill] sm:$0xff] }
 0x4de   :  { %2602 = vmatmul.mubr.f32.gmra.mxu1 %v2397_v29  ;;  %v3485_v19 = vpop.eup %3484  ;;  %v2402_v60 = vmul.f32 %v2352_v1, %v2202_v9  ;;  %3500 = verf.f32 %v2259_v48  ;;  %v2207_v3 = vmul.f32 0.5, %v5497_v41  ;;  %v2210_v33 = vmul.f32 0.5, %v2160_v0 }
 0x4df   :  { %2606 = vmatprep.mubr.f32.mxu1 %v2400_v13  ;;  %v3487_v49 = vpop.eup %3486  ;;  %v2351_v58 = vadd.f32 1.0, %v3485_v19  ;;  %v2209_v35 = vmul.f32 0.5, %v2159_v16  ;;  %v5520_v41 = vrot.slane %v5516_v24, %v6012_v34 }
 0x4e0   :  { %v3489_v4 = vpop.eup %3488  ;;  %v2354_v56 = vadd.f32 1.0, %v3487_v49 }
 0x4e1   :  { %v2401_v20 = vmul.f32 %v2351_v58, %v2201_v36  ;;  %v2353_v15 = vadd.f32 1.0, %v3489_v4 }
 0x4e2   :  { %2607 = vmatmul.mubr.f32.gmra.mxu1 %v2399_v50  ;;  %v2404_v10 = vmul.f32 %v2354_v56, %v2204_v44 }
 0x4e3   :  { %2611 = vmatprep.mubr.f32.mxu1 %v2402_v60  ;;  %v3491_v62 = vpop.eup %3490  ;;  %v2403_v12 = vmul.f32 %v2353_v15, %v2203_v63 }
 0x4e4   :  { %v3493_v30 = vpop.eup %3492  ;;  %v2356_v57 = vadd.f32 1.0, %v3491_v62 }
 0x4e5   :  { %v2355_v11 = vadd.f32 1.0, %v3493_v30 }
 0x4e6   :  { %2612 = vmatmul.mubr.f32.gmra.mxu1 %v2401_v20  ;;  %v3495_v6 = vpop.eup %3494  ;;  %v2406_v14 = vmul.f32 %v2356_v57, %v2206_v59 }
 0x4e7   :  { %2616 = vmatprep.mubr.f32.mxu1 %v2404_v10  ;;  %v3497_v54 = vpop.eup %3496  ;;  %v2405_v52 = vmul.f32 %v2355_v11, %v2205_v2  ;;  %v2358_v26 = vadd.f32 1.0, %v3495_v6 }
 0x4e8   :  { %v2357_v51 = vadd.f32 1.0, %v3497_v54 }
 0x4e9   :  { %v2408_v40 = vmul.f32 %v2358_v26, %v2208_v17 }
 0x4ea   :  { %2617 = vmatmul.mubr.f32.gmra.mxu1 %v2403_v12  ;;  %v3499_v47 = vpop.eup %3498  ;;  %v2407_v8 = vmul.f32 %v2357_v51, %v2207_v3 }
 0x4eb   :  { %2621 = vmatprep.mubr.f32.mxu1 %v2406_v14  ;;  %v2360_v53 = vadd.f32 1.0, %v3499_v47  ;;  %v3501_v39 = vpop.eup %3500 }
 0x4ec   :  { %v2359_v21 = vadd.f32 1.0, %v3501_v39 }
 0x4ed   :  { %v2410_v46 = vmul.f32 %v2360_v53, %v2210_v33 }
 0x4ee   :  { %2622 = vmatmul.mubr.f32.gmra.mxu1 %v2405_v52  ;;  %v2409_v18 = vmul.f32 %v2359_v21, %v2209_v35 }
 0x4ef   :  { %2626 = vmatprep.mubr.f32.mxu1 %v2408_v40 }
 0x4f2   :  { %2627 = vmatmul.mubr.f32.gmra.mxu1 %v2407_v8 }
 0x4f3   :  { %2631 = vmatprep.mubr.f32.mxu1 %v2410_v46 }
 0x4f6   :  { %2632 = vmatmul.mubr.f32.gmra.mxu1 %v2409_v18 }
 0x543   :  { %v2513_v31 = vpop.f32.mrf.mxu1 }
 0x544   :  { %v5523_v38 = vadd.f32 %v2513_v31, %v5520_v41 }
 0x545   :  { %v2515_v37 = vpop.f32.mrf.mxu1 }
 0x546   :  { %2637 = vadd.xlane.f32.xlu0 %v5523_v38 }
 0x549   :  { %v2518_v55 = vpop.f32.mrf.mxu1 }
 0x54a   :  { %v5527_v23 = vadd.f32 %v2518_v55, %v5520_v41 }
 0x54b   :  { %v2520_v43 = vpop.f32.mrf.mxu1 }
 0x54c   :  { %2639 = vadd.xlane.f32.xlu1 %v5527_v23 }
 0x54d   :  { %v2523_v25 = vpop.f32.mrf.mxu1 }
 0x54e   :  { %v5531_v61 = vadd.f32 %v2523_v25, %v5520_v41 }
 0x54f   :  { %v2525_v7 = vpop.f32.mrf.mxu1 }
 0x550   :  { %2641 = vadd.xlane.f32.xlu0 %v5531_v61 }
 0x551   :  { %v2528_v29 = vpop.f32.mrf.mxu1 }
 0x552   :  { %v5535_v27 = vadd.f32 %v2528_v29, %v5520_v41 }
 0x553   :  { %v2530_v32 = vpop.f32.mrf.mxu1 }
 0x554   :  { %2643 = vadd.xlane.f32.xlu1 %v5535_v27 }
 0x555   :  { %v2533_v0 = vpop.f32.mrf.mxu1 }
 0x556   :  { %v5539_v13 = vadd.f32 %v2533_v0, %v5520_v41 }
 0x557   :  { %v2535_v28 = vpop.f32.mrf.mxu1 }
 0x558   :  { %2645 = vadd.xlane.f32.xlu0 %v5539_v13 }
 0x55b   :  { %v2538_v42 = vpop.f32.mrf.mxu1 }
 0x55c   :  { %v5543_v22 = vadd.f32 %v2538_v42, %v5520_v41 }
 0x55d   :  { %v2540_v45 = vpop.f32.mrf.mxu1 }
 0x55e   :  { %2647 = vadd.xlane.f32.xlu1 %v5543_v22 }
 0x55f   :  { %v2543_v5 = vpop.f32.mrf.mxu1 }
 0x560   :  { %v5547_v50 = vadd.f32 %v2543_v5, %v5520_v41 }
 0x561   :  { %v2545_v16 = vpop.f32.mrf.mxu1 }
 0x562   :  { %2649 = vadd.xlane.f32.xlu0 %v5547_v50 }
 0x567   :  { %v2548_v9 = vpop.f32.mrf.mxu1 }
 0x568   :  { %v5551_v1 = vadd.f32 %v2548_v9, %v5520_v41 }
 0x569   :  { %v2550_v19 = vpop.f32.mrf.mxu1 }
 0x56a   :  { %2651 = vadd.xlane.f32.xlu1 %v5551_v1 }
 0x56b   :  { %v2553_v48 = vpop.f32.mrf.mxu1 }
 0x56c   :  { %v5555_v49 = vadd.f32 %v2553_v48, %v5520_v41 }
 0x56d   :  { %v2555_v60 = vpop.f32.mrf.mxu1 }
 0x56e   :  { %2653 = vadd.xlane.f32.xlu0 %v5555_v49 }
 0x56f   :  { %v2558_v36 = vpop.f32.mrf.mxu1 }
 0x570   :  { %v5559_v58 = vadd.f32 %v2558_v36, %v5520_v41 }
 0x571   :  { %v2560_v4 = vpop.f32.mrf.mxu1 }
 0x572   :  { %2655 = vadd.xlane.f32.xlu1 %v5559_v58 }
 0x573   :  { %v2563_v44 = vpop.f32.mrf.mxu1 }
 0x574   :  { %v5563_v56 = vadd.f32 %v2563_v44, %v5520_v41 }
 0x575   :  { %v2565_v20 = vpop.f32.mrf.mxu1 }
 0x576   :  { %2657 = vadd.xlane.f32.xlu0 %v5563_v56 }
 0x579   :  { %v2568_v15 = vpop.f32.mrf.mxu1 }
 0x57a   :  { %v5567_v10 = vadd.f32 %v2568_v15, %v5520_v41 }
 0x57b   :  { %v2570_v63 = vpop.f32.mrf.mxu1 }
 0x57c   :  { %2659 = vadd.xlane.f32.xlu1 %v5567_v10 }
 0x57e   :  { %v2573_v62 = vpop.f32.mrf.mxu1 }
 0x57f   :  { %v5571_v12 = vadd.f32 %v2573_v62, %v5520_v41 }
 0x580   :  { %v2575_v30 = vpop.f32.mrf.mxu1 }
 0x581   :  { %2661 = vadd.xlane.f32.xlu0 %v5571_v12 }
 0x582   :  { %v2578_v59 = vpop.f32.mrf.mxu1 }
 0x583   :  { %v5575_v57 = vadd.f32 %v2578_v59, %v5520_v41 }
 0x584   :  { %v2580_v2 = vpop.f32.mrf.mxu1 }
 0x585   :  { %2663 = vadd.xlane.f32.xlu1 %v5575_v57 }
 0x58a   :  { %v2583_v11 = vpop.f32.mrf.mxu1 }
 0x58b   :  { %v5579_v6 = vadd.f32 %v2583_v11, %v5520_v41 }
 0x58c   :  { %v2585_v14 = vpop.f32.mrf.mxu1 }
 0x58d   :  { %2665 = vadd.xlane.f32.xlu0 %v5579_v6 }
 0x58e   :  { %v2588_v54 = vpop.f32.mrf.mxu1 }
 0x58f   :  { %v5583_v52 = vadd.f32 %v2588_v54, %v5520_v41 }
 0x590   :  { %v2590_v17 = vpop.f32.mrf.mxu1 }
 0x591   :  { %2667 = vadd.xlane.f32.xlu1 %v5583_v52 }
 0x593   :  { %v2593_v26 = vpop.f32.mrf.mxu1 }
 0x594   :  { %v5587_v51 = vadd.f32 %v2593_v26, %v5520_v41 }
 0x595   :  { %v2595_v47 = vpop.f32.mrf.mxu1 }
 0x596   :  { %2669 = vadd.xlane.f32.xlu0 %v5587_v51 }
 0x59a   :  { %v2598_v40 = vpop.f32.mrf.mxu1 }
 0x59b   :  { %v5591_v3 = vadd.f32 %v2598_v40, %v5520_v41 }
 0x59c   :  { %v2600_v33 = vpop.f32.mrf.mxu1 }
 0x59d   :  { %2671 = vadd.xlane.f32.xlu1 %v5591_v3 }
 0x59e   :  { %v2603_v53 = vpop.f32.mrf.mxu1 }
 0x59f   :  { %v5595_v8 = vadd.f32 %v2603_v53, %v5520_v41 }
 0x5a0   :  { %v2605_v39 = vpop.f32.mrf.mxu1 }
 0x5a1   :  { %2673 = vadd.xlane.f32.xlu0 %v5595_v8 }
 0x5a2   :  { %v2608_v46 = vpop.f32.mrf.mxu1 }
 0x5a3   :  { %v5599_v35 = vadd.f32 %v2608_v46, %v5520_v41 }
 0x5a4   :  { %v2610_v21 = vpop.f32.mrf.mxu1 }
 0x5a5   :  { %2675 = vadd.xlane.f32.xlu1 %v5599_v35 }
 0x5a6   :  { %v2613_v18 = vpop.f32.mrf.mxu1 }
 0x5a7   :  { %v5603_v31 = vadd.f32 %v2613_v18, %v5520_v41 }
 0x5a8   :  { %v2615_v37 = vpop.f32.mrf.mxu1 }
 0x5a9   :  { %2677 = vadd.xlane.f32.xlu0 %v5603_v31 }
 0x5aa   :  { %v2618_v55 = vpop.f32.mrf.mxu1 }
 0x5ab   :  { %v5607_v43 = vadd.f32 %v2618_v55, %v5520_v41 }
 0x5ac   :  { %v2620_v25 = vpop.f32.mrf.mxu1 }
 0x5ad   :  { %2679 = vadd.xlane.f32.xlu1 %v5607_v43 }
 0x5ae   :  { %v2623_v7 = vpop.f32.mrf.mxu1 }
 0x5af   :  { %v5611_v29 = vadd.f32 %v2623_v7, %v5520_v41 }
 0x5b0   :  { %v2625_v32 = vpop.f32.mrf.mxu1 }
 0x5b1   :  { %2681 = vadd.xlane.f32.xlu0 %v5611_v29 }
 0x5b2   :  { %v2628_v0 = vpop.f32.mrf.mxu1 }
 0x5b3   :  { %v5615_v28 = vadd.f32 %v2628_v0, %v5520_v41 }
 0x5b4   :  { %v2630_v42 = vpop.f32.mrf.mxu1 }
 0x5b5   :  { %2683 = vadd.xlane.f32.xlu1 %v5615_v28 }
 0x5b6   :  { %v2633_v45 = vpop.f32.mrf.mxu1 }
 0x5b7   :  { %v5619_v5 = vadd.f32 %v2633_v45, %v5520_v41 }
 0x5b8   :  { %v2635_v16 = vpop.f32.mrf.mxu1 }
 0x5b9   :  { %2685 = vadd.xlane.f32.xlu0 %v5619_v5 }
 0x5cf   :  { %v2638_v9 = vpop.xlane.xlu0 %2637 }
 0x5d0   :  { %v2688_v19 = vmul.f32 0.0078125, %v2638_v9 }
 0x5d2   :  { %v5623_v48 = vsub.f32 %v5523_v38, %v2688_v19 }
 0x5d4   :  { %v2738_v60 = vmul.f32 %v5623_v48, %v5623_v48 }
 0x5d5   :  { %v2640_v36 = vpop.xlane.xlu1 %2639 }
 0x5d6   :  { %v2689_v4 = vmul.f32 0.0078125, %v2640_v36  ;;  %2763 = vadd.xlane.f32.xlu1 %v2738_v60 }
 0x5d8   :  { %v5628_v44 = vsub.f32 %v5527_v23, %v2689_v4 }
 0x5d9   :  { %v2642_v20 = vpop.xlane.xlu0 %2641 }
 0x5da   :  { %v2690_v41 = vmul.f32 0.0078125, %v2642_v20  ;;  %v2739_v15 = vmul.f32 %v5628_v44, %v5628_v44 }
 0x5dc   :  { %v5633_v63 = vsub.f32 %v5531_v61, %v2690_v41  ;;  %2765 = vadd.xlane.f32.xlu0 %v2739_v15 }
 0x5dd   :  { %v2644_v38 = vpop.xlane.xlu1 %2643 }
 0x5de   :  { %v2691_v62 = vmul.f32 0.0078125, %v2644_v38  ;;  %v2740_v30 = vmul.f32 %v5633_v63, %v5633_v63 }
 0x5e0   :  { %v5638_v59 = vsub.f32 %v5535_v27, %v2691_v62  ;;  %2767 = vadd.xlane.f32.xlu1 %v2740_v30 }
 0x5e1   :  { %v2646_v23 = vpop.xlane.xlu0 %2645 }
 0x5e2   :  { %v2692_v2 = vmul.f32 0.0078125, %v2646_v23  ;;  %v2741_v11 = vmul.f32 %v5638_v59, %v5638_v59 }
 0x5e4   :  { %v5643_v14 = vsub.f32 %v5539_v13, %v2692_v2  ;;  %2769 = vadd.xlane.f32.xlu0 %v2741_v11 }
 0x5e6   :  { %v2742_v61 = vmul.f32 %v5643_v14, %v5643_v14 }
 0x5e7   :  { %v2648_v54 = vpop.xlane.xlu1 %2647 }
 0x5e8   :  { %2771 = vadd.xlane.f32.xlu1 %v2742_v61  ;;  %v2693_v17 = vmul.f32 0.0078125, %v2648_v54 }
 0x5ea   :  { %v5648_v26 = vsub.f32 %v5543_v22, %v2693_v17 }
 0x5eb   :  { %v2650_v27 = vpop.xlane.xlu0 %2649 }
 0x5ec   :  { %v2694_v47 = vmul.f32 0.0078125, %v2650_v27  ;;  %v2743_v40 = vmul.f32 %v5648_v26, %v5648_v26 }
 0x5ee   :  { %v5653_v33 = vsub.f32 %v5547_v50, %v2694_v47  ;;  %2773 = vadd.xlane.f32.xlu0 %v2743_v40 }
 0x5f0   :  { %v2744_v13 = vmul.f32 %v5653_v33, %v5653_v33 }
 0x5f2   :  { %2775 = vadd.xlane.f32.xlu1 %v2744_v13 }
 0x5f3   :  { %v2652_v53 = vpop.xlane.xlu1 %2651 }
 0x5f4   :  { %v2695_v39 = vmul.f32 0.0078125, %v2652_v53 }
 0x5f6   :  { %v5658_v46 = vsub.f32 %v5551_v1, %v2695_v39 }
 0x5f7   :  { %v2654_v22 = vpop.xlane.xlu0 %2653 }
 0x5f8   :  { %v2696_v21 = vmul.f32 0.0078125, %v2654_v22  ;;  %v2745_v18 = vmul.f32 %v5658_v46, %v5658_v46 }
 0x5fa   :  { %v5663_v37 = vsub.f32 %v5555_v49, %v2696_v21  ;;  %2777 = vadd.xlane.f32.xlu0 %v2745_v18 }
 0x5fb   :  { %v2656_v50 = vpop.xlane.xlu1 %2655 }
 0x5fc   :  { %v2746_v55 = vmul.f32 %v5663_v37, %v5663_v37  ;;  %v2697_v25 = vmul.f32 0.0078125, %v2656_v50 }
 0x5fe   :  { %2779 = vadd.xlane.f32.xlu1 %v2746_v55  ;;  %v5668_v7 = vsub.f32 %v5559_v58, %v2697_v25 }
 0x5ff   :  { %v2658_v1 = vpop.xlane.xlu0 %2657 }
 0x600   :  { %v2698_v32 = vmul.f32 0.0078125, %v2658_v1  ;;  %v2747_v0 = vmul.f32 %v5668_v7, %v5668_v7 }
 0x602   :  { %v5673_v42 = vsub.f32 %v5563_v56, %v2698_v32  ;;  %2781 = vadd.xlane.f32.xlu0 %v2747_v0 }
 0x604   :  { %v2748_v49 = vmul.f32 %v5673_v42, %v5673_v42 }
 0x605   :  { %v2660_v45 = vpop.xlane.xlu1 %2659 }
 0x606   :  { %v2699_v16 = vmul.f32 0.0078125, %v2660_v45  ;;  %2783 = vadd.xlane.f32.xlu1 %v2748_v49 }
 0x608   :  { %v5678_v9 = vsub.f32 %v5567_v10, %v2699_v16 }
 0x60a   :  { %v2662_v58 = vpop.xlane.xlu0 %2661  ;;  %v2749_v19 = vmul.f32 %v5678_v9, %v5678_v9 }
 0x60b   :  { %v2700_v60 = vmul.f32 0.0078125, %v2662_v58 }
 0x60c   :  { %2785 = vadd.xlane.f32.xlu0 %v2749_v19 }
 0x60d   :  { %v5683_v36 = vsub.f32 %v5571_v12, %v2700_v60 }
 0x60e   :  { %v2664_v4 = vpop.xlane.xlu1 %2663 }
 0x60f   :  { %v2750_v56 = vmul.f32 %v5683_v36, %v5683_v36  ;;  %v2701_v20 = vmul.f32 0.0078125, %v2664_v4 }
 0x611   :  { %2787 = vadd.xlane.f32.xlu1 %v2750_v56  ;;  %v5688_v41 = vsub.f32 %v5575_v57, %v2701_v20 }
 0x613   :  { %v2751_v10 = vmul.f32 %v5688_v41, %v5688_v41 }
 0x615   :  { %2789 = vadd.xlane.f32.xlu0 %v2751_v10 }
 0x616   :  { %v2666_v15 = vpop.xlane.xlu0 %2665 }
 0x617   :  { %v2702_v38 = vmul.f32 0.0078125, %v2666_v15 }
 0x619   :  { %v5693_v62 = vsub.f32 %v5579_v6, %v2702_v38 }
 0x61a   :  { %v2668_v12 = vpop.xlane.xlu1 %2667 }
 0x61b   :  { %v2703_v30 = vmul.f32 0.0078125, %v2668_v12  ;;  %v2752_v23 = vmul.f32 %v5693_v62, %v5693_v62 }
 0x61d   :  { %v5698_v2 = vsub.f32 %v5583_v52, %v2703_v30  ;;  %2791 = vadd.xlane.f32.xlu1 %v2752_v23 }
 0x61f   :  { %v2670_v57 = vpop.xlane.xlu0 %2669  ;;  %v2753_v11 = vmul.f32 %v5698_v2, %v5698_v2 }
 0x620   :  { %v2704_v61 = vmul.f32 0.0078125, %v2670_v57 }
 0x621   :  { %2793 = vadd.xlane.f32.xlu0 %v2753_v11 }
 0x622   :  { %v5703_v54 = vsub.f32 %v5587_v51, %v2704_v61  ;;  %v6013_v61 = vld [vmem:[#allocation18_spill] sm:$0xff] }
 0x624   :  { %v2754_v6 = vmul.f32 %v5703_v54, %v5703_v54 }
 0x626   :  { %v2672_v17 = vpop.xlane.xlu1 %2671  ;;  %2795 = vadd.xlane.f32.xlu1 %v2754_v6 }
 0x627   :  { %v2705_v27 = vmul.f32 0.0078125, %v2672_v17 }
 0x629   :  { %v5708_v47 = vsub.f32 %v5591_v3, %v2705_v27 }
 0x62a   :  { %v2674_v52 = vpop.xlane.xlu0 %2673 }
 0x62b   :  { %v2706_v40 = vmul.f32 0.0078125, %v2674_v52  ;;  %v2755_v13 = vmul.f32 %v5708_v47, %v5708_v47  ;;  %v3554_v52 = vld [vmem:[%s5894_s2] sm:$0x7]  ;;  %s3696_s2 = smov [#allocation11]  }
 0x62c   :  { %s3026_s9 = sshll.u32 %s3696_s2, 4  ;;  %s3027_s9 = int_to_ptr.vmem [resolvable:$true] %s3026_s9 }
 0x62d   :  { %v5713_v53 = vsub.f32 %v5595_v8, %v2706_v40  ;;  %2797 = vadd.xlane.f32.xlu0 %v2755_v13  ;;  %v5755_v40 = vrot.slane %v3554_v52, %v6012_v34  ;;  %s3655_s10 = scalar_lea.vmem %s3027_s9, 3200  ;;  %p3660_p12 = scmp.lt.s32.totalorder %s3027_s9, %s3027_s9 }
 0x62e   :  { %v2676_v51 = vpop.xlane.xlu1 %2675  ;;  %p3656_p11 = scmp.ne.s32.totalorder %s3027_s9, %s3655_s10  ;;  %p3661_p13 = scmp.lt.s32.totalorder %s3655_s10, %s3655_s10 }
 0x62f   :  { %v2707_v39 = vmul.f32 0.0078125, %v2676_v51  ;;  %v2756_v22 = vmul.f32 %v5713_v53, %v5713_v53  ;;  %v6014_v51 = vld [vmem:[#allocation17_spill] sm:$0xff] }
 0x630   :  { %p3662_p0 = por %p3661_p13, %p3660_p12 }
 0x631   :  { %v5718_v21 = vsub.f32 %v5599_v35, %v2707_v39  ;;  %2799 = vadd.xlane.f32.xlu1 %v2756_v22  ;;  %v5759_v39 = vrot.slane %v5516_v24, %v6014_v51 }
 0x632   :  { %v2678_v3 = vpop.xlane.xlu0 %2677  ;;  %p3663_p1 = pnand %p3662_p0, %p3656_p11 }
 0x633   :  { %v2708_v18 = vmul.f32 0.0078125, %v2678_v3  ;;  %v2757_v50 = vmul.f32 %v5718_v21, %v5718_v21 }
 0x635   :  { %v5723_v55 = vsub.f32 %v5603_v31, %v2708_v18  ;;  %2801 = vadd.xlane.f32.xlu0 %v2757_v50 }
 0x636   :  { %v2680_v8 = vpop.xlane.xlu1 %2679 }
 0x637   :  { %v2709_v25 = vmul.f32 0.0078125, %v2680_v8  ;;  %v2758_v1 = vmul.f32 %v5723_v55, %v5723_v55  ;;  %v6015_v8 = vld [vmem:[#allocation19_spill] sm:$0xff] }
 0x639   :  { %v5728_v32 = vsub.f32 %v5607_v43, %v2709_v25  ;;  %2803 = vadd.xlane.f32.xlu1 %v2758_v1  ;;  %v250_v25 = vadd.f32 %v6015_v8, %v5755_v40 }
 0x63a   :  { %v2682_v35 = vpop.xlane.xlu0 %2681 }
 0x63b   :  { %v2710_v0 = vmul.f32 0.0078125, %v2682_v35  ;;  %v2759_v49 = vmul.f32 %v5728_v32, %v5728_v32 }
 0x63d   :  { %v5733_v45 = vsub.f32 %v5611_v29, %v2710_v0  ;;  %2805 = vadd.xlane.f32.xlu0 %v2759_v49 }
 0x63e   :  { %v2684_v31 = vpop.xlane.xlu1 %2683 }
 0x63f   :  { %v2711_v16 = vmul.f32 0.0078125, %v2684_v31  ;;  %v2760_v58 = vmul.f32 %v5733_v45, %v5733_v45 }
 0x641   :  { %v5738_v19 = vsub.f32 %v5615_v28, %v2711_v16  ;;  %2807 = vadd.xlane.f32.xlu1 %v2760_v58 }
 0x642   :  { %v2686_v43 = vpop.xlane.xlu0 %2685 }
 0x643   :  { %v2712_v60 = vmul.f32 0.0078125, %v2686_v43  ;;  %v2761_v56 = vmul.f32 %v5738_v19, %v5738_v19 }
 0x645   :  { %v5743_v4 = vsub.f32 %v5619_v5, %v2712_v60  ;;  %2809 = vadd.xlane.f32.xlu0 %v2761_v56  ;;  %v5749_v5 = vrot.slane %v5516_v24, %v6013_v61 }
 0x647   :  { %v2762_v29 = vmul.f32 %v5743_v4, %v5743_v4 }
 0x649   :  { %2811 = vadd.xlane.f32.xlu1 %v2762_v29 }
 0x65f   :  { %v2764_v20 = vpop.xlane.xlu1 %2763 }
 0x660   :  { %v2813_v10 = vmul.f32 0.0078125, %v2764_v20 }
 0x662   :  { %v2838_v15 = vadd.f32 1e-05, %v2813_v10 }
 0x664   :  { %3502 = vrsqrt.f32 %v2838_v15 }
 0x665   :  { %v2766_v28 = vpop.xlane.xlu0 %2765 }
 0x666   :  { %v2814_v38 = vmul.f32 0.0078125, %v2766_v28 }
 0x668   :  { %v2839_v12 = vadd.f32 1e-05, %v2814_v38 }
 0x669   :  { %v2768_v30 = vpop.xlane.xlu1 %2767 }
 0x66a   :  { %3504 = vrsqrt.f32 %v2839_v12  ;;  %v2815_v23 = vmul.f32 0.0078125, %v2768_v30  ;;  %v6017_v12 = vld [vmem:[#allocation21_spill] sm:$0xff] }
 0x66c   :  { %v2840_v57 = vadd.f32 1e-05, %v2815_v23 }
 0x66d   :  { %v2770_v11 = vpop.xlane.xlu0 %2769 }
 0x66e   :  { %3506 = vrsqrt.f32 %v2840_v57  ;;  %v2816_v6 = vmul.f32 0.0078125, %v2770_v11 }
 0x670   :  { %v2841_v17 = vadd.f32 1e-05, %v2816_v6 }
 0x671   :  { %v3503_v27 = vpop.eup %3502  ;;  %v2772_v13 = vpop.xlane.xlu1 %2771 }
 0x672   :  { %v2892_v22 = vmul.f32 %v3503_v27, %v5749_v5  ;;  %3508 = vrsqrt.f32 %v2841_v17  ;;  %v2817_v3 = vmul.f32 0.0078125, %v2772_v13  ;;  %v6018_v17 = vld [vmem:[#allocation22_spill] sm:$0xff] }
 0x673   :  { %v268_v27 = vadd.f32 %v6018_v17, %v5755_v40 }
 0x674   :  { %v2917_v18 = vmul.f32 %v2892_v22, %v5623_v48  ;;  %v2842_v50 = vadd.f32 1e-05, %v2817_v3  ;;  %v6016_v48 = vld [vmem:[#allocation20_spill] sm:$0xff] }
 0x675   :  { %v256_v43 = vadd.f32 %v6016_v48, %v5755_v40 }
 0x676   :  { %v2946_v1 = vadd.f32 %v5759_v39, %v2917_v18  ;;  %3510 = vrsqrt.f32 %v2842_v50  ;;  %v6019_v50 = vld [vmem:[#allocation23_spill] sm:$0xff] }
 0x677   :  { %v3505_v34 = vpop.eup %3504  ;;  %v2774_v49 = vpop.xlane.xlu0 %2773  ;;  %v274_v8 = vadd.f32 %v6019_v50, %v5755_v40 }
 0x678   :  { %v2971_v35 = vadd.f32 %v2946_v1, %v250_v25  ;;  %v2893_v0 = vmul.f32 %v3505_v34, %v5749_v5  ;;  %v2818_v24 = vmul.f32 0.0078125, %v2774_v49 }
 0x67a   :  { %2996 = vst [vmem:[#allocation11] sm:$0xff] %v2971_v35  ;;  %v2918_v31 = vmul.f32 %v2893_v0, %v5628_v44  ;;  %v2843_v58 = vadd.f32 1e-05, %v2818_v24  ;;  %v262_v44 = vadd.f32 %v6017_v12, %v5755_v40 }
 0x67b   :  { %v3507_v16 = vpop.eup %3506  ;;  %v2776_v29 = vpop.xlane.xlu1 %2775 }
 0x67c   :  { %v2947_v60 = vadd.f32 %v5759_v39, %v2918_v31  ;;  %v2894_v56 = vmul.f32 %v3507_v16, %v5749_v5  ;;  %3512 = vrsqrt.f32 %v2843_v58  ;;  %v2819_v20 = vmul.f32 0.0078125, %v2776_v29  ;;  %v6020_v16 = vld [vmem:[#allocation24_spill] sm:$0xff] }
 0x67d   :  { %v280_v58 = vadd.f32 %v6020_v16, %v5755_v40 }
 0x67e   :  { %v2972_v10 = vadd.f32 %v2947_v60, %v256_v43  ;;  %v2919_v15 = vmul.f32 %v2894_v56, %v5633_v63  ;;  %v2844_v38 = vadd.f32 1e-05, %v2819_v20 }
 0x67f   :  { %v3509_v28 = vpop.eup %3508 }
 0x680   :  { %2997 = vst [vmem:[#allocation11 + $0x8] sm:$0xff] %v2972_v10  ;;  %v2948_v30 = vadd.f32 %v5759_v39, %v2919_v15  ;;  %v2895_v23 = vmul.f32 %v3509_v28, %v5749_v5  ;;  %3514 = vrsqrt.f32 %v2844_v38  ;;  %v6021_v15 = vld [vmem:[#allocation25_spill] sm:$0xff] }
 0x681   :  { %v286_v28 = vadd.f32 %v6021_v15, %v5755_v40 }
 0x682   :  { %v2973_v57 = vadd.f32 %v2948_v30, %v262_v44  ;;  %v2920_v11 = vmul.f32 %v2895_v23, %v5638_v59 }
 0x683   :  { %v3511_v61 = vpop.eup %3510  ;;  %v2778_v6 = vpop.xlane.xlu0 %2777 }
 0x684   :  { %2998 = vst [vmem:[#allocation11 + $0x10] sm:$0xff] %v2973_v57  ;;  %v2949_v63 = vadd.f32 %v5759_v39, %v2920_v11  ;;  %v2896_v52 = vmul.f32 %v3511_v61, %v5749_v5  ;;  %v2820_v13 = vmul.f32 0.0078125, %v2778_v6  ;;  %v6022_v6 = vld [vmem:[#allocation26_spill] sm:$0xff] }
 0x685   :  { %v292_v17 = vadd.f32 %v6022_v6, %v5755_v40 }
 0x686   :  { %v2974_v51 = vadd.f32 %v2949_v63, %v268_v27  ;;  %v2921_v22 = vmul.f32 %v2896_v52, %v5643_v14  ;;  %v2845_v3 = vadd.f32 1e-05, %v2820_v13 }
 0x687   :  { %v2780_v18 = vpop.xlane.xlu1 %2779 }
 0x688   :  { %2999 = vst [vmem:[#allocation11 + $0x18] sm:$0xff] %v2974_v51  ;;  %v2950_v59 = vadd.f32 %v5759_v39, %v2921_v22  ;;  %3516 = vrsqrt.f32 %v2845_v3  ;;  %v2821_v25 = vmul.f32 0.0078125, %v2780_v18  ;;  %v6023_v18 = vld [vmem:[#allocation27_spill] sm:$0xff] }
 0x689   :  { %v3513_v1 = vpop.eup %3512  ;;  %v298_v50 = vadd.f32 %v6023_v18, %v5755_v40 }
 0x68a   :  { %v2975_v34 = vadd.f32 %v2950_v59, %v274_v8  ;;  %v2846_v35 = vadd.f32 1e-05, %v2821_v25  ;;  %v2897_v0 = vmul.f32 %v3513_v1, %v5749_v5 }
 0x68b   :  { %v2782_v49 = vpop.xlane.xlu0 %2781 }
 0x68c   :  { %3000 = vst [vmem:[#allocation11 + $0x20] sm:$0xff] %v2975_v34  ;;  %3518 = vrsqrt.f32 %v2846_v35  ;;  %v2922_v14 = vmul.f32 %v2897_v0, %v5648_v26  ;;  %v2822_v24 = vmul.f32 0.0078125, %v2782_v49 }
 0x68d   :  { %v3515_v31 = vpop.eup %3514 }
 0x68e   :  { %v2951_v48 = vadd.f32 %v5759_v39, %v2922_v14  ;;  %v2898_v43 = vmul.f32 %v3515_v31, %v5749_v5  ;;  %v2847_v60 = vadd.f32 1e-05, %v2822_v24 }
 0x68f   :  { %v2784_v56 = vpop.xlane.xlu1 %2783 }
 0x690   :  { %v2976_v29 = vadd.f32 %v2951_v48, %v280_v58  ;;  %v2923_v20 = vmul.f32 %v2898_v43, %v5653_v33  ;;  %3520 = vrsqrt.f32 %v2847_v60  ;;  %v2823_v10 = vmul.f32 0.0078125, %v2784_v56  ;;  %v6025_v48 = vld [vmem:[#allocation29_spill] sm:$0xff] }
 0x691   :  { %v310_v43 = vadd.f32 %v6025_v48, %v5755_v40 }
 0x692   :  { %3001 = vst [vmem:[#allocation11 + $0x28] sm:$0xff] %v2976_v29  ;;  %v2952_v26 = vadd.f32 %v5759_v39, %v2923_v20  ;;  %v2848_v38 = vadd.f32 1e-05, %v2823_v10 }
 0x694   :  { %v2977_v44 = vadd.f32 %v2952_v26, %v286_v28  ;;  %3522 = vrsqrt.f32 %v2848_v38 }
 0x695   :  { %v3517_v12 = vpop.eup %3516  ;;  %v2786_v23 = vpop.xlane.xlu0 %2785 }
 0x696   :  { %v2899_v30 = vmul.f32 %v3517_v12, %v5749_v5  ;;  %3002 = vst [vmem:[#allocation11 + $0x30] sm:$0xff] %v2977_v44  ;;  %v2824_v57 = vmul.f32 0.0078125, %v2786_v23  ;;  %v6026_v12 = vld [vmem:[#allocation30_spill] sm:$0xff] }
 0x697   :  { %v316_v44 = vadd.f32 %v6026_v12, %v5755_v40 }
 0x698   :  { %v2924_v11 = vmul.f32 %v2899_v30, %v5658_v46  ;;  %v2849_v61 = vadd.f32 1e-05, %v2824_v57 }
 0x699   :  { %v3519_v33 = vpop.eup %3518 }
 0x69a   :  { %v2953_v27 = vadd.f32 %v5759_v39, %v2924_v11  ;;  %v2900_v63 = vmul.f32 %v3519_v33, %v5749_v5  ;;  %3524 = vrsqrt.f32 %v2849_v61  ;;  %v2788_v52 = vpop.xlane.xlu1 %2787 }
 0x69b   :  { %v2825_v22 = vmul.f32 0.0078125, %v2788_v52 }
 0x69c   :  { %v2978_v13 = vadd.f32 %v2953_v27, %v292_v17  ;;  %v2925_v51 = vmul.f32 %v2900_v63, %v5663_v37  ;;  %v6024_v37 = vld [vmem:[#allocation28_spill] sm:$0xff] }
 0x69d   :  { %v3521_v3 = vpop.eup %3520  ;;  %v2850_v8 = vadd.f32 1e-05, %v2825_v22  ;;  %v304_v49 = vadd.f32 %v6024_v37, %v5755_v40 }
 0x69e   :  { %3003 = vst [vmem:[#allocation11 + $0x38] sm:$0xff] %v2978_v13  ;;  %v2954_v46 = vadd.f32 %v5759_v39, %v2925_v51  ;;  %v2901_v59 = vmul.f32 %v3521_v3, %v5749_v5  ;;  %v2790_v34 = vpop.xlane.xlu0 %2789 }
 0x69f   :  { %3526 = vrsqrt.f32 %v2850_v8  ;;  %v2826_v0 = vmul.f32 0.0078125, %v2790_v34 }
 0x6a0   :  { %v2979_v25 = vadd.f32 %v2954_v46, %v298_v50  ;;  %v2926_v1 = vmul.f32 %v2901_v59, %v5668_v7 }
 0x6a1   :  { %v3523_v35 = vpop.eup %3522  ;;  %v2851_v31 = vadd.f32 1e-05, %v2826_v0 }
 0x6a2   :  { %3004 = vst [vmem:[#allocation11 + $0x40] sm:$0xff] %v2979_v25  ;;  %v2955_v14 = vadd.f32 %v5759_v39, %v2926_v1  ;;  %v2902_v24 = vmul.f32 %v3523_v35, %v5749_v5 }
 0x6a3   :  { %3528 = vrsqrt.f32 %v2851_v31 }
 0x6a4   :  { %v2980_v16 = vadd.f32 %v2955_v14, %v304_v49  ;;  %v2927_v58 = vmul.f32 %v2902_v24, %v5673_v42 }
 0x6a6   :  { %3005 = vst [vmem:[#allocation11 + $0x48] sm:$0xff] %v2980_v16  ;;  %v2956_v7 = vadd.f32 %v5759_v39, %v2927_v58  ;;  %v2792_v60 = vpop.xlane.xlu1 %2791 }
 0x6a7   :  { %v3525_v56 = vpop.eup %3524  ;;  %v2827_v29 = vmul.f32 0.0078125, %v2792_v60 }
 0x6a8   :  { %v2981_v20 = vadd.f32 %v2956_v7, %v310_v43  ;;  %v2903_v10 = vmul.f32 %v3525_v56, %v5749_v5 }
 0x6a9   :  { %v2852_v15 = vadd.f32 1e-05, %v2827_v29 }
 0x6aa   :  { %3006 = vst [vmem:[#allocation11 + $0x50] sm:$0xff] %v2981_v20  ;;  %v2928_v28 = vmul.f32 %v2903_v10, %v5678_v9  ;;  %v2794_v26 = vpop.xlane.xlu0 %2793  ;;  %v6027_v9 = vld [vmem:[#allocation31_spill] sm:$0xff] }
 0x6ab   :  { %3530 = vrsqrt.f32 %v2852_v15  ;;  %v2828_v42 = vmul.f32 0.0078125, %v2794_v26  ;;  %v322_v17 = vadd.f32 %v6027_v9, %v5755_v40 }
 0x6ac   :  { %v3527_v38 = vpop.eup %3526  ;;  %v2957_v30 = vadd.f32 %v5759_v39, %v2928_v28 }
 0x6ad   :  { %v2904_v23 = vmul.f32 %v3527_v38, %v5749_v5  ;;  %v2853_v57 = vadd.f32 1e-05, %v2828_v42  ;;  %v6031_v42 = vld [vmem:[#allocation35_spill] sm:$0xff] }
 0x6ae   :  { %v2982_v11 = vadd.f32 %v2957_v30, %v316_v44  ;;  %v346_v38 = vadd.f32 %v6031_v42, %v5755_v40 }
 0x6af   :  { %v2929_v33 = vmul.f32 %v2904_v23, %v5683_v36  ;;  %3532 = vrsqrt.f32 %v2853_v57  ;;  %v2796_v61 = vpop.xlane.xlu1 %2795  ;;  %v6028_v36 = vld [vmem:[#allocation32_spill] sm:$0xff] }
 0x6b0   :  { %3007 = vst [vmem:[#allocation11 + $0x58] sm:$0xff] %v2982_v11  ;;  %v2829_v6 = vmul.f32 0.0078125, %v2796_v61  ;;  %v3529_v63 = vpop.eup %3528  ;;  %v328_v18 = vadd.f32 %v6028_v36, %v5755_v40 }
 0x6b1   :  { %v2958_v27 = vadd.f32 %v5759_v39, %v2929_v33  ;;  %v2905_v51 = vmul.f32 %v3529_v63, %v5749_v5 }
 0x6b2   :  { %v2854_v52 = vadd.f32 1e-05, %v2829_v6 }
 0x6b3   :  { %v2983_v13 = vadd.f32 %v2958_v27, %v322_v17  ;;  %v2930_v22 = vmul.f32 %v2905_v51, %v5688_v41  ;;  %v6029_v41 = vld [vmem:[#allocation33_spill] sm:$0xff]  ;;  %v6032_v17 = vld [vmem:[#allocation36_spill] sm:$0xff] }
 0x6b4   :  { %3534 = vrsqrt.f32 %v2854_v52  ;;  %v334_v49 = vadd.f32 %v6029_v41, %v5755_v40  ;;  %v352_v27 = vadd.f32 %v6032_v17, %v5755_v40 }
 0x6b5   :  { %3008 = vst [vmem:[#allocation11 + $0x60] sm:$0xff] %v2983_v13  ;;  %v2959_v50 = vadd.f32 %v5759_v39, %v2930_v22 }
 0x6b6   :  { %v2798_v3 = vpop.xlane.xlu0 %2797 }
 0x6b7   :  { %v2830_v46 = vmul.f32 0.0078125, %v2798_v3  ;;  %v2984_v59 = vadd.f32 %v2959_v50, %v328_v18 }
 0x6b8   :  { %v3531_v8 = vpop.eup %3530 }
 0x6b9   :  { %v2906_v25 = vmul.f32 %v3531_v8, %v5749_v5  ;;  %v2855_v1 = vadd.f32 1e-05, %v2830_v46  ;;  %3009 = vst [vmem:[#allocation11 + $0x68] sm:$0xff] %v2984_v59 }
 0x6ba   :  { %v2800_v34 = vpop.xlane.xlu1 %2799 }
 0x6bb   :  { %v2931_v35 = vmul.f32 %v2906_v25, %v5693_v62  ;;  %3536 = vrsqrt.f32 %v2855_v1  ;;  %v2831_v0 = vmul.f32 0.0078125, %v2800_v34  ;;  %v6030_v62 = vld [vmem:[#allocation34_spill] sm:$0xff] }
 0x6bc   :  { %v3533_v37 = vpop.eup %3532  ;;  %v340_v60 = vadd.f32 %v6030_v62, %v5755_v40 }
 0x6bd   :  { %v2960_v14 = vadd.f32 %v5759_v39, %v2931_v35  ;;  %v2907_v24 = vmul.f32 %v3533_v37, %v5749_v5  ;;  %v2856_v31 = vadd.f32 1e-05, %v2831_v0 }
 0x6be   :  { %v2802_v16 = vpop.xlane.xlu0 %2801 }
 0x6bf   :  { %v2985_v58 = vadd.f32 %v2960_v14, %v334_v49  ;;  %v2932_v48 = vmul.f32 %v2907_v24, %v5698_v2  ;;  %3538 = vrsqrt.f32 %v2856_v31  ;;  %v2832_v43 = vmul.f32 0.0078125, %v2802_v16 }
 0x6c1   :  { %v3535_v7 = vpop.eup %3534  ;;  %3010 = vst [vmem:[#allocation11 + $0x70] sm:$0xff] %v2985_v58  ;;  %v2961_v56 = vadd.f32 %v5759_v39, %v2932_v48  ;;  %v2857_v29 = vadd.f32 1e-05, %v2832_v43  ;;  %v6035_v58 = vld [vmem:[#allocation39_spill] sm:$0xff] }
 0x6c2   :  { %v2908_v20 = vmul.f32 %v3535_v7, %v5749_v5  ;;  %v2804_v10 = vpop.xlane.xlu1 %2803 }
 0x6c3   :  { %v2986_v15 = vadd.f32 %v2961_v56, %v340_v60  ;;  %3540 = vrsqrt.f32 %v2857_v29  ;;  %v2833_v28 = vmul.f32 0.0078125, %v2804_v10  ;;  %v6036_v56 = vld [vmem:[#allocation40_spill] sm:$0xff] }
 0x6c4   :  { %v2933_v26 = vmul.f32 %v2908_v20, %v5703_v54  ;;  %v376_v29 = vadd.f32 %v6036_v56, %v5755_v40 }
 0x6c5   :  { %3011 = vst [vmem:[#allocation11 + $0x78] sm:$0xff] %v2986_v15  ;;  %v2858_v2 = vadd.f32 1e-05, %v2833_v28 }
 0x6c6   :  { %v2962_v12 = vadd.f32 %v5759_v39, %v2933_v26  ;;  %v2806_v44 = vpop.xlane.xlu0 %2805  ;;  %v6037_v26 = vld [vmem:[#allocation41_spill] sm:$0xff] }
 0x6c7   :  { %3542 = vrsqrt.f32 %v2858_v2  ;;  %v2834_v30 = vmul.f32 0.0078125, %v2806_v44  ;;  %v382_v2 = vadd.f32 %v6037_v26, %v5755_v40 }
 0x6c8   :  { %v3537_v23 = vpop.eup %3536  ;;  %v2987_v57 = vadd.f32 %v2962_v12, %v346_v38 }
 0x6c9   :  { %v2909_v11 = vmul.f32 %v3537_v23, %v5749_v5  ;;  %v2859_v33 = vadd.f32 1e-05, %v2834_v30  ;;  %v6038_v30 = vld [vmem:[#allocation42_spill] sm:$0xff] }
 0x6ca   :  { %3012 = vst [vmem:[#allocation11 + $0x80] sm:$0xff] %v2987_v57  ;;  %v2808_v61 = vpop.xlane.xlu1 %2807  ;;  %v388_v23 = vadd.f32 %v6038_v30, %v5755_v40 }
 0x6cb   :  { %v2934_v6 = vmul.f32 %v2909_v11, %v5708_v47  ;;  %3544 = vrsqrt.f32 %v2859_v33  ;;  %v2835_v54 = vmul.f32 0.0078125, %v2808_v61  ;;  %v6033_v47 = vld [vmem:[#allocation37_spill] sm:$0xff]  ;;  %v6039_v61 = vld [vmem:[#allocation43_spill] sm:$0xff] }
 0x6cc   :  { %v3539_v9 = vpop.eup %3538  ;;  %v358_v50 = vadd.f32 %v6033_v47, %v5755_v40 }
 0x6cd   :  { %v2963_v63 = vadd.f32 %v5759_v39, %v2934_v6  ;;  %v2910_v52 = vmul.f32 %v3539_v9, %v5749_v5  ;;  %v2860_v13 = vadd.f32 1e-05, %v2835_v54  ;;  %v394_v6 = vadd.f32 %v6039_v61, %v5755_v40 }
 0x6ce   :  { %v2810_v51 = vpop.xlane.xlu0 %2809 }
 0x6cf   :  { %v2988_v22 = vadd.f32 %v2963_v63, %v352_v27  ;;  %v2935_v3 = vmul.f32 %v2910_v52, %v5713_v53  ;;  %3546 = vrsqrt.f32 %v2860_v13  ;;  %v2836_v36 = vmul.f32 0.0078125, %v2810_v51  ;;  %v6034_v53 = vld [vmem:[#allocation38_spill] sm:$0xff] }
 0x6d0   :  { %v3541_v18 = vpop.eup %3540  ;;  %v364_v37 = vadd.f32 %v6034_v53, %v5755_v40 }
 0x6d1   :  { %3013 = vst [vmem:[#allocation11 + $0x88] sm:$0xff] %v2988_v22  ;;  %v2964_v46 = vadd.f32 %v5759_v39, %v2935_v3  ;;  %v2911_v8 = vmul.f32 %v3541_v18, %v5749_v5  ;;  %v2861_v59 = vadd.f32 1e-05, %v2836_v36 }
 0x6d2   :  { %v2812_v25 = vpop.xlane.xlu1 %2811 }
 0x6d3   :  { %v2989_v1 = vadd.f32 %v2964_v46, %v358_v50  ;;  %v2936_v34 = vmul.f32 %v2911_v8, %v5718_v21  ;;  %3548 = vrsqrt.f32 %v2861_v59  ;;  %v2837_v35 = vmul.f32 0.0078125, %v2812_v25 }
 0x6d4   :  { %v3543_v0 = vpop.eup %3542  ;;  %v370_v21 = vadd.f32 %v6035_v58, %v5755_v40 }
 0x6d5   :  { %3014 = vst [vmem:[#allocation11 + $0x90] sm:$0xff] %v2989_v1  ;;  %v2965_v41 = vadd.f32 %v5759_v39, %v2936_v34  ;;  %v2912_v49 = vmul.f32 %v3543_v0, %v5749_v5  ;;  %v2862_v14 = vadd.f32 1e-05, %v2837_v35 }
 0x6d7   :  { %v2990_v24 = vadd.f32 %v2965_v41, %v364_v37  ;;  %v2937_v31 = vmul.f32 %v2912_v49, %v5723_v55  ;;  %3550 = vrsqrt.f32 %v2862_v14 }
 0x6d8   :  { %v3545_v16 = vpop.eup %3544 }
 0x6d9   :  { %3015 = vst [vmem:[#allocation11 + $0x98] sm:$0xff] %v2990_v24  ;;  %v2966_v48 = vadd.f32 %v5759_v39, %v2937_v31  ;;  %v2913_v43 = vmul.f32 %v3545_v16, %v5749_v5 }
 0x6db   :  { %v2991_v7 = vadd.f32 %v2966_v48, %v370_v21  ;;  %v2938_v62 = vmul.f32 %v2913_v43, %v5728_v32 }
 0x6dc   :  { %v3547_v60 = vpop.eup %3546 }
 0x6dd   :  { %3016 = vst [vmem:[#allocation11 + $0xa0] sm:$0xff] %v2991_v7  ;;  %v2967_v55 = vadd.f32 %v5759_v39, %v2938_v62  ;;  %v2914_v20 = vmul.f32 %v3547_v60, %v5749_v5 }
 0x6df   :  { %v2992_v10 = vadd.f32 %v2967_v55, %v376_v29  ;;  %v2939_v15 = vmul.f32 %v2914_v20, %v5733_v45 }
 0x6e0   :  { %v3549_v28 = vpop.eup %3548 }
 0x6e1   :  { %3017 = vst [vmem:[#allocation11 + $0xa8] sm:$0xff] %v2992_v10  ;;  %v2968_v42 = vadd.f32 %v5759_v39, %v2939_v15  ;;  %v2915_v32 = vmul.f32 %v3549_v28, %v5749_v5 }
 0x6e3   :  { %v2993_v38 = vadd.f32 %v2968_v42, %v382_v2  ;;  %v2940_v12 = vmul.f32 %v2915_v32, %v5738_v19 }
 0x6e4   :  { %v3551_v44 = vpop.eup %3550 }
 0x6e5   :  { %3018 = vst [vmem:[#allocation11 + $0xb0] sm:$0xff] %v2993_v38  ;;  %v2969_v57 = vadd.f32 %v5759_v39, %v2940_v12  ;;  %v2916_v45 = vmul.f32 %v3551_v44, %v5749_v5 }
 0x6e7   :  { %v2994_v11 = vadd.f32 %v2969_v57, %v388_v23  ;;  %v2941_v33 = vmul.f32 %v2916_v45, %v5743_v4 }
 0x6e9   :  { %3019 = vst [vmem:[#allocation11 + $0xb8] sm:$0xff] %v2994_v11  ;;  %v2970_v19 = vadd.f32 %v5759_v39, %v2941_v33 }
 0x6eb   :  { %v2995_v54 = vadd.f32 %v2970_v19, %v394_v6 }
 0x6ed   :  { %3020 = vst [vmem:[#allocation11 + $0xc0] sm:$0xff] %v2995_v54 }
 0x6ee   :  { %3666 = shalt.err (!%p3663_p1)
}
 0x6ef   :  { %3032 = dma.vmem_to_hbm [thread:$0]  %s3027_s9, 3200, %s5899_s7, [#allocation4], %s3688_s13, %s3688_s13, %s3689_s14  }
 0x6f0   :  { %3681 = dma.done.wait [#allocation4], 3200  }
 0x6f1   :  { %3682 = vsyncadd [#allocation4], 4294964096 }
 0x6f2   :  { %3036 = vsyncpa [#allocation3], 1 }
 0x6f3   :  { %3037 = vsyncpa [#allocation6], 1 }
 0x6f4   :  { %3038 = vsyncpa [#allocation9], 1 }
 0x6f5   :  { %3039 = vsyncpa [#allocation4], 1 }

</bundles_post_ra>
